<compile_context>
chip_gen: v5e
topology: v5e:2x2
jax: 0.10.0
libtpu: 0.0.40
codegen_flags: <defaults>
</compile_context>

<pallas_src>
import functools

import jax
import jax.numpy as jnp
from jax.experimental import pallas as pl
from jax.experimental.pallas import tpu as pltpu

NUM_HEADS = 4
_BF16 = jnp.bfloat16


# --------------------------------------------------------------------------
# In-kernel helpers (traced inside the Pallas kernel)
# --------------------------------------------------------------------------

def _layer_norm(x, g, b, eps):
    # Single reduction pass: var = E[x^2] - E[x]^2.
    m = jnp.mean(x, axis=-1, keepdims=True)
    m2 = jnp.mean(x * x, axis=-1, keepdims=True)
    var = m2 - m * m
    return (x - m) * jax.lax.rsqrt(var + eps) * g + b


def _mha(q_in, k_in, v_in, wqkv, bqkv, wo, bo, num_heads):
    """Multi-head attention on 2-D slabs, fused projections across heads.

    q_in: [Sq, D], k_in/v_in: [Sk, D] (f32).
    wqkv: [3, D, H*dh] bf16, bqkv: [3, 1, H*dh] f32,
    wo:   [H*dh, D]   bf16, bo:   [1, D]        f32.
    One matmul per Q/K/V projection (N = H*dh fills the MXU lane width),
    per-head score/PV dots on static lane slices, then one fused output
    projection over the concatenated head outputs.
    """
    hdh = wqkv.shape[-1]
    dh = hdh // num_heads
    scale = 1.0 / float(dh) ** 0.5

    q_all = jnp.dot(q_in.astype(_BF16), wqkv[0],
                    preferred_element_type=jnp.float32) + bqkv[0]
    k_all = jnp.dot(k_in.astype(_BF16), wqkv[1],
                    preferred_element_type=jnp.float32) + bqkv[1]
    v_all = jnp.dot(v_in.astype(_BF16), wqkv[2],
                    preferred_element_type=jnp.float32) + bqkv[2]

    heads = []
    # TODO(synk): at real RT-DETR sizes (S=6400, dh=64) replace this static
    # unroll with a grid axis / fori_loop over heads plus flash-style Sq/Sk
    # tiling + online softmax (the [S,S] score slab does not fit VMEM).
    for h in range(num_heads):
        sl = slice(h * dh, (h + 1) * dh)
        # scores = q_h @ k_h.T  (A·Bᵀ dot_general, Sk in the lane axis)
        s = jax.lax.dot_general(q_all[:, sl].astype(_BF16),
                                k_all[:, sl].astype(_BF16),
                                (((1,), (1,)), ((), ())),
                                preferred_element_type=jnp.float32) * scale
        s = s - jnp.max(s, axis=-1, keepdims=True)
        p = jnp.exp(s)
        p = p * pl.reciprocal(jnp.sum(p, axis=-1, keepdims=True), approx=True)
        heads.append(jnp.dot(p.astype(_BF16), v_all[:, sl].astype(_BF16),
                             preferred_element_type=jnp.float32))
    o = jnp.concatenate(heads, axis=-1)                       # [Sq, H*dh]
    return jnp.dot(o.astype(_BF16), wo,
                   preferred_element_type=jnp.float32) + bo


def _ffn(x, w1, b1, w2, b2):
    f = jnp.maximum(
        jnp.dot(x.astype(_BF16), w1, preferred_element_type=jnp.float32) + b1,
        0.0)
    return jnp.dot(f.astype(_BF16), w2, preferred_element_type=jnp.float32) + b2


# --------------------------------------------------------------------------
# Fully fused kernel: backbone conv + AIFI encoder + decoder + heads
# (one grid point per batch element)
# --------------------------------------------------------------------------

def _rtdetr_fused_kernel(
        patches_ref, pos_ref, conv_w_ref, conv_b_ref,
        e_wqkv_ref, e_bqkv_ref, e_wo_ref, e_bo_ref,
        e_ln1_g_ref, e_ln1_b_ref,
        e_ffn_w1_ref, e_ffn_b1_ref, e_ffn_w2_ref, e_ffn_b2_ref,
        e_ln2_g_ref, e_ln2_b_ref,
        query_ref, qpos_ref,
        sa_wqkv_ref, sa_bqkv_ref, sa_wo_ref, sa_bo_ref,
        d_ln1_g_ref, d_ln1_b_ref,
        ca_wqkv_ref, ca_bqkv_ref, ca_wo_ref, ca_bo_ref,
        d_ln2_g_ref, d_ln2_b_ref,
        d_ffn_w1_ref, d_ffn_b1_ref, d_ffn_w2_ref, d_ffn_b2_ref,
        d_ln3_g_ref, d_ln3_b_ref,
        head_w_ref, head_b_ref, bbox_w2_ref, bbox_b2_ref,
        out_ref,
        *, num_heads, num_classes, eps):
    # ---- backbone: 3x3/2 conv as a matmul over im2col patches + ReLU
    feat = jnp.dot(patches_ref[0].astype(_BF16), conv_w_ref[...],
                   preferred_element_type=jnp.float32) + conv_b_ref[...]
    feat = jnp.maximum(feat, 0.0)                              # [S, D] f32

    # ---- AIFI encoder layer: pos added to Q/K only, V projected from feat
    qk = feat + pos_ref[...]
    attn = _mha(qk, qk, feat,
                e_wqkv_ref[...], e_bqkv_ref[...], e_wo_ref[...], e_bo_ref[...],
                num_heads)
    h1 = _layer_norm(feat + attn, e_ln1_g_ref[...], e_ln1_b_ref[...], eps)
    f = _ffn(h1, e_ffn_w1_ref[...], e_ffn_b1_ref[...],
             e_ffn_w2_ref[...], e_ffn_b2_ref[...])
    memory = _layer_norm(h1 + f, e_ln2_g_ref[...], e_ln2_b_ref[...], eps)

    # ---- decoder layer (query pos embed on Q/K of self-attn, Q of cross-attn)
    tgt = query_ref[...]                                       # [Q, D]
    qpos = qpos_ref[...]
    sa = _mha(tgt + qpos, tgt + qpos, tgt,
              sa_wqkv_ref[...], sa_bqkv_ref[...], sa_wo_ref[...], sa_bo_ref[...],
              num_heads)
    t1 = _layer_norm(tgt + sa, d_ln1_g_ref[...], d_ln1_b_ref[...], eps)

    ca = _mha(t1 + qpos, memory, memory,
              ca_wqkv_ref[...], ca_bqkv_ref[...], ca_wo_ref[...], ca_bo_ref[...],
              num_heads)
    t2 = _layer_norm(t1 + ca, d_ln2_g_ref[...], d_ln2_b_ref[...], eps)

    f2 = _ffn(t2, d_ffn_w1_ref[...], d_ffn_b1_ref[...],
              d_ffn_w2_ref[...], d_ffn_b2_ref[...])
    t3 = _layer_norm(t2 + f2, d_ln3_g_ref[...], d_ln3_b_ref[...], eps)

    # ---- prediction heads (class + bbox_fc1 fused in one matmul)
    head = jnp.dot(t3.astype(_BF16), head_w_ref[...],
                   preferred_element_type=jnp.float32) + head_b_ref[...]
    logits = head[:, :num_classes]                             # [Q, NC]
    bh = jnp.maximum(head[:, num_classes:], 0.0)               # [Q, D]
    boxes = jax.nn.sigmoid(
        jnp.dot(bh.astype(_BF16), bbox_w2_ref[...],
                preferred_element_type=jnp.float32) + bbox_b2_ref[...])   # [Q, 4]

    # ---- lane-dense packed output: [logits | boxes | zero pad] -> 128 lanes
    q_n = logits.shape[0]
    pad = out_ref.shape[-1] - num_classes - 4
    packed = jnp.concatenate(
        [logits, boxes, jnp.zeros((q_n, pad), jnp.float32)], axis=-1)
    out_ref[0] = packed.astype(out_ref.dtype)


# --------------------------------------------------------------------------
# pallas_call wrapper
# --------------------------------------------------------------------------

def _rep_spec(arr):
    """BlockSpec covering the whole array, identical at every grid point."""
    zeros = (0,) * arr.ndim
    return pl.BlockSpec(arr.shape, lambda b, _z=zeros: _z)


def _round_up(x, m):
    return (x + m - 1) // m * m


def rtdetr_fused_forward(patches, pos, conv_w, conv_b, pe, pd,
                         num_heads, num_classes):
    """Single fused pallas_call; patches: [B, S, C*kh*kw] f32."""
    B, S, CK = patches.shape
    D = conv_w.shape[1]
    Q = pd["query_embed"].shape[0]
    P = _round_up(num_classes + 4, 128)          # lane-dense packed output width

    ea, sa, ca = pe["attn"], pd["self_attn"], pd["cross_attn"]
    head_w = jnp.concatenate([pd["class_w"], pd["bbox_w1"]], axis=1)   # bf16
    head_b = jnp.concatenate([pd["class_b"], pd["bbox_b1"]], axis=1)   # f32

    args = (patches, pos, conv_w, conv_b,
            ea["wqkv"], ea["bqkv"], ea["wo"], ea["bo"],
            pe["ln1_g"], pe["ln1_b"],
            pe["ffn_w1"], pe["ffn_b1"], pe["ffn_w2"], pe["ffn_b2"],
            pe["ln2_g"], pe["ln2_b"],
            pd["query_embed"], pd["query_pos"],
            sa["wqkv"], sa["bqkv"], sa["wo"], sa["bo"],
            pd["ln1_g"], pd["ln1_b"],
            ca["wqkv"], ca["bqkv"], ca["wo"], ca["bo"],
            pd["ln2_g"], pd["ln2_b"],
            pd["ffn_w1"], pd["ffn_b1"], pd["ffn_w2"], pd["ffn_b2"],
            pd["ln3_g"], pd["ln3_b"],
            head_w, head_b, pd["bbox_w2"], pd["bbox_b2"])

    in_specs = [pl.BlockSpec((1, S, CK), lambda b: (b, 0, 0))] + [
        _rep_spec(t) for t in args[1:]]

    kern = functools.partial(_rtdetr_fused_kernel, num_heads=num_heads,
                             num_classes=num_classes, eps=1e-5)
    # TODO(synk): at real RT-DETR sizes (S=6400, D=256) split encoder/decoder
    # into separate calls, tile Sq/Sk with (8,128)-aligned blocks + online
    # softmax, add a second "parallel" grid axis, and set vmem_limit_bytes
    # against v7x's 64 MiB VMEM.
    packed = pl.pallas_call(
        kern,
        out_shape=jax.ShapeDtypeStruct((B, Q, P), jnp.float32),
        grid=(B,),
        in_specs=in_specs,
        out_specs=pl.BlockSpec((1, Q, P), lambda b: (b, 0, 0)),
        compiler_params=pltpu.CompilerParams(
            dimension_semantics=("parallel",)),
    )(*args)
    return packed


# --------------------------------------------------------------------------
# Glue: im2col, positional embeddings, parameter init
# --------------------------------------------------------------------------

def im2col(x, kh, kw, stride, pad):
    """x: [B, C, H, W] (NCHW) -> patches [B, Ho, Wo, C*kh*kw] (C-major order)."""
    B, C, H, W = x.shape
    xp = jnp.pad(x, ((0, 0), (0, 0), (pad, pad), (pad, pad)))
    Ho = (H + 2 * pad - kh) // stride + 1
    Wo = (W + 2 * pad - kw) // stride + 1
    cols = []
    for i in range(kh):
        for j in range(kw):
            cols.append(xp[:, :, i:i + stride * Ho:stride, j:j + stride * Wo:stride])
    patches = jnp.stack(cols, axis=2)                     # [B, C, kh*kw, Ho, Wo]
    patches = patches.transpose(0, 3, 4, 1, 2)            # [B, Ho, Wo, C, kh*kw]
    return patches.reshape(B, Ho, Wo, C * kh * kw), Ho, Wo


def build_2d_sincos_pos_embed(h, w, dim, temperature=10000.0):
    """AIFI-style 2D sin/cos positional embedding, flattened row-major (h outer)."""
    gh = jnp.arange(h, dtype=jnp.float32)
    gw = jnp.arange(w, dtype=jnp.float32)
    gh, gw = jnp.meshgrid(gh, gw, indexing="ij")
    pos_dim = dim // 4
    omega = jnp.arange(pos_dim, dtype=jnp.float32) / pos_dim
    omega = 1.0 / (temperature ** omega)
    out_h = gh.flatten()[:, None] * omega[None, :]
    out_w = gw.flatten()[:, None] * omega[None, :]
    return jnp.concatenate(
        [jnp.sin(out_h), jnp.cos(out_h), jnp.sin(out_w), jnp.cos(out_w)], axis=1)


def init_params(key, c_in=4, d=32, ffn=64, num_queries=8, num_classes=16,
                num_heads=NUM_HEADS):
    assert d % 4 == 0, "2D sin/cos positional embedding requires d % 4 == 0"
    assert d % num_heads == 0, "model dim must be divisible by num_heads"
    ks = iter(jax.random.split(key, 64))

    def w(shape, scale=0.02):              # f32 weights (non-MXU / reference)
        return jax.random.normal(next(ks), shape, jnp.float32) * scale

    def wb(shape, scale=0.02):             # bf16 MXU weights
        return w(shape, scale).astype(_BF16)

    z = lambda *s: jnp.zeros(s, jnp.float32)
    one = lambda *s: jnp.ones(s, jnp.float32)

    def attn():
        # Fused head-major projections: wqkv[i] is the [D, H*dh] block of the
        # i-th (q/k/v) projection, heads concatenated along the lane axis.
        return {"wqkv": wb((3, d, d)),
                "bqkv": z(3, 1, d),
                "wo": wb((d, d)),
                "bo": z(1, d)}

    return {
        # backbone: one 3x3 stride-2 conv (PyTorch weight layout [Cout,Cin,kh,kw])
        "backbone": {"conv_w": w((d, c_in, 3, 3)), "conv_b": z(1, d)},
        # encoder: one AIFI transformer encoder layer
        "encoder": {
            "attn": attn(),
            "ln1_g": one(1, d), "ln1_b": z(1, d),
            "ffn_w1": wb((d, ffn)), "ffn_b1": z(1, ffn),
            "ffn_w2": wb((ffn, d)), "ffn_b2": z(1, d),
            "ln2_g": one(1, d), "ln2_b": z(1, d),
        },
        # decoder: learned queries, self-attn, cross-attn, FFN, prediction heads
        "decoder": {
            "query_embed": w((num_queries, d)),
            "query_pos": w((num_queries, d)),
            "self_attn": attn(),
            "ln1_g": one(1, d), "ln1_b": z(1, d),
            "cross_attn": attn(),
            "ln2_g": one(1, d), "ln2_b": z(1, d),
            "ffn_w1": wb((d, ffn)), "ffn_b1": z(1, ffn),
            "ffn_w2": wb((ffn, d)), "ffn_b2": z(1, d),
            "ln3_g": one(1, d), "ln3_b": z(1, d),
            "class_w": wb((d, num_classes)), "class_b": z(1, num_classes),
            "bbox_w1": wb((d, d)), "bbox_b1": z(1, d),
            "bbox_w2": wb((d, 4)), "bbox_b2": z(1, 4),
        },
    }


# --------------------------------------------------------------------------
# RTDETR.forward : x -> backbone -> encoder -> decoder -> dict
# --------------------------------------------------------------------------

def rtdetr_forward(params, x):
    # TODO(synk): the multi-scale F.interpolate branch is training-only
    # (`self.multi_scale and self.training`); this implements the eval/deploy
    # forward, matching the deployed model.
    B, C, H, W = x.shape
    pb, pe, pd = params["backbone"], params["encoder"], params["decoder"]
    D = pb["conv_w"].shape[0]
    NC = pd["class_w"].shape[1]

    # --- backbone patch extraction (glue); the conv matmul + ReLU runs fused
    # inside the kernel so the feature map never round-trips HBM on its own.
    # TODO(synk): at real image sizes move this gather in-kernel (strided DMA)
    # or keep the conv in XLA — the 9x-inflated patch tensor is pure HBM tax.
    patches, Ho, Wo = im2col(x, 3, 3, stride=2, pad=1)   # [B, Ho, Wo, C*9]
    S = Ho * Wo
    patches = patches.reshape(B, S, C * 9)
    conv_w = pb["conv_w"].reshape(D, C * 9).T.astype(_BF16)   # [C*9, D] bf16
    pos = build_2d_sincos_pos_embed(Ho, Wo, D)                # [S, D] f32

    packed = rtdetr_fused_forward(patches, pos, conv_w, pb["conv_b"],
                                  pe, pd, NUM_HEADS, NC)      # [B, Q, 128]
    return {"pred_logits": packed[:, :, :NC],
            "pred_boxes": packed[:, :, NC:NC + 4]}


# --------------------------------------------------------------------------

if __name__ == "__main__":
    key = jax.random.PRNGKey(0)
    pkey, xkey = jax.random.split(key)
    params = init_params(pkey, c_in=4, d=32, ffn=64, num_queries=8,
                         num_classes=16, num_heads=NUM_HEADS)
    x = jax.random.normal(xkey, (2, 4, 16, 16), jnp.float32)   # NCHW, like PyTorch

    out = jax.jit(rtdetr_forward)(params, x)
    jax.block_until_ready(out)

    assert out["pred_logits"].shape == (2, 8, 16)
    assert out["pred_boxes"].shape == (2, 8, 4)
    assert bool(jnp.all(jnp.isfinite(out["pred_logits"])))
    assert bool(jnp.all((out["pred_boxes"] >= 0.0) & (out["pred_boxes"] <= 1.0)))
    print("KERNEL_OK")
</pallas_src>

<mosaic_0001>
module attributes {stable_mosaic.version = 11 : i64} {
  func.func @_rtdetr_fused_kernel(%arg0: i32, %arg1: memref<1x64x36xf32, #tpu.memory_space<vmem>>, %arg2: memref<64x32xf32, #tpu.memory_space<vmem>>, %arg3: memref<36x32xbf16, #tpu.memory_space<vmem>>, %arg4: memref<1x32xf32, #tpu.memory_space<vmem>>, %arg5: memref<3x32x32xbf16, #tpu.memory_space<vmem>>, %arg6: memref<3x1x32xf32, #tpu.memory_space<vmem>>, %arg7: memref<32x32xbf16, #tpu.memory_space<vmem>>, %arg8: memref<1x32xf32, #tpu.memory_space<vmem>>, %arg9: memref<1x32xf32, #tpu.memory_space<vmem>>, %arg10: memref<1x32xf32, #tpu.memory_space<vmem>>, %arg11: memref<32x64xbf16, #tpu.memory_space<vmem>>, %arg12: memref<1x64xf32, #tpu.memory_space<vmem>>, %arg13: memref<64x32xbf16, #tpu.memory_space<vmem>>, %arg14: memref<1x32xf32, #tpu.memory_space<vmem>>, %arg15: memref<1x32xf32, #tpu.memory_space<vmem>>, %arg16: memref<1x32xf32, #tpu.memory_space<vmem>>, %arg17: memref<8x32xf32, #tpu.memory_space<vmem>>, %arg18: memref<8x32xf32, #tpu.memory_space<vmem>>, %arg19: memref<3x32x32xbf16, #tpu.memory_space<vmem>>, %arg20: memref<3x1x32xf32, #tpu.memory_space<vmem>>, %arg21: memref<32x32xbf16, #tpu.memory_space<vmem>>, %arg22: memref<1x32xf32, #tpu.memory_space<vmem>>, %arg23: memref<1x32xf32, #tpu.memory_space<vmem>>, %arg24: memref<1x32xf32, #tpu.memory_space<vmem>>, %arg25: memref<3x32x32xbf16, #tpu.memory_space<vmem>>, %arg26: memref<3x1x32xf32, #tpu.memory_space<vmem>>, %arg27: memref<32x32xbf16, #tpu.memory_space<vmem>>, %arg28: memref<1x32xf32, #tpu.memory_space<vmem>>, %arg29: memref<1x32xf32, #tpu.memory_space<vmem>>, %arg30: memref<1x32xf32, #tpu.memory_space<vmem>>, %arg31: memref<32x64xbf16, #tpu.memory_space<vmem>>, %arg32: memref<1x64xf32, #tpu.memory_space<vmem>>, %arg33: memref<64x32xbf16, #tpu.memory_space<vmem>>, %arg34: memref<1x32xf32, #tpu.memory_space<vmem>>, %arg35: memref<1x32xf32, #tpu.memory_space<vmem>>, %arg36: memref<1x32xf32, #tpu.memory_space<vmem>>, %arg37: memref<32x48xbf16, #tpu.memory_space<vmem>>, %arg38: memref<1x48xf32, #tpu.memory_space<vmem>>, %arg39: memref<32x4xbf16, #tpu.memory_space<vmem>>, %arg40: memref<1x4xf32, #tpu.memory_space<vmem>>, %arg41: memref<1x8x128xf32, #tpu.memory_space<vmem>>) attributes {dimension_semantics = [#tpu.dimension_semantics<parallel>], iteration_bounds = array<i64: 2>, scalar_prefetch = 0 : i64, scratch_operands = 0 : i64, tpu.core_type = #tpu.core_type<tc>, window_params = [{transform_indices = @transform_0, window_bounds = array<i64: 1, 64, 36>}, {pipeline_mode = #tpu.pipeline_mode<synchronous>, transform_indices = @transform_1, window_bounds = array<i64: 64, 32>}, {pipeline_mode = #tpu.pipeline_mode<synchronous>, transform_indices = @transform_2, window_bounds = array<i64: 36, 32>}, {pipeline_mode = #tpu.pipeline_mode<synchronous>, transform_indices = @transform_3, window_bounds = array<i64: 1, 32>}, {pipeline_mode = #tpu.pipeline_mode<synchronous>, transform_indices = @transform_4, window_bounds = array<i64: 3, 32, 32>}, {pipeline_mode = #tpu.pipeline_mode<synchronous>, transform_indices = @transform_5, window_bounds = array<i64: 3, 1, 32>}, {pipeline_mode = #tpu.pipeline_mode<synchronous>, transform_indices = @transform_6, window_bounds = array<i64: 32, 32>}, {pipeline_mode = #tpu.pipeline_mode<synchronous>, transform_indices = @transform_7, window_bounds = array<i64: 1, 32>}, {pipeline_mode = #tpu.pipeline_mode<synchronous>, transform_indices = @transform_8, window_bounds = array<i64: 1, 32>}, {pipeline_mode = #tpu.pipeline_mode<synchronous>, transform_indices = @transform_9, window_bounds = array<i64: 1, 32>}, {pipeline_mode = #tpu.pipeline_mode<synchronous>, transform_indices = @transform_10, window_bounds = array<i64: 32, 64>}, {pipeline_mode = #tpu.pipeline_mode<synchronous>, transform_indices = @transform_11, window_bounds = array<i64: 1, 64>}, {pipeline_mode = #tpu.pipeline_mode<synchronous>, transform_indices = @transform_12, window_bounds = array<i64: 64, 32>}, {pipeline_mode = #tpu.pipeline_mode<synchronous>, transform_indices = @transform_13, window_bounds = array<i64: 1, 32>}, {pipeline_mode = #tpu.pipeline_mode<synchronous>, transform_indices = @transform_14, window_bounds = array<i64: 1, 32>}, {pipeline_mode = #tpu.pipeline_mode<synchronous>, transform_indices = @transform_15, window_bounds = array<i64: 1, 32>}, {pipeline_mode = #tpu.pipeline_mode<synchronous>, transform_indices = @transform_16, window_bounds = array<i64: 8, 32>}, {pipeline_mode = #tpu.pipeline_mode<synchronous>, transform_indices = @transform_17, window_bounds = array<i64: 8, 32>}, {pipeline_mode = #tpu.pipeline_mode<synchronous>, transform_indices = @transform_18, window_bounds = array<i64: 3, 32, 32>}, {pipeline_mode = #tpu.pipeline_mode<synchronous>, transform_indices = @transform_19, window_bounds = array<i64: 3, 1, 32>}, {pipeline_mode = #tpu.pipeline_mode<synchronous>, transform_indices = @transform_20, window_bounds = array<i64: 32, 32>}, {pipeline_mode = #tpu.pipeline_mode<synchronous>, transform_indices = @transform_21, window_bounds = array<i64: 1, 32>}, {pipeline_mode = #tpu.pipeline_mode<synchronous>, transform_indices = @transform_22, window_bounds = array<i64: 1, 32>}, {pipeline_mode = #tpu.pipeline_mode<synchronous>, transform_indices = @transform_23, window_bounds = array<i64: 1, 32>}, {pipeline_mode = #tpu.pipeline_mode<synchronous>, transform_indices = @transform_24, window_bounds = array<i64: 3, 32, 32>}, {pipeline_mode = #tpu.pipeline_mode<synchronous>, transform_indices = @transform_25, window_bounds = array<i64: 3, 1, 32>}, {pipeline_mode = #tpu.pipeline_mode<synchronous>, transform_indices = @transform_26, window_bounds = array<i64: 32, 32>}, {pipeline_mode = #tpu.pipeline_mode<synchronous>, transform_indices = @transform_27, window_bounds = array<i64: 1, 32>}, {pipeline_mode = #tpu.pipeline_mode<synchronous>, transform_indices = @transform_28, window_bounds = array<i64: 1, 32>}, {pipeline_mode = #tpu.pipeline_mode<synchronous>, transform_indices = @transform_29, window_bounds = array<i64: 1, 32>}, {pipeline_mode = #tpu.pipeline_mode<synchronous>, transform_indices = @transform_30, window_bounds = array<i64: 32, 64>}, {pipeline_mode = #tpu.pipeline_mode<synchronous>, transform_indices = @transform_31, window_bounds = array<i64: 1, 64>}, {pipeline_mode = #tpu.pipeline_mode<synchronous>, transform_indices = @transform_32, window_bounds = array<i64: 64, 32>}, {pipeline_mode = #tpu.pipeline_mode<synchronous>, transform_indices = @transform_33, window_bounds = array<i64: 1, 32>}, {pipeline_mode = #tpu.pipeline_mode<synchronous>, transform_indices = @transform_34, window_bounds = array<i64: 1, 32>}, {pipeline_mode = #tpu.pipeline_mode<synchronous>, transform_indices = @transform_35, window_bounds = array<i64: 1, 32>}, {pipeline_mode = #tpu.pipeline_mode<synchronous>, transform_indices = @transform_36, window_bounds = array<i64: 32, 48>}, {pipeline_mode = #tpu.pipeline_mode<synchronous>, transform_indices = @transform_37, window_bounds = array<i64: 1, 48>}, {pipeline_mode = #tpu.pipeline_mode<synchronous>, transform_indices = @transform_38, window_bounds = array<i64: 32, 4>}, {pipeline_mode = #tpu.pipeline_mode<synchronous>, transform_indices = @transform_39, window_bounds = array<i64: 1, 4>}, {transform_indices = @transform_40, window_bounds = array<i64: 1, 8, 128>}]} {
    %c0 = arith.constant 0 : index
    %c0_0 = arith.constant 0 : index
    %c0_1 = arith.constant 0 : index
    %0 = vector.load %arg1[%c0, %c0_0, %c0_1] : memref<1x64x36xf32, #tpu.memory_space<vmem>>, vector<1x64x36xf32>
    %1 = vector.shape_cast %0 : vector<1x64x36xf32> to vector<64x36xf32>
    %2 = arith.truncf %1 : vector<64x36xf32> to vector<64x36xbf16>
    %c0_2 = arith.constant 0 : index
    %c0_3 = arith.constant 0 : index
    %3 = vector.load %arg3[%c0_2, %c0_3] : memref<36x32xbf16, #tpu.memory_space<vmem>>, vector<36x32xbf16>
    %cst = arith.constant dense<0.000000e+00> : vector<64x32xf32>
    %4 = tpu.matmul %2, %3, %cst {dimension_numbers = #tpu.dot_dimension_numbers<[1], [0], [0], [1], [0, 0, 1, 1], [], []>} : vector<64x36xbf16>, vector<36x32xbf16>, vector<64x32xf32> -> vector<64x32xf32>
    %c0_4 = arith.constant 0 : index
    %c0_5 = arith.constant 0 : index
    %5 = vector.load %arg4[%c0_4, %c0_5] : memref<1x32xf32, #tpu.memory_space<vmem>>, vector<1x32xf32>
    %6 = vector.broadcast %5 : vector<1x32xf32> to vector<64x32xf32>
    %7 = arith.addf %4, %6 : vector<64x32xf32>
    %cst_6 = arith.constant 0.000000e+00 : f32
    %8 = vector.broadcast %cst_6 : f32 to vector<64x32xf32>
    %9 = arith.maximumf %7, %8 : vector<64x32xf32>
    %c0_7 = arith.constant 0 : index
    %c0_8 = arith.constant 0 : index
    %10 = vector.load %arg2[%c0_7, %c0_8] : memref<64x32xf32, #tpu.memory_space<vmem>>, vector<64x32xf32>
    %11 = arith.addf %9, %10 : vector<64x32xf32>
    %c0_9 = arith.constant 0 : index
    %c0_10 = arith.constant 0 : index
    %c0_11 = arith.constant 0 : index
    %12 = vector.load %arg5[%c0_9, %c0_10, %c0_11] : memref<3x32x32xbf16, #tpu.memory_space<vmem>>, vector<3x32x32xbf16>
    %c0_12 = arith.constant 0 : index
    %c0_13 = arith.constant 0 : index
    %c0_14 = arith.constant 0 : index
    %13 = vector.load %arg6[%c0_12, %c0_13, %c0_14] : memref<3x1x32xf32, #tpu.memory_space<vmem>>, vector<3x1x32xf32>
    %c0_15 = arith.constant 0 : index
    %c0_16 = arith.constant 0 : index
    %14 = vector.load %arg7[%c0_15, %c0_16] : memref<32x32xbf16, #tpu.memory_space<vmem>>, vector<32x32xbf16>
    %c0_17 = arith.constant 0 : index
    %c0_18 = arith.constant 0 : index
    %15 = vector.load %arg8[%c0_17, %c0_18] : memref<1x32xf32, #tpu.memory_space<vmem>>, vector<1x32xf32>
    %16 = arith.truncf %11 : vector<64x32xf32> to vector<64x32xbf16>
    %17 = vector.extract_strided_slice %12 {offsets = [0, 0, 0], sizes = [1, 32, 32], strides = [1, 1, 1]} : vector<3x32x32xbf16> to vector<1x32x32xbf16>
    %18 = vector.shape_cast %17 : vector<1x32x32xbf16> to vector<32x32xbf16>
    %cst_19 = arith.constant dense<0.000000e+00> : vector<64x32xf32>
    %19 = tpu.matmul %16, %18, %cst_19 {dimension_numbers = #tpu.dot_dimension_numbers<[1], [0], [0], [1], [0, 0, 1, 1], [], []>} : vector<64x32xbf16>, vector<32x32xbf16>, vector<64x32xf32> -> vector<64x32xf32>
    %20 = vector.extract_strided_slice %13 {offsets = [0, 0, 0], sizes = [1, 1, 32], strides = [1, 1, 1]} : vector<3x1x32xf32> to vector<1x1x32xf32>
    %21 = vector.shape_cast %20 : vector<1x1x32xf32> to vector<1x32xf32>
    %22 = vector.broadcast %21 : vector<1x32xf32> to vector<64x32xf32>
    %23 = arith.addf %19, %22 : vector<64x32xf32>
    %24 = arith.truncf %11 : vector<64x32xf32> to vector<64x32xbf16>
    %25 = vector.extract_strided_slice %12 {offsets = [1, 0, 0], sizes = [1, 32, 32], strides = [1, 1, 1]} : vector<3x32x32xbf16> to vector<1x32x32xbf16>
    %26 = vector.shape_cast %25 : vector<1x32x32xbf16> to vector<32x32xbf16>
    %cst_20 = arith.constant dense<0.000000e+00> : vector<64x32xf32>
    %27 = tpu.matmul %24, %26, %cst_20 {dimension_numbers = #tpu.dot_dimension_numbers<[1], [0], [0], [1], [0, 0, 1, 1], [], []>} : vector<64x32xbf16>, vector<32x32xbf16>, vector<64x32xf32> -> vector<64x32xf32>
    %28 = vector.extract_strided_slice %13 {offsets = [1, 0, 0], sizes = [1, 1, 32], strides = [1, 1, 1]} : vector<3x1x32xf32> to vector<1x1x32xf32>
    %29 = vector.shape_cast %28 : vector<1x1x32xf32> to vector<1x32xf32>
    %30 = vector.broadcast %29 : vector<1x32xf32> to vector<64x32xf32>
    %31 = arith.addf %27, %30 : vector<64x32xf32>
    %32 = arith.truncf %9 : vector<64x32xf32> to vector<64x32xbf16>
    %33 = vector.extract_strided_slice %12 {offsets = [2, 0, 0], sizes = [1, 32, 32], strides = [1, 1, 1]} : vector<3x32x32xbf16> to vector<1x32x32xbf16>
    %34 = vector.shape_cast %33 : vector<1x32x32xbf16> to vector<32x32xbf16>
    %cst_21 = arith.constant dense<0.000000e+00> : vector<64x32xf32>
    %35 = tpu.matmul %32, %34, %cst_21 {dimension_numbers = #tpu.dot_dimension_numbers<[1], [0], [0], [1], [0, 0, 1, 1], [], []>} : vector<64x32xbf16>, vector<32x32xbf16>, vector<64x32xf32> -> vector<64x32xf32>
    %36 = vector.extract_strided_slice %13 {offsets = [2, 0, 0], sizes = [1, 1, 32], strides = [1, 1, 1]} : vector<3x1x32xf32> to vector<1x1x32xf32>
    %37 = vector.shape_cast %36 : vector<1x1x32xf32> to vector<1x32xf32>
    %38 = vector.broadcast %37 : vector<1x32xf32> to vector<64x32xf32>
    %39 = arith.addf %35, %38 : vector<64x32xf32>
    %40 = vector.extract_strided_slice %23 {offsets = [0, 0], sizes = [64, 8], strides = [1, 1]} : vector<64x32xf32> to vector<64x8xf32>
    %41 = arith.truncf %40 : vector<64x8xf32> to vector<64x8xbf16>
    %42 = vector.extract_strided_slice %31 {offsets = [0, 0], sizes = [64, 8], strides = [1, 1]} : vector<64x32xf32> to vector<64x8xf32>
    %43 = arith.truncf %42 : vector<64x8xf32> to vector<64x8xbf16>
    %cst_22 = arith.constant dense<0.000000e+00> : vector<64x64xf32>
    %44 = tpu.matmul %41, %43, %cst_22 {dimension_numbers = #tpu.dot_dimension_numbers<[1], [1], [0], [0], [0, 0, 1, 0], [], []>} : vector<64x8xbf16>, vector<64x8xbf16>, vector<64x64xf32> -> vector<64x64xf32>
    %cst_23 = arith.constant 0.353553385 : f32
    %45 = vector.broadcast %cst_23 : f32 to vector<64x64xf32>
    %46 = arith.mulf %44, %45 : vector<64x64xf32>
    %cst_24 = arith.constant dense<0xFF800000> : vector<64xf32>
    %47 = vector.multi_reduction <maximumf>, %46, %cst_24 [1] : vector<64x64xf32> to vector<64xf32>
    %48 = vector.shape_cast %47 : vector<64xf32> to vector<64x1xf32>
    %49 = vector.broadcast %48 : vector<64x1xf32> to vector<64x64xf32>
    %50 = arith.subf %46, %49 : vector<64x64xf32>
    %51 = math.exp %50 : vector<64x64xf32>
    %cst_25 = arith.constant dense<0.000000e+00> : vector<64xf32>
    %52 = vector.multi_reduction <add>, %51, %cst_25 [1] : vector<64x64xf32> to vector<64xf32>
    %53 = vector.shape_cast %52 : vector<64xf32> to vector<64x1xf32>
    %54 = tpu.reciprocal %53 {approx = true} : vector<64x1xf32> -> vector<64x1xf32>
    %55 = vector.broadcast %54 : vector<64x1xf32> to vector<64x64xf32>
    %56 = arith.mulf %51, %55 : vector<64x64xf32>
    %57 = arith.truncf %56 : vector<64x64xf32> to vector<64x64xbf16>
    %58 = vector.extract_strided_slice %39 {offsets = [0, 0], sizes = [64, 8], strides = [1, 1]} : vector<64x32xf32> to vector<64x8xf32>
    %59 = arith.truncf %58 : vector<64x8xf32> to vector<64x8xbf16>
    %cst_26 = arith.constant dense<0.000000e+00> : vector<64x8xf32>
    %60 = tpu.matmul %57, %59, %cst_26 {dimension_numbers = #tpu.dot_dimension_numbers<[1], [0], [0], [1], [0, 0, 1, 1], [], []>} : vector<64x64xbf16>, vector<64x8xbf16>, vector<64x8xf32> -> vector<64x8xf32>
    %61 = vector.extract_strided_slice %23 {offsets = [0, 8], sizes = [64, 8], strides = [1, 1]} : vector<64x32xf32> to vector<64x8xf32>
    %62 = arith.truncf %61 : vector<64x8xf32> to vector<64x8xbf16>
    %63 = vector.extract_strided_slice %31 {offsets = [0, 8], sizes = [64, 8], strides = [1, 1]} : vector<64x32xf32> to vector<64x8xf32>
    %64 = arith.truncf %63 : vector<64x8xf32> to vector<64x8xbf16>
    %cst_27 = arith.constant dense<0.000000e+00> : vector<64x64xf32>
    %65 = tpu.matmul %62, %64, %cst_27 {dimension_numbers = #tpu.dot_dimension_numbers<[1], [1], [0], [0], [0, 0, 1, 0], [], []>} : vector<64x8xbf16>, vector<64x8xbf16>, vector<64x64xf32> -> vector<64x64xf32>
    %cst_28 = arith.constant 0.353553385 : f32
    %66 = vector.broadcast %cst_28 : f32 to vector<64x64xf32>
    %67 = arith.mulf %65, %66 : vector<64x64xf32>
    %cst_29 = arith.constant dense<0xFF800000> : vector<64xf32>
    %68 = vector.multi_reduction <maximumf>, %67, %cst_29 [1] : vector<64x64xf32> to vector<64xf32>
    %69 = vector.shape_cast %68 : vector<64xf32> to vector<64x1xf32>
    %70 = vector.broadcast %69 : vector<64x1xf32> to vector<64x64xf32>
    %71 = arith.subf %67, %70 : vector<64x64xf32>
    %72 = math.exp %71 : vector<64x64xf32>
    %cst_30 = arith.constant dense<0.000000e+00> : vector<64xf32>
    %73 = vector.multi_reduction <add>, %72, %cst_30 [1] : vector<64x64xf32> to vector<64xf32>
    %74 = vector.shape_cast %73 : vector<64xf32> to vector<64x1xf32>
    %75 = tpu.reciprocal %74 {approx = true} : vector<64x1xf32> -> vector<64x1xf32>
    %76 = vector.broadcast %75 : vector<64x1xf32> to vector<64x64xf32>
    %77 = arith.mulf %72, %76 : vector<64x64xf32>
    %78 = arith.truncf %77 : vector<64x64xf32> to vector<64x64xbf16>
    %79 = vector.extract_strided_slice %39 {offsets = [0, 8], sizes = [64, 8], strides = [1, 1]} : vector<64x32xf32> to vector<64x8xf32>
    %80 = arith.truncf %79 : vector<64x8xf32> to vector<64x8xbf16>
    %cst_31 = arith.constant dense<0.000000e+00> : vector<64x8xf32>
    %81 = tpu.matmul %78, %80, %cst_31 {dimension_numbers = #tpu.dot_dimension_numbers<[1], [0], [0], [1], [0, 0, 1, 1], [], []>} : vector<64x64xbf16>, vector<64x8xbf16>, vector<64x8xf32> -> vector<64x8xf32>
    %82 = vector.extract_strided_slice %23 {offsets = [0, 16], sizes = [64, 8], strides = [1, 1]} : vector<64x32xf32> to vector<64x8xf32>
    %83 = arith.truncf %82 : vector<64x8xf32> to vector<64x8xbf16>
    %84 = vector.extract_strided_slice %31 {offsets = [0, 16], sizes = [64, 8], strides = [1, 1]} : vector<64x32xf32> to vector<64x8xf32>
    %85 = arith.truncf %84 : vector<64x8xf32> to vector<64x8xbf16>
    %cst_32 = arith.constant dense<0.000000e+00> : vector<64x64xf32>
    %86 = tpu.matmul %83, %85, %cst_32 {dimension_numbers = #tpu.dot_dimension_numbers<[1], [1], [0], [0], [0, 0, 1, 0], [], []>} : vector<64x8xbf16>, vector<64x8xbf16>, vector<64x64xf32> -> vector<64x64xf32>
    %cst_33 = arith.constant 0.353553385 : f32
    %87 = vector.broadcast %cst_33 : f32 to vector<64x64xf32>
    %88 = arith.mulf %86, %87 : vector<64x64xf32>
    %cst_34 = arith.constant dense<0xFF800000> : vector<64xf32>
    %89 = vector.multi_reduction <maximumf>, %88, %cst_34 [1] : vector<64x64xf32> to vector<64xf32>
    %90 = vector.shape_cast %89 : vector<64xf32> to vector<64x1xf32>
    %91 = vector.broadcast %90 : vector<64x1xf32> to vector<64x64xf32>
    %92 = arith.subf %88, %91 : vector<64x64xf32>
    %93 = math.exp %92 : vector<64x64xf32>
    %cst_35 = arith.constant dense<0.000000e+00> : vector<64xf32>
    %94 = vector.multi_reduction <add>, %93, %cst_35 [1] : vector<64x64xf32> to vector<64xf32>
    %95 = vector.shape_cast %94 : vector<64xf32> to vector<64x1xf32>
    %96 = tpu.reciprocal %95 {approx = true} : vector<64x1xf32> -> vector<64x1xf32>
    %97 = vector.broadcast %96 : vector<64x1xf32> to vector<64x64xf32>
    %98 = arith.mulf %93, %97 : vector<64x64xf32>
    %99 = arith.truncf %98 : vector<64x64xf32> to vector<64x64xbf16>
    %100 = vector.extract_strided_slice %39 {offsets = [0, 16], sizes = [64, 8], strides = [1, 1]} : vector<64x32xf32> to vector<64x8xf32>
    %101 = arith.truncf %100 : vector<64x8xf32> to vector<64x8xbf16>
    %cst_36 = arith.constant dense<0.000000e+00> : vector<64x8xf32>
    %102 = tpu.matmul %99, %101, %cst_36 {dimension_numbers = #tpu.dot_dimension_numbers<[1], [0], [0], [1], [0, 0, 1, 1], [], []>} : vector<64x64xbf16>, vector<64x8xbf16>, vector<64x8xf32> -> vector<64x8xf32>
    %103 = vector.extract_strided_slice %23 {offsets = [0, 24], sizes = [64, 8], strides = [1, 1]} : vector<64x32xf32> to vector<64x8xf32>
    %104 = arith.truncf %103 : vector<64x8xf32> to vector<64x8xbf16>
    %105 = vector.extract_strided_slice %31 {offsets = [0, 24], sizes = [64, 8], strides = [1, 1]} : vector<64x32xf32> to vector<64x8xf32>
    %106 = arith.truncf %105 : vector<64x8xf32> to vector<64x8xbf16>
    %cst_37 = arith.constant dense<0.000000e+00> : vector<64x64xf32>
    %107 = tpu.matmul %104, %106, %cst_37 {dimension_numbers = #tpu.dot_dimension_numbers<[1], [1], [0], [0], [0, 0, 1, 0], [], []>} : vector<64x8xbf16>, vector<64x8xbf16>, vector<64x64xf32> -> vector<64x64xf32>
    %cst_38 = arith.constant 0.353553385 : f32
    %108 = vector.broadcast %cst_38 : f32 to vector<64x64xf32>
    %109 = arith.mulf %107, %108 : vector<64x64xf32>
    %cst_39 = arith.constant dense<0xFF800000> : vector<64xf32>
    %110 = vector.multi_reduction <maximumf>, %109, %cst_39 [1] : vector<64x64xf32> to vector<64xf32>
    %111 = vector.shape_cast %110 : vector<64xf32> to vector<64x1xf32>
    %112 = vector.broadcast %111 : vector<64x1xf32> to vector<64x64xf32>
    %113 = arith.subf %109, %112 : vector<64x64xf32>
    %114 = math.exp %113 : vector<64x64xf32>
    %cst_40 = arith.constant dense<0.000000e+00> : vector<64xf32>
    %115 = vector.multi_reduction <add>, %114, %cst_40 [1] : vector<64x64xf32> to vector<64xf32>
    %116 = vector.shape_cast %115 : vector<64xf32> to vector<64x1xf32>
    %117 = tpu.reciprocal %116 {approx = true} : vector<64x1xf32> -> vector<64x1xf32>
    %118 = vector.broadcast %117 : vector<64x1xf32> to vector<64x64xf32>
    %119 = arith.mulf %114, %118 : vector<64x64xf32>
    %120 = arith.truncf %119 : vector<64x64xf32> to vector<64x64xbf16>
    %121 = vector.extract_strided_slice %39 {offsets = [0, 24], sizes = [64, 8], strides = [1, 1]} : vector<64x32xf32> to vector<64x8xf32>
    %122 = arith.truncf %121 : vector<64x8xf32> to vector<64x8xbf16>
    %cst_41 = arith.constant dense<0.000000e+00> : vector<64x8xf32>
    %123 = tpu.matmul %120, %122, %cst_41 {dimension_numbers = #tpu.dot_dimension_numbers<[1], [0], [0], [1], [0, 0, 1, 1], [], []>} : vector<64x64xbf16>, vector<64x8xbf16>, vector<64x8xf32> -> vector<64x8xf32>
    %124 = tpu.concatenate %60, %81, %102, %123 in 1 : vector<64x8xf32>, vector<64x8xf32>, vector<64x8xf32>, vector<64x8xf32> -> vector<64x32xf32>
    %125 = arith.truncf %124 : vector<64x32xf32> to vector<64x32xbf16>
    %cst_42 = arith.constant dense<0.000000e+00> : vector<64x32xf32>
    %126 = tpu.matmul %125, %14, %cst_42 {dimension_numbers = #tpu.dot_dimension_numbers<[1], [0], [0], [1], [0, 0, 1, 1], [], []>} : vector<64x32xbf16>, vector<32x32xbf16>, vector<64x32xf32> -> vector<64x32xf32>
    %127 = vector.broadcast %15 : vector<1x32xf32> to vector<64x32xf32>
    %128 = arith.addf %126, %127 : vector<64x32xf32>
    %129 = arith.addf %9, %128 : vector<64x32xf32>
    %c0_43 = arith.constant 0 : index
    %c0_44 = arith.constant 0 : index
    %130 = vector.load %arg9[%c0_43, %c0_44] : memref<1x32xf32, #tpu.memory_space<vmem>>, vector<1x32xf32>
    %c0_45 = arith.constant 0 : index
    %c0_46 = arith.constant 0 : index
    %131 = vector.load %arg10[%c0_45, %c0_46] : memref<1x32xf32, #tpu.memory_space<vmem>>, vector<1x32xf32>
    %cst_47 = arith.constant dense<0.000000e+00> : vector<64xf32>
    %132 = vector.multi_reduction <add>, %129, %cst_47 [1] : vector<64x32xf32> to vector<64xf32>
    %133 = vector.shape_cast %132 : vector<64xf32> to vector<64x1xf32>
    %cst_48 = arith.constant 3.200000e+01 : f32
    %134 = vector.broadcast %cst_48 : f32 to vector<64x1xf32>
    %135 = arith.divf %133, %134 : vector<64x1xf32>
    %136 = arith.mulf %129, %129 : vector<64x32xf32>
    %cst_49 = arith.constant dense<0.000000e+00> : vector<64xf32>
    %137 = vector.multi_reduction <add>, %136, %cst_49 [1] : vector<64x32xf32> to vector<64xf32>
    %138 = vector.shape_cast %137 : vector<64xf32> to vector<64x1xf32>
    %cst_50 = arith.constant 3.200000e+01 : f32
    %139 = vector.broadcast %cst_50 : f32 to vector<64x1xf32>
    %140 = arith.divf %138, %139 : vector<64x1xf32>
    %141 = arith.mulf %135, %135 : vector<64x1xf32>
    %142 = arith.subf %140, %141 : vector<64x1xf32>
    %143 = vector.broadcast %135 : vector<64x1xf32> to vector<64x32xf32>
    %144 = arith.subf %129, %143 : vector<64x32xf32>
    %cst_51 = arith.constant 9.99999974E-6 : f32
    %145 = vector.broadcast %cst_51 : f32 to vector<64x1xf32>
    %146 = arith.addf %142, %145 : vector<64x1xf32>
    %147 = math.rsqrt %146 : vector<64x1xf32>
    %148 = vector.broadcast %147 : vector<64x1xf32> to vector<64x32xf32>
    %149 = arith.mulf %144, %148 : vector<64x32xf32>
    %150 = vector.broadcast %130 : vector<1x32xf32> to vector<64x32xf32>
    %151 = arith.mulf %149, %150 : vector<64x32xf32>
    %152 = vector.broadcast %131 : vector<1x32xf32> to vector<64x32xf32>
    %153 = arith.addf %151, %152 : vector<64x32xf32>
    %c0_52 = arith.constant 0 : index
    %c0_53 = arith.constant 0 : index
    %154 = vector.load %arg11[%c0_52, %c0_53] : memref<32x64xbf16, #tpu.memory_space<vmem>>, vector<32x64xbf16>
    %c0_54 = arith.constant 0 : index
    %c0_55 = arith.constant 0 : index
    %155 = vector.load %arg12[%c0_54, %c0_55] : memref<1x64xf32, #tpu.memory_space<vmem>>, vector<1x64xf32>
    %c0_56 = arith.constant 0 : index
    %c0_57 = arith.constant 0 : index
    %156 = vector.load %arg13[%c0_56, %c0_57] : memref<64x32xbf16, #tpu.memory_space<vmem>>, vector<64x32xbf16>
    %c0_58 = arith.constant 0 : index
    %c0_59 = arith.constant 0 : index
    %157 = vector.load %arg14[%c0_58, %c0_59] : memref<1x32xf32, #tpu.memory_space<vmem>>, vector<1x32xf32>
    %158 = arith.truncf %153 : vector<64x32xf32> to vector<64x32xbf16>
    %cst_60 = arith.constant dense<0.000000e+00> : vector<64x64xf32>
    %159 = tpu.matmul %158, %154, %cst_60 {dimension_numbers = #tpu.dot_dimension_numbers<[1], [0], [0], [1], [0, 0, 1, 1], [], []>} : vector<64x32xbf16>, vector<32x64xbf16>, vector<64x64xf32> -> vector<64x64xf32>
    %160 = vector.broadcast %155 : vector<1x64xf32> to vector<64x64xf32>
    %161 = arith.addf %159, %160 : vector<64x64xf32>
    %cst_61 = arith.constant 0.000000e+00 : f32
    %162 = vector.broadcast %cst_61 : f32 to vector<64x64xf32>
    %163 = arith.maximumf %161, %162 : vector<64x64xf32>
    %164 = arith.truncf %163 : vector<64x64xf32> to vector<64x64xbf16>
    %cst_62 = arith.constant dense<0.000000e+00> : vector<64x32xf32>
    %165 = tpu.matmul %164, %156, %cst_62 {dimension_numbers = #tpu.dot_dimension_numbers<[1], [0], [0], [1], [0, 0, 1, 1], [], []>} : vector<64x64xbf16>, vector<64x32xbf16>, vector<64x32xf32> -> vector<64x32xf32>
    %166 = vector.broadcast %157 : vector<1x32xf32> to vector<64x32xf32>
    %167 = arith.addf %165, %166 : vector<64x32xf32>
    %168 = arith.addf %153, %167 : vector<64x32xf32>
    %c0_63 = arith.constant 0 : index
    %c0_64 = arith.constant 0 : index
    %169 = vector.load %arg15[%c0_63, %c0_64] : memref<1x32xf32, #tpu.memory_space<vmem>>, vector<1x32xf32>
    %c0_65 = arith.constant 0 : index
    %c0_66 = arith.constant 0 : index
    %170 = vector.load %arg16[%c0_65, %c0_66] : memref<1x32xf32, #tpu.memory_space<vmem>>, vector<1x32xf32>
    %cst_67 = arith.constant dense<0.000000e+00> : vector<64xf32>
    %171 = vector.multi_reduction <add>, %168, %cst_67 [1] : vector<64x32xf32> to vector<64xf32>
    %172 = vector.shape_cast %171 : vector<64xf32> to vector<64x1xf32>
    %cst_68 = arith.constant 3.200000e+01 : f32
    %173 = vector.broadcast %cst_68 : f32 to vector<64x1xf32>
    %174 = arith.divf %172, %173 : vector<64x1xf32>
    %175 = arith.mulf %168, %168 : vector<64x32xf32>
    %cst_69 = arith.constant dense<0.000000e+00> : vector<64xf32>
    %176 = vector.multi_reduction <add>, %175, %cst_69 [1] : vector<64x32xf32> to vector<64xf32>
    %177 = vector.shape_cast %176 : vector<64xf32> to vector<64x1xf32>
    %cst_70 = arith.constant 3.200000e+01 : f32
    %178 = vector.broadcast %cst_70 : f32 to vector<64x1xf32>
    %179 = arith.divf %177, %178 : vector<64x1xf32>
    %180 = arith.mulf %174, %174 : vector<64x1xf32>
    %181 = arith.subf %179, %180 : vector<64x1xf32>
    %182 = vector.broadcast %174 : vector<64x1xf32> to vector<64x32xf32>
    %183 = arith.subf %168, %182 : vector<64x32xf32>
    %cst_71 = arith.constant 9.99999974E-6 : f32
    %184 = vector.broadcast %cst_71 : f32 to vector<64x1xf32>
    %185 = arith.addf %181, %184 : vector<64x1xf32>
    %186 = math.rsqrt %185 : vector<64x1xf32>
    %187 = vector.broadcast %186 : vector<64x1xf32> to vector<64x32xf32>
    %188 = arith.mulf %183, %187 : vector<64x32xf32>
    %189 = vector.broadcast %169 : vector<1x32xf32> to vector<64x32xf32>
    %190 = arith.mulf %188, %189 : vector<64x32xf32>
    %191 = vector.broadcast %170 : vector<1x32xf32> to vector<64x32xf32>
    %192 = arith.addf %190, %191 : vector<64x32xf32>
    %c0_72 = arith.constant 0 : index
    %c0_73 = arith.constant 0 : index
    %193 = vector.load %arg17[%c0_72, %c0_73] : memref<8x32xf32, #tpu.memory_space<vmem>>, vector<8x32xf32>
    %c0_74 = arith.constant 0 : index
    %c0_75 = arith.constant 0 : index
    %194 = vector.load %arg18[%c0_74, %c0_75] : memref<8x32xf32, #tpu.memory_space<vmem>>, vector<8x32xf32>
    %195 = arith.addf %193, %194 : vector<8x32xf32>
    %196 = arith.addf %193, %194 : vector<8x32xf32>
    %c0_76 = arith.constant 0 : index
    %c0_77 = arith.constant 0 : index
    %c0_78 = arith.constant 0 : index
    %197 = vector.load %arg19[%c0_76, %c0_77, %c0_78] : memref<3x32x32xbf16, #tpu.memory_space<vmem>>, vector<3x32x32xbf16>
    %c0_79 = arith.constant 0 : index
    %c0_80 = arith.constant 0 : index
    %c0_81 = arith.constant 0 : index
    %198 = vector.load %arg20[%c0_79, %c0_80, %c0_81] : memref<3x1x32xf32, #tpu.memory_space<vmem>>, vector<3x1x32xf32>
    %c0_82 = arith.constant 0 : index
    %c0_83 = arith.constant 0 : index
    %199 = vector.load %arg21[%c0_82, %c0_83] : memref<32x32xbf16, #tpu.memory_space<vmem>>, vector<32x32xbf16>
    %c0_84 = arith.constant 0 : index
    %c0_85 = arith.constant 0 : index
    %200 = vector.load %arg22[%c0_84, %c0_85] : memref<1x32xf32, #tpu.memory_space<vmem>>, vector<1x32xf32>
    %201 = arith.truncf %195 : vector<8x32xf32> to vector<8x32xbf16>
    %202 = vector.extract_strided_slice %197 {offsets = [0, 0, 0], sizes = [1, 32, 32], strides = [1, 1, 1]} : vector<3x32x32xbf16> to vector<1x32x32xbf16>
    %203 = vector.shape_cast %202 : vector<1x32x32xbf16> to vector<32x32xbf16>
    %cst_86 = arith.constant dense<0.000000e+00> : vector<8x32xf32>
    %204 = tpu.matmul %201, %203, %cst_86 {dimension_numbers = #tpu.dot_dimension_numbers<[1], [0], [0], [1], [0, 0, 1, 1], [], []>} : vector<8x32xbf16>, vector<32x32xbf16>, vector<8x32xf32> -> vector<8x32xf32>
    %205 = vector.extract_strided_slice %198 {offsets = [0, 0, 0], sizes = [1, 1, 32], strides = [1, 1, 1]} : vector<3x1x32xf32> to vector<1x1x32xf32>
    %206 = vector.shape_cast %205 : vector<1x1x32xf32> to vector<1x32xf32>
    %207 = vector.broadcast %206 : vector<1x32xf32> to vector<8x32xf32>
    %208 = arith.addf %204, %207 : vector<8x32xf32>
    %209 = arith.truncf %196 : vector<8x32xf32> to vector<8x32xbf16>
    %210 = vector.extract_strided_slice %197 {offsets = [1, 0, 0], sizes = [1, 32, 32], strides = [1, 1, 1]} : vector<3x32x32xbf16> to vector<1x32x32xbf16>
    %211 = vector.shape_cast %210 : vector<1x32x32xbf16> to vector<32x32xbf16>
    %cst_87 = arith.constant dense<0.000000e+00> : vector<8x32xf32>
    %212 = tpu.matmul %209, %211, %cst_87 {dimension_numbers = #tpu.dot_dimension_numbers<[1], [0], [0], [1], [0, 0, 1, 1], [], []>} : vector<8x32xbf16>, vector<32x32xbf16>, vector<8x32xf32> -> vector<8x32xf32>
    %213 = vector.extract_strided_slice %198 {offsets = [1, 0, 0], sizes = [1, 1, 32], strides = [1, 1, 1]} : vector<3x1x32xf32> to vector<1x1x32xf32>
    %214 = vector.shape_cast %213 : vector<1x1x32xf32> to vector<1x32xf32>
    %215 = vector.broadcast %214 : vector<1x32xf32> to vector<8x32xf32>
    %216 = arith.addf %212, %215 : vector<8x32xf32>
    %217 = arith.truncf %193 : vector<8x32xf32> to vector<8x32xbf16>
    %218 = vector.extract_strided_slice %197 {offsets = [2, 0, 0], sizes = [1, 32, 32], strides = [1, 1, 1]} : vector<3x32x32xbf16> to vector<1x32x32xbf16>
    %219 = vector.shape_cast %218 : vector<1x32x32xbf16> to vector<32x32xbf16>
    %cst_88 = arith.constant dense<0.000000e+00> : vector<8x32xf32>
    %220 = tpu.matmul %217, %219, %cst_88 {dimension_numbers = #tpu.dot_dimension_numbers<[1], [0], [0], [1], [0, 0, 1, 1], [], []>} : vector<8x32xbf16>, vector<32x32xbf16>, vector<8x32xf32> -> vector<8x32xf32>
    %221 = vector.extract_strided_slice %198 {offsets = [2, 0, 0], sizes = [1, 1, 32], strides = [1, 1, 1]} : vector<3x1x32xf32> to vector<1x1x32xf32>
    %222 = vector.shape_cast %221 : vector<1x1x32xf32> to vector<1x32xf32>
    %223 = vector.broadcast %222 : vector<1x32xf32> to vector<8x32xf32>
    %224 = arith.addf %220, %223 : vector<8x32xf32>
    %225 = vector.extract_strided_slice %208 {offsets = [0, 0], sizes = [8, 8], strides = [1, 1]} : vector<8x32xf32> to vector<8x8xf32>
    %226 = arith.truncf %225 : vector<8x8xf32> to vector<8x8xbf16>
    %227 = vector.extract_strided_slice %216 {offsets = [0, 0], sizes = [8, 8], strides = [1, 1]} : vector<8x32xf32> to vector<8x8xf32>
    %228 = arith.truncf %227 : vector<8x8xf32> to vector<8x8xbf16>
    %cst_89 = arith.constant dense<0.000000e+00> : vector<8x8xf32>
    %229 = tpu.matmul %226, %228, %cst_89 {dimension_numbers = #tpu.dot_dimension_numbers<[1], [1], [0], [0], [0, 0, 1, 0], [], []>} : vector<8x8xbf16>, vector<8x8xbf16>, vector<8x8xf32> -> vector<8x8xf32>
    %cst_90 = arith.constant 0.353553385 : f32
    %230 = vector.broadcast %cst_90 : f32 to vector<8x8xf32>
    %231 = arith.mulf %229, %230 : vector<8x8xf32>
    %cst_91 = arith.constant dense<0xFF800000> : vector<8xf32>
    %232 = vector.multi_reduction <maximumf>, %231, %cst_91 [1] : vector<8x8xf32> to vector<8xf32>
    %233 = vector.shape_cast %232 : vector<8xf32> to vector<8x1xf32>
    %234 = vector.broadcast %233 : vector<8x1xf32> to vector<8x8xf32>
    %235 = arith.subf %231, %234 : vector<8x8xf32>
    %236 = math.exp %235 : vector<8x8xf32>
    %cst_92 = arith.constant dense<0.000000e+00> : vector<8xf32>
    %237 = vector.multi_reduction <add>, %236, %cst_92 [1] : vector<8x8xf32> to vector<8xf32>
    %238 = vector.shape_cast %237 : vector<8xf32> to vector<8x1xf32>
    %239 = tpu.reciprocal %238 {approx = true} : vector<8x1xf32> -> vector<8x1xf32>
    %240 = vector.broadcast %239 : vector<8x1xf32> to vector<8x8xf32>
    %241 = arith.mulf %236, %240 : vector<8x8xf32>
    %242 = arith.truncf %241 : vector<8x8xf32> to vector<8x8xbf16>
    %243 = vector.extract_strided_slice %224 {offsets = [0, 0], sizes = [8, 8], strides = [1, 1]} : vector<8x32xf32> to vector<8x8xf32>
    %244 = arith.truncf %243 : vector<8x8xf32> to vector<8x8xbf16>
    %cst_93 = arith.constant dense<0.000000e+00> : vector<8x8xf32>
    %245 = tpu.matmul %242, %244, %cst_93 {dimension_numbers = #tpu.dot_dimension_numbers<[1], [0], [0], [1], [0, 0, 1, 1], [], []>} : vector<8x8xbf16>, vector<8x8xbf16>, vector<8x8xf32> -> vector<8x8xf32>
    %246 = vector.extract_strided_slice %208 {offsets = [0, 8], sizes = [8, 8], strides = [1, 1]} : vector<8x32xf32> to vector<8x8xf32>
    %247 = arith.truncf %246 : vector<8x8xf32> to vector<8x8xbf16>
    %248 = vector.extract_strided_slice %216 {offsets = [0, 8], sizes = [8, 8], strides = [1, 1]} : vector<8x32xf32> to vector<8x8xf32>
    %249 = arith.truncf %248 : vector<8x8xf32> to vector<8x8xbf16>
    %cst_94 = arith.constant dense<0.000000e+00> : vector<8x8xf32>
    %250 = tpu.matmul %247, %249, %cst_94 {dimension_numbers = #tpu.dot_dimension_numbers<[1], [1], [0], [0], [0, 0, 1, 0], [], []>} : vector<8x8xbf16>, vector<8x8xbf16>, vector<8x8xf32> -> vector<8x8xf32>
    %cst_95 = arith.constant 0.353553385 : f32
    %251 = vector.broadcast %cst_95 : f32 to vector<8x8xf32>
    %252 = arith.mulf %250, %251 : vector<8x8xf32>
    %cst_96 = arith.constant dense<0xFF800000> : vector<8xf32>
    %253 = vector.multi_reduction <maximumf>, %252, %cst_96 [1] : vector<8x8xf32> to vector<8xf32>
    %254 = vector.shape_cast %253 : vector<8xf32> to vector<8x1xf32>
    %255 = vector.broadcast %254 : vector<8x1xf32> to vector<8x8xf32>
    %256 = arith.subf %252, %255 : vector<8x8xf32>
    %257 = math.exp %256 : vector<8x8xf32>
    %cst_97 = arith.constant dense<0.000000e+00> : vector<8xf32>
    %258 = vector.multi_reduction <add>, %257, %cst_97 [1] : vector<8x8xf32> to vector<8xf32>
    %259 = vector.shape_cast %258 : vector<8xf32> to vector<8x1xf32>
    %260 = tpu.reciprocal %259 {approx = true} : vector<8x1xf32> -> vector<8x1xf32>
    %261 = vector.broadcast %260 : vector<8x1xf32> to vector<8x8xf32>
    %262 = arith.mulf %257, %261 : vector<8x8xf32>
    %263 = arith.truncf %262 : vector<8x8xf32> to vector<8x8xbf16>
    %264 = vector.extract_strided_slice %224 {offsets = [0, 8], sizes = [8, 8], strides = [1, 1]} : vector<8x32xf32> to vector<8x8xf32>
    %265 = arith.truncf %264 : vector<8x8xf32> to vector<8x8xbf16>
    %cst_98 = arith.constant dense<0.000000e+00> : vector<8x8xf32>
    %266 = tpu.matmul %263, %265, %cst_98 {dimension_numbers = #tpu.dot_dimension_numbers<[1], [0], [0], [1], [0, 0, 1, 1], [], []>} : vector<8x8xbf16>, vector<8x8xbf16>, vector<8x8xf32> -> vector<8x8xf32>
    %267 = vector.extract_strided_slice %208 {offsets = [0, 16], sizes = [8, 8], strides = [1, 1]} : vector<8x32xf32> to vector<8x8xf32>
    %268 = arith.truncf %267 : vector<8x8xf32> to vector<8x8xbf16>
    %269 = vector.extract_strided_slice %216 {offsets = [0, 16], sizes = [8, 8], strides = [1, 1]} : vector<8x32xf32> to vector<8x8xf32>
    %270 = arith.truncf %269 : vector<8x8xf32> to vector<8x8xbf16>
    %cst_99 = arith.constant dense<0.000000e+00> : vector<8x8xf32>
    %271 = tpu.matmul %268, %270, %cst_99 {dimension_numbers = #tpu.dot_dimension_numbers<[1], [1], [0], [0], [0, 0, 1, 0], [], []>} : vector<8x8xbf16>, vector<8x8xbf16>, vector<8x8xf32> -> vector<8x8xf32>
    %cst_100 = arith.constant 0.353553385 : f32
    %272 = vector.broadcast %cst_100 : f32 to vector<8x8xf32>
    %273 = arith.mulf %271, %272 : vector<8x8xf32>
    %cst_101 = arith.constant dense<0xFF800000> : vector<8xf32>
    %274 = vector.multi_reduction <maximumf>, %273, %cst_101 [1] : vector<8x8xf32> to vector<8xf32>
    %275 = vector.shape_cast %274 : vector<8xf32> to vector<8x1xf32>
    %276 = vector.broadcast %275 : vector<8x1xf32> to vector<8x8xf32>
    %277 = arith.subf %273, %276 : vector<8x8xf32>
    %278 = math.exp %277 : vector<8x8xf32>
    %cst_102 = arith.constant dense<0.000000e+00> : vector<8xf32>
    %279 = vector.multi_reduction <add>, %278, %cst_102 [1] : vector<8x8xf32> to vector<8xf32>
    %280 = vector.shape_cast %279 : vector<8xf32> to vector<8x1xf32>
    %281 = tpu.reciprocal %280 {approx = true} : vector<8x1xf32> -> vector<8x1xf32>
    %282 = vector.broadcast %281 : vector<8x1xf32> to vector<8x8xf32>
    %283 = arith.mulf %278, %282 : vector<8x8xf32>
    %284 = arith.truncf %283 : vector<8x8xf32> to vector<8x8xbf16>
    %285 = vector.extract_strided_slice %224 {offsets = [0, 16], sizes = [8, 8], strides = [1, 1]} : vector<8x32xf32> to vector<8x8xf32>
    %286 = arith.truncf %285 : vector<8x8xf32> to vector<8x8xbf16>
    %cst_103 = arith.constant dense<0.000000e+00> : vector<8x8xf32>
    %287 = tpu.matmul %284, %286, %cst_103 {dimension_numbers = #tpu.dot_dimension_numbers<[1], [0], [0], [1], [0, 0, 1, 1], [], []>} : vector<8x8xbf16>, vector<8x8xbf16>, vector<8x8xf32> -> vector<8x8xf32>
    %288 = vector.extract_strided_slice %208 {offsets = [0, 24], sizes = [8, 8], strides = [1, 1]} : vector<8x32xf32> to vector<8x8xf32>
    %289 = arith.truncf %288 : vector<8x8xf32> to vector<8x8xbf16>
    %290 = vector.extract_strided_slice %216 {offsets = [0, 24], sizes = [8, 8], strides = [1, 1]} : vector<8x32xf32> to vector<8x8xf32>
    %291 = arith.truncf %290 : vector<8x8xf32> to vector<8x8xbf16>
    %cst_104 = arith.constant dense<0.000000e+00> : vector<8x8xf32>
    %292 = tpu.matmul %289, %291, %cst_104 {dimension_numbers = #tpu.dot_dimension_numbers<[1], [1], [0], [0], [0, 0, 1, 0], [], []>} : vector<8x8xbf16>, vector<8x8xbf16>, vector<8x8xf32> -> vector<8x8xf32>
    %cst_105 = arith.constant 0.353553385 : f32
    %293 = vector.broadcast %cst_105 : f32 to vector<8x8xf32>
    %294 = arith.mulf %292, %293 : vector<8x8xf32>
    %cst_106 = arith.constant dense<0xFF800000> : vector<8xf32>
    %295 = vector.multi_reduction <maximumf>, %294, %cst_106 [1] : vector<8x8xf32> to vector<8xf32>
    %296 = vector.shape_cast %295 : vector<8xf32> to vector<8x1xf32>
    %297 = vector.broadcast %296 : vector<8x1xf32> to vector<8x8xf32>
    %298 = arith.subf %294, %297 : vector<8x8xf32>
    %299 = math.exp %298 : vector<8x8xf32>
    %cst_107 = arith.constant dense<0.000000e+00> : vector<8xf32>
    %300 = vector.multi_reduction <add>, %299, %cst_107 [1] : vector<8x8xf32> to vector<8xf32>
    %301 = vector.shape_cast %300 : vector<8xf32> to vector<8x1xf32>
    %302 = tpu.reciprocal %301 {approx = true} : vector<8x1xf32> -> vector<8x1xf32>
    %303 = vector.broadcast %302 : vector<8x1xf32> to vector<8x8xf32>
    %304 = arith.mulf %299, %303 : vector<8x8xf32>
    %305 = arith.truncf %304 : vector<8x8xf32> to vector<8x8xbf16>
    %306 = vector.extract_strided_slice %224 {offsets = [0, 24], sizes = [8, 8], strides = [1, 1]} : vector<8x32xf32> to vector<8x8xf32>
    %307 = arith.truncf %306 : vector<8x8xf32> to vector<8x8xbf16>
    %cst_108 = arith.constant dense<0.000000e+00> : vector<8x8xf32>
    %308 = tpu.matmul %305, %307, %cst_108 {dimension_numbers = #tpu.dot_dimension_numbers<[1], [0], [0], [1], [0, 0, 1, 1], [], []>} : vector<8x8xbf16>, vector<8x8xbf16>, vector<8x8xf32> -> vector<8x8xf32>
    %309 = tpu.concatenate %245, %266, %287, %308 in 1 : vector<8x8xf32>, vector<8x8xf32>, vector<8x8xf32>, vector<8x8xf32> -> vector<8x32xf32>
    %310 = arith.truncf %309 : vector<8x32xf32> to vector<8x32xbf16>
    %cst_109 = arith.constant dense<0.000000e+00> : vector<8x32xf32>
    %311 = tpu.matmul %310, %199, %cst_109 {dimension_numbers = #tpu.dot_dimension_numbers<[1], [0], [0], [1], [0, 0, 1, 1], [], []>} : vector<8x32xbf16>, vector<32x32xbf16>, vector<8x32xf32> -> vector<8x32xf32>
    %312 = vector.broadcast %200 : vector<1x32xf32> to vector<8x32xf32>
    %313 = arith.addf %311, %312 : vector<8x32xf32>
    %314 = arith.addf %193, %313 : vector<8x32xf32>
    %c0_110 = arith.constant 0 : index
    %c0_111 = arith.constant 0 : index
    %315 = vector.load %arg23[%c0_110, %c0_111] : memref<1x32xf32, #tpu.memory_space<vmem>>, vector<1x32xf32>
    %c0_112 = arith.constant 0 : index
    %c0_113 = arith.constant 0 : index
    %316 = vector.load %arg24[%c0_112, %c0_113] : memref<1x32xf32, #tpu.memory_space<vmem>>, vector<1x32xf32>
    %cst_114 = arith.constant dense<0.000000e+00> : vector<8xf32>
    %317 = vector.multi_reduction <add>, %314, %cst_114 [1] : vector<8x32xf32> to vector<8xf32>
    %318 = vector.shape_cast %317 : vector<8xf32> to vector<8x1xf32>
    %cst_115 = arith.constant 3.200000e+01 : f32
    %319 = vector.broadcast %cst_115 : f32 to vector<8x1xf32>
    %320 = arith.divf %318, %319 : vector<8x1xf32>
    %321 = arith.mulf %314, %314 : vector<8x32xf32>
    %cst_116 = arith.constant dense<0.000000e+00> : vector<8xf32>
    %322 = vector.multi_reduction <add>, %321, %cst_116 [1] : vector<8x32xf32> to vector<8xf32>
    %323 = vector.shape_cast %322 : vector<8xf32> to vector<8x1xf32>
    %cst_117 = arith.constant 3.200000e+01 : f32
    %324 = vector.broadcast %cst_117 : f32 to vector<8x1xf32>
    %325 = arith.divf %323, %324 : vector<8x1xf32>
    %326 = arith.mulf %320, %320 : vector<8x1xf32>
    %327 = arith.subf %325, %326 : vector<8x1xf32>
    %328 = vector.broadcast %320 : vector<8x1xf32> to vector<8x32xf32>
    %329 = arith.subf %314, %328 : vector<8x32xf32>
    %cst_118 = arith.constant 9.99999974E-6 : f32
    %330 = vector.broadcast %cst_118 : f32 to vector<8x1xf32>
    %331 = arith.addf %327, %330 : vector<8x1xf32>
    %332 = math.rsqrt %331 : vector<8x1xf32>
    %333 = vector.broadcast %332 : vector<8x1xf32> to vector<8x32xf32>
    %334 = arith.mulf %329, %333 : vector<8x32xf32>
    %335 = vector.broadcast %315 : vector<1x32xf32> to vector<8x32xf32>
    %336 = arith.mulf %334, %335 : vector<8x32xf32>
    %337 = vector.broadcast %316 : vector<1x32xf32> to vector<8x32xf32>
    %338 = arith.addf %336, %337 : vector<8x32xf32>
    %339 = arith.addf %338, %194 : vector<8x32xf32>
    %c0_119 = arith.constant 0 : index
    %c0_120 = arith.constant 0 : index
    %c0_121 = arith.constant 0 : index
    %340 = vector.load %arg25[%c0_119, %c0_120, %c0_121] : memref<3x32x32xbf16, #tpu.memory_space<vmem>>, vector<3x32x32xbf16>
    %c0_122 = arith.constant 0 : index
    %c0_123 = arith.constant 0 : index
    %c0_124 = arith.constant 0 : index
    %341 = vector.load %arg26[%c0_122, %c0_123, %c0_124] : memref<3x1x32xf32, #tpu.memory_space<vmem>>, vector<3x1x32xf32>
    %c0_125 = arith.constant 0 : index
    %c0_126 = arith.constant 0 : index
    %342 = vector.load %arg27[%c0_125, %c0_126] : memref<32x32xbf16, #tpu.memory_space<vmem>>, vector<32x32xbf16>
    %c0_127 = arith.constant 0 : index
    %c0_128 = arith.constant 0 : index
    %343 = vector.load %arg28[%c0_127, %c0_128] : memref<1x32xf32, #tpu.memory_space<vmem>>, vector<1x32xf32>
    %344 = arith.truncf %339 : vector<8x32xf32> to vector<8x32xbf16>
    %345 = vector.extract_strided_slice %340 {offsets = [0, 0, 0], sizes = [1, 32, 32], strides = [1, 1, 1]} : vector<3x32x32xbf16> to vector<1x32x32xbf16>
    %346 = vector.shape_cast %345 : vector<1x32x32xbf16> to vector<32x32xbf16>
    %cst_129 = arith.constant dense<0.000000e+00> : vector<8x32xf32>
    %347 = tpu.matmul %344, %346, %cst_129 {dimension_numbers = #tpu.dot_dimension_numbers<[1], [0], [0], [1], [0, 0, 1, 1], [], []>} : vector<8x32xbf16>, vector<32x32xbf16>, vector<8x32xf32> -> vector<8x32xf32>
    %348 = vector.extract_strided_slice %341 {offsets = [0, 0, 0], sizes = [1, 1, 32], strides = [1, 1, 1]} : vector<3x1x32xf32> to vector<1x1x32xf32>
    %349 = vector.shape_cast %348 : vector<1x1x32xf32> to vector<1x32xf32>
    %350 = vector.broadcast %349 : vector<1x32xf32> to vector<8x32xf32>
    %351 = arith.addf %347, %350 : vector<8x32xf32>
    %352 = arith.truncf %192 : vector<64x32xf32> to vector<64x32xbf16>
    %353 = vector.extract_strided_slice %340 {offsets = [1, 0, 0], sizes = [1, 32, 32], strides = [1, 1, 1]} : vector<3x32x32xbf16> to vector<1x32x32xbf16>
    %354 = vector.shape_cast %353 : vector<1x32x32xbf16> to vector<32x32xbf16>
    %cst_130 = arith.constant dense<0.000000e+00> : vector<64x32xf32>
    %355 = tpu.matmul %352, %354, %cst_130 {dimension_numbers = #tpu.dot_dimension_numbers<[1], [0], [0], [1], [0, 0, 1, 1], [], []>} : vector<64x32xbf16>, vector<32x32xbf16>, vector<64x32xf32> -> vector<64x32xf32>
    %356 = vector.extract_strided_slice %341 {offsets = [1, 0, 0], sizes = [1, 1, 32], strides = [1, 1, 1]} : vector<3x1x32xf32> to vector<1x1x32xf32>
    %357 = vector.shape_cast %356 : vector<1x1x32xf32> to vector<1x32xf32>
    %358 = vector.broadcast %357 : vector<1x32xf32> to vector<64x32xf32>
    %359 = arith.addf %355, %358 : vector<64x32xf32>
    %360 = arith.truncf %192 : vector<64x32xf32> to vector<64x32xbf16>
    %361 = vector.extract_strided_slice %340 {offsets = [2, 0, 0], sizes = [1, 32, 32], strides = [1, 1, 1]} : vector<3x32x32xbf16> to vector<1x32x32xbf16>
    %362 = vector.shape_cast %361 : vector<1x32x32xbf16> to vector<32x32xbf16>
    %cst_131 = arith.constant dense<0.000000e+00> : vector<64x32xf32>
    %363 = tpu.matmul %360, %362, %cst_131 {dimension_numbers = #tpu.dot_dimension_numbers<[1], [0], [0], [1], [0, 0, 1, 1], [], []>} : vector<64x32xbf16>, vector<32x32xbf16>, vector<64x32xf32> -> vector<64x32xf32>
    %364 = vector.extract_strided_slice %341 {offsets = [2, 0, 0], sizes = [1, 1, 32], strides = [1, 1, 1]} : vector<3x1x32xf32> to vector<1x1x32xf32>
    %365 = vector.shape_cast %364 : vector<1x1x32xf32> to vector<1x32xf32>
    %366 = vector.broadcast %365 : vector<1x32xf32> to vector<64x32xf32>
    %367 = arith.addf %363, %366 : vector<64x32xf32>
    %368 = vector.extract_strided_slice %351 {offsets = [0, 0], sizes = [8, 8], strides = [1, 1]} : vector<8x32xf32> to vector<8x8xf32>
    %369 = arith.truncf %368 : vector<8x8xf32> to vector<8x8xbf16>
    %370 = vector.extract_strided_slice %359 {offsets = [0, 0], sizes = [64, 8], strides = [1, 1]} : vector<64x32xf32> to vector<64x8xf32>
    %371 = arith.truncf %370 : vector<64x8xf32> to vector<64x8xbf16>
    %cst_132 = arith.constant dense<0.000000e+00> : vector<8x64xf32>
    %372 = tpu.matmul %369, %371, %cst_132 {dimension_numbers = #tpu.dot_dimension_numbers<[1], [1], [0], [0], [0, 0, 1, 0], [], []>} : vector<8x8xbf16>, vector<64x8xbf16>, vector<8x64xf32> -> vector<8x64xf32>
    %cst_133 = arith.constant 0.353553385 : f32
    %373 = vector.broadcast %cst_133 : f32 to vector<8x64xf32>
    %374 = arith.mulf %372, %373 : vector<8x64xf32>
    %cst_134 = arith.constant dense<0xFF800000> : vector<8xf32>
    %375 = vector.multi_reduction <maximumf>, %374, %cst_134 [1] : vector<8x64xf32> to vector<8xf32>
    %376 = vector.shape_cast %375 : vector<8xf32> to vector<8x1xf32>
    %377 = vector.broadcast %376 : vector<8x1xf32> to vector<8x64xf32>
    %378 = arith.subf %374, %377 : vector<8x64xf32>
    %379 = math.exp %378 : vector<8x64xf32>
    %cst_135 = arith.constant dense<0.000000e+00> : vector<8xf32>
    %380 = vector.multi_reduction <add>, %379, %cst_135 [1] : vector<8x64xf32> to vector<8xf32>
    %381 = vector.shape_cast %380 : vector<8xf32> to vector<8x1xf32>
    %382 = tpu.reciprocal %381 {approx = true} : vector<8x1xf32> -> vector<8x1xf32>
    %383 = vector.broadcast %382 : vector<8x1xf32> to vector<8x64xf32>
    %384 = arith.mulf %379, %383 : vector<8x64xf32>
    %385 = arith.truncf %384 : vector<8x64xf32> to vector<8x64xbf16>
    %386 = vector.extract_strided_slice %367 {offsets = [0, 0], sizes = [64, 8], strides = [1, 1]} : vector<64x32xf32> to vector<64x8xf32>
    %387 = arith.truncf %386 : vector<64x8xf32> to vector<64x8xbf16>
    %cst_136 = arith.constant dense<0.000000e+00> : vector<8x8xf32>
    %388 = tpu.matmul %385, %387, %cst_136 {dimension_numbers = #tpu.dot_dimension_numbers<[1], [0], [0], [1], [0, 0, 1, 1], [], []>} : vector<8x64xbf16>, vector<64x8xbf16>, vector<8x8xf32> -> vector<8x8xf32>
    %389 = vector.extract_strided_slice %351 {offsets = [0, 8], sizes = [8, 8], strides = [1, 1]} : vector<8x32xf32> to vector<8x8xf32>
    %390 = arith.truncf %389 : vector<8x8xf32> to vector<8x8xbf16>
    %391 = vector.extract_strided_slice %359 {offsets = [0, 8], sizes = [64, 8], strides = [1, 1]} : vector<64x32xf32> to vector<64x8xf32>
    %392 = arith.truncf %391 : vector<64x8xf32> to vector<64x8xbf16>
    %cst_137 = arith.constant dense<0.000000e+00> : vector<8x64xf32>
    %393 = tpu.matmul %390, %392, %cst_137 {dimension_numbers = #tpu.dot_dimension_numbers<[1], [1], [0], [0], [0, 0, 1, 0], [], []>} : vector<8x8xbf16>, vector<64x8xbf16>, vector<8x64xf32> -> vector<8x64xf32>
    %cst_138 = arith.constant 0.353553385 : f32
    %394 = vector.broadcast %cst_138 : f32 to vector<8x64xf32>
    %395 = arith.mulf %393, %394 : vector<8x64xf32>
    %cst_139 = arith.constant dense<0xFF800000> : vector<8xf32>
    %396 = vector.multi_reduction <maximumf>, %395, %cst_139 [1] : vector<8x64xf32> to vector<8xf32>
    %397 = vector.shape_cast %396 : vector<8xf32> to vector<8x1xf32>
    %398 = vector.broadcast %397 : vector<8x1xf32> to vector<8x64xf32>
    %399 = arith.subf %395, %398 : vector<8x64xf32>
    %400 = math.exp %399 : vector<8x64xf32>
    %cst_140 = arith.constant dense<0.000000e+00> : vector<8xf32>
    %401 = vector.multi_reduction <add>, %400, %cst_140 [1] : vector<8x64xf32> to vector<8xf32>
    %402 = vector.shape_cast %401 : vector<8xf32> to vector<8x1xf32>
    %403 = tpu.reciprocal %402 {approx = true} : vector<8x1xf32> -> vector<8x1xf32>
    %404 = vector.broadcast %403 : vector<8x1xf32> to vector<8x64xf32>
    %405 = arith.mulf %400, %404 : vector<8x64xf32>
    %406 = arith.truncf %405 : vector<8x64xf32> to vector<8x64xbf16>
    %407 = vector.extract_strided_slice %367 {offsets = [0, 8], sizes = [64, 8], strides = [1, 1]} : vector<64x32xf32> to vector<64x8xf32>
    %408 = arith.truncf %407 : vector<64x8xf32> to vector<64x8xbf16>
    %cst_141 = arith.constant dense<0.000000e+00> : vector<8x8xf32>
    %409 = tpu.matmul %406, %408, %cst_141 {dimension_numbers = #tpu.dot_dimension_numbers<[1], [0], [0], [1], [0, 0, 1, 1], [], []>} : vector<8x64xbf16>, vector<64x8xbf16>, vector<8x8xf32> -> vector<8x8xf32>
    %410 = vector.extract_strided_slice %351 {offsets = [0, 16], sizes = [8, 8], strides = [1, 1]} : vector<8x32xf32> to vector<8x8xf32>
    %411 = arith.truncf %410 : vector<8x8xf32> to vector<8x8xbf16>
    %412 = vector.extract_strided_slice %359 {offsets = [0, 16], sizes = [64, 8], strides = [1, 1]} : vector<64x32xf32> to vector<64x8xf32>
    %413 = arith.truncf %412 : vector<64x8xf32> to vector<64x8xbf16>
    %cst_142 = arith.constant dense<0.000000e+00> : vector<8x64xf32>
    %414 = tpu.matmul %411, %413, %cst_142 {dimension_numbers = #tpu.dot_dimension_numbers<[1], [1], [0], [0], [0, 0, 1, 0], [], []>} : vector<8x8xbf16>, vector<64x8xbf16>, vector<8x64xf32> -> vector<8x64xf32>
    %cst_143 = arith.constant 0.353553385 : f32
    %415 = vector.broadcast %cst_143 : f32 to vector<8x64xf32>
    %416 = arith.mulf %414, %415 : vector<8x64xf32>
    %cst_144 = arith.constant dense<0xFF800000> : vector<8xf32>
    %417 = vector.multi_reduction <maximumf>, %416, %cst_144 [1] : vector<8x64xf32> to vector<8xf32>
    %418 = vector.shape_cast %417 : vector<8xf32> to vector<8x1xf32>
    %419 = vector.broadcast %418 : vector<8x1xf32> to vector<8x64xf32>
    %420 = arith.subf %416, %419 : vector<8x64xf32>
    %421 = math.exp %420 : vector<8x64xf32>
    %cst_145 = arith.constant dense<0.000000e+00> : vector<8xf32>
    %422 = vector.multi_reduction <add>, %421, %cst_145 [1] : vector<8x64xf32> to vector<8xf32>
    %423 = vector.shape_cast %422 : vector<8xf32> to vector<8x1xf32>
    %424 = tpu.reciprocal %423 {approx = true} : vector<8x1xf32> -> vector<8x1xf32>
    %425 = vector.broadcast %424 : vector<8x1xf32> to vector<8x64xf32>
    %426 = arith.mulf %421, %425 : vector<8x64xf32>
    %427 = arith.truncf %426 : vector<8x64xf32> to vector<8x64xbf16>
    %428 = vector.extract_strided_slice %367 {offsets = [0, 16], sizes = [64, 8], strides = [1, 1]} : vector<64x32xf32> to vector<64x8xf32>
    %429 = arith.truncf %428 : vector<64x8xf32> to vector<64x8xbf16>
    %cst_146 = arith.constant dense<0.000000e+00> : vector<8x8xf32>
    %430 = tpu.matmul %427, %429, %cst_146 {dimension_numbers = #tpu.dot_dimension_numbers<[1], [0], [0], [1], [0, 0, 1, 1], [], []>} : vector<8x64xbf16>, vector<64x8xbf16>, vector<8x8xf32> -> vector<8x8xf32>
    %431 = vector.extract_strided_slice %351 {offsets = [0, 24], sizes = [8, 8], strides = [1, 1]} : vector<8x32xf32> to vector<8x8xf32>
    %432 = arith.truncf %431 : vector<8x8xf32> to vector<8x8xbf16>
    %433 = vector.extract_strided_slice %359 {offsets = [0, 24], sizes = [64, 8], strides = [1, 1]} : vector<64x32xf32> to vector<64x8xf32>
    %434 = arith.truncf %433 : vector<64x8xf32> to vector<64x8xbf16>
    %cst_147 = arith.constant dense<0.000000e+00> : vector<8x64xf32>
    %435 = tpu.matmul %432, %434, %cst_147 {dimension_numbers = #tpu.dot_dimension_numbers<[1], [1], [0], [0], [0, 0, 1, 0], [], []>} : vector<8x8xbf16>, vector<64x8xbf16>, vector<8x64xf32> -> vector<8x64xf32>
    %cst_148 = arith.constant 0.353553385 : f32
    %436 = vector.broadcast %cst_148 : f32 to vector<8x64xf32>
    %437 = arith.mulf %435, %436 : vector<8x64xf32>
    %cst_149 = arith.constant dense<0xFF800000> : vector<8xf32>
    %438 = vector.multi_reduction <maximumf>, %437, %cst_149 [1] : vector<8x64xf32> to vector<8xf32>
    %439 = vector.shape_cast %438 : vector<8xf32> to vector<8x1xf32>
    %440 = vector.broadcast %439 : vector<8x1xf32> to vector<8x64xf32>
    %441 = arith.subf %437, %440 : vector<8x64xf32>
    %442 = math.exp %441 : vector<8x64xf32>
    %cst_150 = arith.constant dense<0.000000e+00> : vector<8xf32>
    %443 = vector.multi_reduction <add>, %442, %cst_150 [1] : vector<8x64xf32> to vector<8xf32>
    %444 = vector.shape_cast %443 : vector<8xf32> to vector<8x1xf32>
    %445 = tpu.reciprocal %444 {approx = true} : vector<8x1xf32> -> vector<8x1xf32>
    %446 = vector.broadcast %445 : vector<8x1xf32> to vector<8x64xf32>
    %447 = arith.mulf %442, %446 : vector<8x64xf32>
    %448 = arith.truncf %447 : vector<8x64xf32> to vector<8x64xbf16>
    %449 = vector.extract_strided_slice %367 {offsets = [0, 24], sizes = [64, 8], strides = [1, 1]} : vector<64x32xf32> to vector<64x8xf32>
    %450 = arith.truncf %449 : vector<64x8xf32> to vector<64x8xbf16>
    %cst_151 = arith.constant dense<0.000000e+00> : vector<8x8xf32>
    %451 = tpu.matmul %448, %450, %cst_151 {dimension_numbers = #tpu.dot_dimension_numbers<[1], [0], [0], [1], [0, 0, 1, 1], [], []>} : vector<8x64xbf16>, vector<64x8xbf16>, vector<8x8xf32> -> vector<8x8xf32>
    %452 = tpu.concatenate %388, %409, %430, %451 in 1 : vector<8x8xf32>, vector<8x8xf32>, vector<8x8xf32>, vector<8x8xf32> -> vector<8x32xf32>
    %453 = arith.truncf %452 : vector<8x32xf32> to vector<8x32xbf16>
    %cst_152 = arith.constant dense<0.000000e+00> : vector<8x32xf32>
    %454 = tpu.matmul %453, %342, %cst_152 {dimension_numbers = #tpu.dot_dimension_numbers<[1], [0], [0], [1], [0, 0, 1, 1], [], []>} : vector<8x32xbf16>, vector<32x32xbf16>, vector<8x32xf32> -> vector<8x32xf32>
    %455 = vector.broadcast %343 : vector<1x32xf32> to vector<8x32xf32>
    %456 = arith.addf %454, %455 : vector<8x32xf32>
    %457 = arith.addf %338, %456 : vector<8x32xf32>
    %c0_153 = arith.constant 0 : index
    %c0_154 = arith.constant 0 : index
    %458 = vector.load %arg29[%c0_153, %c0_154] : memref<1x32xf32, #tpu.memory_space<vmem>>, vector<1x32xf32>
    %c0_155 = arith.constant 0 : index
    %c0_156 = arith.constant 0 : index
    %459 = vector.load %arg30[%c0_155, %c0_156] : memref<1x32xf32, #tpu.memory_space<vmem>>, vector<1x32xf32>
    %cst_157 = arith.constant dense<0.000000e+00> : vector<8xf32>
    %460 = vector.multi_reduction <add>, %457, %cst_157 [1] : vector<8x32xf32> to vector<8xf32>
    %461 = vector.shape_cast %460 : vector<8xf32> to vector<8x1xf32>
    %cst_158 = arith.constant 3.200000e+01 : f32
    %462 = vector.broadcast %cst_158 : f32 to vector<8x1xf32>
    %463 = arith.divf %461, %462 : vector<8x1xf32>
    %464 = arith.mulf %457, %457 : vector<8x32xf32>
    %cst_159 = arith.constant dense<0.000000e+00> : vector<8xf32>
    %465 = vector.multi_reduction <add>, %464, %cst_159 [1] : vector<8x32xf32> to vector<8xf32>
    %466 = vector.shape_cast %465 : vector<8xf32> to vector<8x1xf32>
    %cst_160 = arith.constant 3.200000e+01 : f32
    %467 = vector.broadcast %cst_160 : f32 to vector<8x1xf32>
    %468 = arith.divf %466, %467 : vector<8x1xf32>
    %469 = arith.mulf %463, %463 : vector<8x1xf32>
    %470 = arith.subf %468, %469 : vector<8x1xf32>
    %471 = vector.broadcast %463 : vector<8x1xf32> to vector<8x32xf32>
    %472 = arith.subf %457, %471 : vector<8x32xf32>
    %cst_161 = arith.constant 9.99999974E-6 : f32
    %473 = vector.broadcast %cst_161 : f32 to vector<8x1xf32>
    %474 = arith.addf %470, %473 : vector<8x1xf32>
    %475 = math.rsqrt %474 : vector<8x1xf32>
    %476 = vector.broadcast %475 : vector<8x1xf32> to vector<8x32xf32>
    %477 = arith.mulf %472, %476 : vector<8x32xf32>
    %478 = vector.broadcast %458 : vector<1x32xf32> to vector<8x32xf32>
    %479 = arith.mulf %477, %478 : vector<8x32xf32>
    %480 = vector.broadcast %459 : vector<1x32xf32> to vector<8x32xf32>
    %481 = arith.addf %479, %480 : vector<8x32xf32>
    %c0_162 = arith.constant 0 : index
    %c0_163 = arith.constant 0 : index
    %482 = vector.load %arg31[%c0_162, %c0_163] : memref<32x64xbf16, #tpu.memory_space<vmem>>, vector<32x64xbf16>
    %c0_164 = arith.constant 0 : index
    %c0_165 = arith.constant 0 : index
    %483 = vector.load %arg32[%c0_164, %c0_165] : memref<1x64xf32, #tpu.memory_space<vmem>>, vector<1x64xf32>
    %c0_166 = arith.constant 0 : index
    %c0_167 = arith.constant 0 : index
    %484 = vector.load %arg33[%c0_166, %c0_167] : memref<64x32xbf16, #tpu.memory_space<vmem>>, vector<64x32xbf16>
    %c0_168 = arith.constant 0 : index
    %c0_169 = arith.constant 0 : index
    %485 = vector.load %arg34[%c0_168, %c0_169] : memref<1x32xf32, #tpu.memory_space<vmem>>, vector<1x32xf32>
    %486 = arith.truncf %481 : vector<8x32xf32> to vector<8x32xbf16>
    %cst_170 = arith.constant dense<0.000000e+00> : vector<8x64xf32>
    %487 = tpu.matmul %486, %482, %cst_170 {dimension_numbers = #tpu.dot_dimension_numbers<[1], [0], [0], [1], [0, 0, 1, 1], [], []>} : vector<8x32xbf16>, vector<32x64xbf16>, vector<8x64xf32> -> vector<8x64xf32>
    %488 = vector.broadcast %483 : vector<1x64xf32> to vector<8x64xf32>
    %489 = arith.addf %487, %488 : vector<8x64xf32>
    %cst_171 = arith.constant 0.000000e+00 : f32
    %490 = vector.broadcast %cst_171 : f32 to vector<8x64xf32>
    %491 = arith.maximumf %489, %490 : vector<8x64xf32>
    %492 = arith.truncf %491 : vector<8x64xf32> to vector<8x64xbf16>
    %cst_172 = arith.constant dense<0.000000e+00> : vector<8x32xf32>
    %493 = tpu.matmul %492, %484, %cst_172 {dimension_numbers = #tpu.dot_dimension_numbers<[1], [0], [0], [1], [0, 0, 1, 1], [], []>} : vector<8x64xbf16>, vector<64x32xbf16>, vector<8x32xf32> -> vector<8x32xf32>
    %494 = vector.broadcast %485 : vector<1x32xf32> to vector<8x32xf32>
    %495 = arith.addf %493, %494 : vector<8x32xf32>
    %496 = arith.addf %481, %495 : vector<8x32xf32>
    %c0_173 = arith.constant 0 : index
    %c0_174 = arith.constant 0 : index
    %497 = vector.load %arg35[%c0_173, %c0_174] : memref<1x32xf32, #tpu.memory_space<vmem>>, vector<1x32xf32>
    %c0_175 = arith.constant 0 : index
    %c0_176 = arith.constant 0 : index
    %498 = vector.load %arg36[%c0_175, %c0_176] : memref<1x32xf32, #tpu.memory_space<vmem>>, vector<1x32xf32>
    %cst_177 = arith.constant dense<0.000000e+00> : vector<8xf32>
    %499 = vector.multi_reduction <add>, %496, %cst_177 [1] : vector<8x32xf32> to vector<8xf32>
    %500 = vector.shape_cast %499 : vector<8xf32> to vector<8x1xf32>
    %cst_178 = arith.constant 3.200000e+01 : f32
    %501 = vector.broadcast %cst_178 : f32 to vector<8x1xf32>
    %502 = arith.divf %500, %501 : vector<8x1xf32>
    %503 = arith.mulf %496, %496 : vector<8x32xf32>
    %cst_179 = arith.constant dense<0.000000e+00> : vector<8xf32>
    %504 = vector.multi_reduction <add>, %503, %cst_179 [1] : vector<8x32xf32> to vector<8xf32>
    %505 = vector.shape_cast %504 : vector<8xf32> to vector<8x1xf32>
    %cst_180 = arith.constant 3.200000e+01 : f32
    %506 = vector.broadcast %cst_180 : f32 to vector<8x1xf32>
    %507 = arith.divf %505, %506 : vector<8x1xf32>
    %508 = arith.mulf %502, %502 : vector<8x1xf32>
    %509 = arith.subf %507, %508 : vector<8x1xf32>
    %510 = vector.broadcast %502 : vector<8x1xf32> to vector<8x32xf32>
    %511 = arith.subf %496, %510 : vector<8x32xf32>
    %cst_181 = arith.constant 9.99999974E-6 : f32
    %512 = vector.broadcast %cst_181 : f32 to vector<8x1xf32>
    %513 = arith.addf %509, %512 : vector<8x1xf32>
    %514 = math.rsqrt %513 : vector<8x1xf32>
    %515 = vector.broadcast %514 : vector<8x1xf32> to vector<8x32xf32>
    %516 = arith.mulf %511, %515 : vector<8x32xf32>
    %517 = vector.broadcast %497 : vector<1x32xf32> to vector<8x32xf32>
    %518 = arith.mulf %516, %517 : vector<8x32xf32>
    %519 = vector.broadcast %498 : vector<1x32xf32> to vector<8x32xf32>
    %520 = arith.addf %518, %519 : vector<8x32xf32>
    %521 = arith.truncf %520 : vector<8x32xf32> to vector<8x32xbf16>
    %c0_182 = arith.constant 0 : index
    %c0_183 = arith.constant 0 : index
    %522 = vector.load %arg37[%c0_182, %c0_183] : memref<32x48xbf16, #tpu.memory_space<vmem>>, vector<32x48xbf16>
    %cst_184 = arith.constant dense<0.000000e+00> : vector<8x48xf32>
    %523 = tpu.matmul %521, %522, %cst_184 {dimension_numbers = #tpu.dot_dimension_numbers<[1], [0], [0], [1], [0, 0, 1, 1], [], []>} : vector<8x32xbf16>, vector<32x48xbf16>, vector<8x48xf32> -> vector<8x48xf32>
    %c0_185 = arith.constant 0 : index
    %c0_186 = arith.constant 0 : index
    %524 = vector.load %arg38[%c0_185, %c0_186] : memref<1x48xf32, #tpu.memory_space<vmem>>, vector<1x48xf32>
    %525 = vector.broadcast %524 : vector<1x48xf32> to vector<8x48xf32>
    %526 = arith.addf %523, %525 : vector<8x48xf32>
    %527 = vector.extract_strided_slice %526 {offsets = [0, 0], sizes = [8, 16], strides = [1, 1]} : vector<8x48xf32> to vector<8x16xf32>
    %528 = vector.extract_strided_slice %526 {offsets = [0, 16], sizes = [8, 32], strides = [1, 1]} : vector<8x48xf32> to vector<8x32xf32>
    %cst_187 = arith.constant 0.000000e+00 : f32
    %529 = vector.broadcast %cst_187 : f32 to vector<8x32xf32>
    %530 = arith.maximumf %528, %529 : vector<8x32xf32>
    %531 = arith.truncf %530 : vector<8x32xf32> to vector<8x32xbf16>
    %c0_188 = arith.constant 0 : index
    %c0_189 = arith.constant 0 : index
    %532 = vector.load %arg39[%c0_188, %c0_189] : memref<32x4xbf16, #tpu.memory_space<vmem>>, vector<32x4xbf16>
    %cst_190 = arith.constant dense<0.000000e+00> : vector<8x4xf32>
    %533 = tpu.matmul %531, %532, %cst_190 {dimension_numbers = #tpu.dot_dimension_numbers<[1], [0], [0], [1], [0, 0, 1, 1], [], []>} : vector<8x32xbf16>, vector<32x4xbf16>, vector<8x4xf32> -> vector<8x4xf32>
    %c0_191 = arith.constant 0 : index
    %c0_192 = arith.constant 0 : index
    %534 = vector.load %arg40[%c0_191, %c0_192] : memref<1x4xf32, #tpu.memory_space<vmem>>, vector<1x4xf32>
    %535 = vector.broadcast %534 : vector<1x4xf32> to vector<8x4xf32>
    %536 = arith.addf %533, %535 : vector<8x4xf32>
    %537 = arith.negf %536 : vector<8x4xf32>
    %538 = math.exp %537 : vector<8x4xf32>
    %cst_193 = arith.constant 1.000000e+00 : f32
    %539 = vector.broadcast %cst_193 : f32 to vector<8x4xf32>
    %540 = arith.addf %539, %538 : vector<8x4xf32>
    %541 = arith.divf %539, %540 : vector<8x4xf32>
    %cst_194 = arith.constant 0.000000e+00 : f32
    %542 = vector.broadcast %cst_194 : f32 to vector<8x108xf32>
    %543 = tpu.concatenate %527, %541, %542 in 1 : vector<8x16xf32>, vector<8x4xf32>, vector<8x108xf32> -> vector<8x128xf32>
    %c0_195 = arith.constant 0 : index
    %c0_196 = arith.constant 0 : index
    %c0_197 = arith.constant 0 : index
    %544 = vector.load %arg41[%c0_195, %c0_196, %c0_197] : memref<1x8x128xf32, #tpu.memory_space<vmem>>, vector<1x8x128xf32>
    %545 = vector.shape_cast %544 : vector<1x8x128xf32> to vector<8x128xf32>
    %546 = vector.shape_cast %543 : vector<8x128xf32> to vector<1x8x128xf32>
    tpu.vector_store %arg41[%c0_195, %c0_196, %c0_197], %546 {strides = array<i32>} : memref<1x8x128xf32, #tpu.memory_space<vmem>>, vector<1x8x128xf32>,
    return
  }
  func.func @transform_0(%arg0: i32) -> (i32, i32, i32) {
    %c0_i32 = arith.constant 0 : i32
    %c0_i32_0 = arith.constant 0 : i32
    %c0_i32_1 = arith.constant 0 : i32
    return %arg0, %c0_i32, %c0_i32_0 : i32, i32, i32
  }
  func.func @transform_1(%arg0: i32) -> (i32, i32) {
    %c0_i32 = arith.constant 0 : i32
    %c0_i32_0 = arith.constant 0 : i32
    %c0_i32_1 = arith.constant 0 : i32
    return %c0_i32, %c0_i32_0 : i32, i32
  }
  func.func @transform_2(%arg0: i32) -> (i32, i32) {
    %c0_i32 = arith.constant 0 : i32
    %c0_i32_0 = arith.constant 0 : i32
    %c0_i32_1 = arith.constant 0 : i32
    return %c0_i32, %c0_i32_0 : i32, i32
  }
  func.func @transform_3(%arg0: i32) -> (i32, i32) {
    %c0_i32 = arith.constant 0 : i32
    %c0_i32_0 = arith.constant 0 : i32
    %c0_i32_1 = arith.constant 0 : i32
    return %c0_i32, %c0_i32_0 : i32, i32
  }
  func.func @transform_4(%arg0: i32) -> (i32, i32, i32) {
    %c0_i32 = arith.constant 0 : i32
    %c0_i32_0 = arith.constant 0 : i32
    %c0_i32_1 = arith.constant 0 : i32
    %c0_i32_2 = arith.constant 0 : i32
    return %c0_i32, %c0_i32_0, %c0_i32_1 : i32, i32, i32
  }
  func.func @transform_5(%arg0: i32) -> (i32, i32, i32) {
    %c0_i32 = arith.constant 0 : i32
    %c0_i32_0 = arith.constant 0 : i32
    %c0_i32_1 = arith.constant 0 : i32
    %c0_i32_2 = arith.constant 0 : i32
    return %c0_i32, %c0_i32_0, %c0_i32_1 : i32, i32, i32
  }
  func.func @transform_6(%arg0: i32) -> (i32, i32) {
    %c0_i32 = arith.constant 0 : i32
    %c0_i32_0 = arith.constant 0 : i32
    %c0_i32_1 = arith.constant 0 : i32
    return %c0_i32, %c0_i32_0 : i32, i32
  }
  func.func @transform_7(%arg0: i32) -> (i32, i32) {
    %c0_i32 = arith.constant 0 : i32
    %c0_i32_0 = arith.constant 0 : i32
    %c0_i32_1 = arith.constant 0 : i32
    return %c0_i32, %c0_i32_0 : i32, i32
  }
  func.func @transform_8(%arg0: i32) -> (i32, i32) {
    %c0_i32 = arith.constant 0 : i32
    %c0_i32_0 = arith.constant 0 : i32
    %c0_i32_1 = arith.constant 0 : i32
    return %c0_i32, %c0_i32_0 : i32, i32
  }
  func.func @transform_9(%arg0: i32) -> (i32, i32) {
    %c0_i32 = arith.constant 0 : i32
    %c0_i32_0 = arith.constant 0 : i32
    %c0_i32_1 = arith.constant 0 : i32
    return %c0_i32, %c0_i32_0 : i32, i32
  }
  func.func @transform_10(%arg0: i32) -> (i32, i32) {
    %c0_i32 = arith.constant 0 : i32
    %c0_i32_0 = arith.constant 0 : i32
    %c0_i32_1 = arith.constant 0 : i32
    return %c0_i32, %c0_i32_0 : i32, i32
  }
  func.func @transform_11(%arg0: i32) -> (i32, i32) {
    %c0_i32 = arith.constant 0 : i32
    %c0_i32_0 = arith.constant 0 : i32
    %c0_i32_1 = arith.constant 0 : i32
    return %c0_i32, %c0_i32_0 : i32, i32
  }
  func.func @transform_12(%arg0: i32) -> (i32, i32) {
    %c0_i32 = arith.constant 0 : i32
    %c0_i32_0 = arith.constant 0 : i32
    %c0_i32_1 = arith.constant 0 : i32
    return %c0_i32, %c0_i32_0 : i32, i32
  }
  func.func @transform_13(%arg0: i32) -> (i32, i32) {
    %c0_i32 = arith.constant 0 : i32
    %c0_i32_0 = arith.constant 0 : i32
    %c0_i32_1 = arith.constant 0 : i32
    return %c0_i32, %c0_i32_0 : i32, i32
  }
  func.func @transform_14(%arg0: i32) -> (i32, i32) {
    %c0_i32 = arith.constant 0 : i32
    %c0_i32_0 = arith.constant 0 : i32
    %c0_i32_1 = arith.constant 0 : i32
    return %c0_i32, %c0_i32_0 : i32, i32
  }
  func.func @transform_15(%arg0: i32) -> (i32, i32) {
    %c0_i32 = arith.constant 0 : i32
    %c0_i32_0 = arith.constant 0 : i32
    %c0_i32_1 = arith.constant 0 : i32
    return %c0_i32, %c0_i32_0 : i32, i32
  }
  func.func @transform_16(%arg0: i32) -> (i32, i32) {
    %c0_i32 = arith.constant 0 : i32
    %c0_i32_0 = arith.constant 0 : i32
    %c0_i32_1 = arith.constant 0 : i32
    return %c0_i32, %c0_i32_0 : i32, i32
  }
  func.func @transform_17(%arg0: i32) -> (i32, i32) {
    %c0_i32 = arith.constant 0 : i32
    %c0_i32_0 = arith.constant 0 : i32
    %c0_i32_1 = arith.constant 0 : i32
    return %c0_i32, %c0_i32_0 : i32, i32
  }
  func.func @transform_18(%arg0: i32) -> (i32, i32, i32) {
    %c0_i32 = arith.constant 0 : i32
    %c0_i32_0 = arith.constant 0 : i32
    %c0_i32_1 = arith.constant 0 : i32
    %c0_i32_2 = arith.constant 0 : i32
    return %c0_i32, %c0_i32_0, %c0_i32_1 : i32, i32, i32
  }
  func.func @transform_19(%arg0: i32) -> (i32, i32, i32) {
    %c0_i32 = arith.constant 0 : i32
    %c0_i32_0 = arith.constant 0 : i32
    %c0_i32_1 = arith.constant 0 : i32
    %c0_i32_2 = arith.constant 0 : i32
    return %c0_i32, %c0_i32_0, %c0_i32_1 : i32, i32, i32
  }
  func.func @transform_20(%arg0: i32) -> (i32, i32) {
    %c0_i32 = arith.constant 0 : i32
    %c0_i32_0 = arith.constant 0 : i32
    %c0_i32_1 = arith.constant 0 : i32
    return %c0_i32, %c0_i32_0 : i32, i32
  }
  func.func @transform_21(%arg0: i32) -> (i32, i32) {
    %c0_i32 = arith.constant 0 : i32
    %c0_i32_0 = arith.constant 0 : i32
    %c0_i32_1 = arith.constant 0 : i32
    return %c0_i32, %c0_i32_0 : i32, i32
  }
  func.func @transform_22(%arg0: i32) -> (i32, i32) {
    %c0_i32 = arith.constant 0 : i32
    %c0_i32_0 = arith.constant 0 : i32
    %c0_i32_1 = arith.constant 0 : i32
    return %c0_i32, %c0_i32_0 : i32, i32
  }
  func.func @transform_23(%arg0: i32) -> (i32, i32) {
    %c0_i32 = arith.constant 0 : i32
    %c0_i32_0 = arith.constant 0 : i32
    %c0_i32_1 = arith.constant 0 : i32
    return %c0_i32, %c0_i32_0 : i32, i32
  }
  func.func @transform_24(%arg0: i32) -> (i32, i32, i32) {
    %c0_i32 = arith.constant 0 : i32
    %c0_i32_0 = arith.constant 0 : i32
    %c0_i32_1 = arith.constant 0 : i32
    %c0_i32_2 = arith.constant 0 : i32
    return %c0_i32, %c0_i32_0, %c0_i32_1 : i32, i32, i32
  }
  func.func @transform_25(%arg0: i32) -> (i32, i32, i32) {
    %c0_i32 = arith.constant 0 : i32
    %c0_i32_0 = arith.constant 0 : i32
    %c0_i32_1 = arith.constant 0 : i32
    %c0_i32_2 = arith.constant 0 : i32
    return %c0_i32, %c0_i32_0, %c0_i32_1 : i32, i32, i32
  }
  func.func @transform_26(%arg0: i32) -> (i32, i32) {
    %c0_i32 = arith.constant 0 : i32
    %c0_i32_0 = arith.constant 0 : i32
    %c0_i32_1 = arith.constant 0 : i32
    return %c0_i32, %c0_i32_0 : i32, i32
  }
  func.func @transform_27(%arg0: i32) -> (i32, i32) {
    %c0_i32 = arith.constant 0 : i32
    %c0_i32_0 = arith.constant 0 : i32
    %c0_i32_1 = arith.constant 0 : i32
    return %c0_i32, %c0_i32_0 : i32, i32
  }
  func.func @transform_28(%arg0: i32) -> (i32, i32) {
    %c0_i32 = arith.constant 0 : i32
    %c0_i32_0 = arith.constant 0 : i32
    %c0_i32_1 = arith.constant 0 : i32
    return %c0_i32, %c0_i32_0 : i32, i32
  }
  func.func @transform_29(%arg0: i32) -> (i32, i32) {
    %c0_i32 = arith.constant 0 : i32
    %c0_i32_0 = arith.constant 0 : i32
    %c0_i32_1 = arith.constant 0 : i32
    return %c0_i32, %c0_i32_0 : i32, i32
  }
  func.func @transform_30(%arg0: i32) -> (i32, i32) {
    %c0_i32 = arith.constant 0 : i32
    %c0_i32_0 = arith.constant 0 : i32
    %c0_i32_1 = arith.constant 0 : i32
    return %c0_i32, %c0_i32_0 : i32, i32
  }
  func.func @transform_31(%arg0: i32) -> (i32, i32) {
    %c0_i32 = arith.constant 0 : i32
    %c0_i32_0 = arith.constant 0 : i32
    %c0_i32_1 = arith.constant 0 : i32
    return %c0_i32, %c0_i32_0 : i32, i32
  }
  func.func @transform_32(%arg0: i32) -> (i32, i32) {
    %c0_i32 = arith.constant 0 : i32
    %c0_i32_0 = arith.constant 0 : i32
    %c0_i32_1 = arith.constant 0 : i32
    return %c0_i32, %c0_i32_0 : i32, i32
  }
  func.func @transform_33(%arg0: i32) -> (i32, i32) {
    %c0_i32 = arith.constant 0 : i32
    %c0_i32_0 = arith.constant 0 : i32
    %c0_i32_1 = arith.constant 0 : i32
    return %c0_i32, %c0_i32_0 : i32, i32
  }
  func.func @transform_34(%arg0: i32) -> (i32, i32) {
    %c0_i32 = arith.constant 0 : i32
    %c0_i32_0 = arith.constant 0 : i32
    %c0_i32_1 = arith.constant 0 : i32
    return %c0_i32, %c0_i32_0 : i32, i32
  }
  func.func @transform_35(%arg0: i32) -> (i32, i32) {
    %c0_i32 = arith.constant 0 : i32
    %c0_i32_0 = arith.constant 0 : i32
    %c0_i32_1 = arith.constant 0 : i32
    return %c0_i32, %c0_i32_0 : i32, i32
  }
  func.func @transform_36(%arg0: i32) -> (i32, i32) {
    %c0_i32 = arith.constant 0 : i32
    %c0_i32_0 = arith.constant 0 : i32
    %c0_i32_1 = arith.constant 0 : i32
    return %c0_i32, %c0_i32_0 : i32, i32
  }
  func.func @transform_37(%arg0: i32) -> (i32, i32) {
    %c0_i32 = arith.constant 0 : i32
    %c0_i32_0 = arith.constant 0 : i32
    %c0_i32_1 = arith.constant 0 : i32
    return %c0_i32, %c0_i32_0 : i32, i32
  }
  func.func @transform_38(%arg0: i32) -> (i32, i32) {
    %c0_i32 = arith.constant 0 : i32
    %c0_i32_0 = arith.constant 0 : i32
    %c0_i32_1 = arith.constant 0 : i32
    return %c0_i32, %c0_i32_0 : i32, i32
  }
  func.func @transform_39(%arg0: i32) -> (i32, i32) {
    %c0_i32 = arith.constant 0 : i32
    %c0_i32_0 = arith.constant 0 : i32
    %c0_i32_1 = arith.constant 0 : i32
    return %c0_i32, %c0_i32_0 : i32, i32
  }
  func.func @transform_40(%arg0: i32) -> (i32, i32, i32) {
    %c0_i32 = arith.constant 0 : i32
    %c0_i32_0 = arith.constant 0 : i32
    %c0_i32_1 = arith.constant 0 : i32
    return %arg0, %c0_i32, %c0_i32_0 : i32, i32, i32
  }
}

</mosaic_0001>

<bundles_post_ra>
// kernel: mul.15
= control target key start
LH: loop header
LB: loop body
LE: loop exit
PB: predicated region body
PF: predicated region fallthrough
CT: control target
= control target key end

     0   :  { %s67_s10 = smov 56   ;;  %s68_s11 = smov 40   ;;  %vm3_vm0 = vcmask 64512   ;;  %vm9_vm1 = vcmask 523712   ;;  %vm15_vm2 = vcmask 458112   ;;  %vm21_vm3 = vcmask 392512   ;;  %s111_s0 = inlined_call_operand.vmem [shape: f32[8,8], index: 0, kind: input, shape index: {}]   ;;  %s112_s1 = inlined_call_operand.vmem [shape: f32[64], index: 1, kind: output, shape index: {}]  }
   0x1   :  { %v53_v0 = vld [vmem:[%s111_s0 + $0x7] sm:$0x1]   ;;  %v55_v1 = vld [vmem:[%s111_s0 + $0x5] sm:$0x1]   ;;  %v57_v2 = vld [vmem:[%s111_s0 + $0x3] sm:$0x1]  }
   0x2   :  { %7 = vrot.lane.b32.xlu0 %v53_v0, %s67_s10  ;;  %19 = vrot.lane.b32.xlu1 %v55_v1, %s68_s11  ;;  %s69_s14 = smov 24   ;;  %v54_v3 = vld [vmem:[%s111_s0 + $0x6] sm:$0x1]   ;;  %v56_v4 = vld [vmem:[%s111_s0 + $0x4] sm:$0x1]   ;;  %s70_s21 = smov 48  }
   0x3   :  { %31 = vrot.lane.b32.xlu2 %v57_v2, %s69_s14  ;;  %v58_v5 = vld [vmem:[%s111_s0 + $0x2] sm:$0x1]   ;;  %s71_s22 = smov 32   ;;  %s72_s23 = smov 16   ;;  %v59_v6 = vld [vmem:[%s111_s0 + $0x1] sm:$0x1]  }
   0x4   :  { %s73_s26 = smov 8   ;;  %v2_v7 = vld [vmem:[%s111_s0] sm:$0x1]   ;;  %vm27_vm4 = vcmask 326912   ;;  %vm33_vm5 = vcmask 261312   ;;  %vm39_vm6 = vcmask 195712  }
   0x5   :  { %4 = vst.msk [vmem:[#allocation0] sm:$0x1] %vm3_vm0, %v2_v7   ;;  %vm45_vm7 = vcmask 130112  }
   0xa   :  { %13 = vrot.lane.b32.xlu0 %v54_v3, %s70_s21  ;;  %25 = vrot.lane.b32.xlu1 %v56_v4, %s71_s22 }
   0xb   :  { %37 = vrot.lane.b32.xlu2 %v58_v5, %s72_s23 }
  0x12   :  { %43 = vrot.lane.b32.xlu0 %v59_v6, %s73_s26 }
  0x5d   :  { %v32_v8 = vpop.permute.xlu2 %31  }
  0x65   :  { %v38_v9 = vpop.permute.xlu2 %37  }
  0x74   :  { %v8_v10 = vpop.permute.xlu0 %7   ;;  %v20_v11 = vpop.permute.xlu1 %19  }
  0x75   :  { %10 = vst.msk [vmem:[#allocation0] sm:$0x1] %vm9_vm1, %v8_v10  }
  0x7c   :  { %v14_v12 = vpop.permute.xlu0 %13   ;;  %v26_v13 = vpop.permute.xlu1 %25  }
  0x7d   :  { %16 = vst.msk [vmem:[#allocation0] sm:$0x1] %vm15_vm2, %v14_v12  }
  0x7e   :  { %22 = vst.msk [vmem:[#allocation0] sm:$0x1] %vm21_vm3, %v20_v11  }
  0x7f   :  { %28 = vst.msk [vmem:[#allocation0] sm:$0x1] %vm27_vm4, %v26_v13  }
  0x80   :  { %34 = vst.msk [vmem:[#allocation0] sm:$0x1] %vm33_vm5, %v32_v8  }
  0x81   :  { %40 = vst.msk [vmem:[#allocation0] sm:$0x1] %vm39_vm6, %v38_v9  }
  0x84   :  { %v44_v14 = vpop.permute.xlu0 %43  }
  0x85   :  { %46 = vst.msk [vmem:[#allocation0] sm:$0x1] %vm45_vm7, %v44_v14  }
  0x8c   :  { %v49_v15 = vld [vmem:[#allocation0] sm:$0x1] }
  0x8d   :  { %52 = vst [vmem:[%s112_s1] sm:$0x1] %v49_v15 }

// kernel: rtdetr_forward.1
= control target key start
LH: loop header
LB: loop body
LE: loop exit
PB: predicated region body
PF: predicated region fallthrough
CT: control target
= control target key end

     0   :  { %s5153_s6 = smov 1   ;;  %s5154_s10 = smov 2   ;;  %s6686_s0 = inlined_call_operand.smem [shape: u32[41], index: -1, kind: input, shape index: {}] }
   0x1   :  { %s5208_s5 = sld [smem:[%s6686_s0]]   ;;  %s5155_s14 = smov 3  }
   0x2   :  { %s5213_s9 = sld [smem:[%s6686_s0 + %s5153_s6]]   ;;  %s5156_s18 = smov 4  }
   0x3   :  { %s5218_s13 = sld [smem:[%s6686_s0 + %s5154_s10]]   ;;  %s5157_s22 = smov 5  }
   0x4   :  { %s5223_s17 = sld [smem:[%s6686_s0 + %s5155_s14]]   ;;  %s5158_s26 = smov 6  }
   0x5   :  { %s5228_s21 = sld [smem:[%s6686_s0 + %s5156_s18]]   ;;  %s5159_s30 = smov 7  }
   0x6   :  { %s5233_s25 = sld [smem:[%s6686_s0 + %s5157_s22]]   ;;  %s5160_s4 = smov 8  }
   0x7   :  { %s5238_s29 = sld [smem:[%s6686_s0 + %s5158_s26]]   ;;  %s5161_s10 = smov 9  }
   0x8   :  { %s5243_s3 = sld [smem:[%s6686_s0 + %s5159_s30]]   ;;  %s5162_s15 = smov 10  }
   0x9   :  { %s5248_s8 = sld [smem:[%s6686_s0 + %s5160_s4]]   ;;  %s5163_s20 = smov 11  }
   0xa   :  { %s5253_s14 = sld [smem:[%s6686_s0 + %s5161_s10]]   ;;  %s5164_s26 = smov 12  }
   0xb   :  { %s5258_s19 = sld [smem:[%s6686_s0 + %s5162_s15]]   ;;  %s5165_s1 = smov 13  }
   0xc   :  { %s5263_s24 = sld [smem:[%s6686_s0 + %s5163_s20]]   ;;  %s5166_s7 = smov 14  }
   0xd   :  { %s5268_s30 = sld [smem:[%s6686_s0 + %s5164_s26]]   ;;  %s5167_s15 = smov 15  }
   0xe   :  { %s5273_s6 = sld [smem:[%s6686_s0 + %s5165_s1]]   ;;  %s5168_s22 = smov 16  }
   0xf   :  { %s5278_s12 = sld [smem:[%s6686_s0 + %s5166_s7]]   ;;  %s5169_s28 = smov 17  }
  0x10   :  { %6699 = sst [smem:[#allocation2_spill]] %s5253_s14  ;;  %s5170_s7 = smov 18  }
  0x11   :  { %s5283_s20 = sld [smem:[%s6686_s0 + %s5167_s15]]   ;;  %s5171_s15 = smov 19  }
  0x12   :  { %6700 = sst [smem:[#allocation3_spill]] %s5263_s24 }
  0x13   :  { %6701 = sst [smem:[#allocation4_spill]] %s5268_s30 }
  0x14   :  { %6702 = sst [smem:[#allocation5_spill]] %s5273_s6 }
  0x15   :  { %6703 = sst [smem:[#allocation6_spill]] %s5278_s12 }
  0x16   :  { %s5288_s27 = sld [smem:[%s6686_s0 + %s5168_s22]]   ;;  %s5172_s22 = smov 20  }
  0x17   :  { %6704 = sst [smem:[#allocation7_spill]] %s5283_s20 }
  0x18   :  { %s5293_s4 = sld [smem:[%s6686_s0 + %s5169_s28]]   ;;  %s5173_s28 = smov 21  }
  0x19   :  { %s5298_s12 = sld [smem:[%s6686_s0 + %s5170_s7]]   ;;  %s5174_s7 = smov 22  }
  0x1a   :  { %s5303_s20 = sld [smem:[%s6686_s0 + %s5171_s15]]   ;;  %s5175_s15 = smov 23  }
  0x1b   :  { %s5308_s6 = sld [smem:[%s6686_s0 + %s5172_s22]]   ;;  %s5176_s22 = smov 24  }
  0x1c   :  { %s5313_s24 = sld [smem:[%s6686_s0 + %s5173_s28]]   ;;  %s5177_s28 = smov 25  }
  0x1d   :  { %s5318_s30 = sld [smem:[%s6686_s0 + %s5174_s7]]   ;;  %s5178_s7 = smov 26  }
  0x1e   :  { %s5323_s14 = sld [smem:[%s6686_s0 + %s5175_s15]]   ;;  %s5179_s15 = smov 27  }
  0x21   :  { %6705 = sst [smem:[#allocation8_spill]] %s5308_s6 }
  0x22   :  { %6706 = sst [smem:[#allocation9_spill]] %s5313_s24 }
  0x23   :  { %6707 = sst [smem:[#allocation10_spill]] %s5318_s30 }
  0x24   :  { %6708 = sst [smem:[#allocation11_spill]] %s5323_s14 }
  0x25   :  { %s5328_s6 = sld [smem:[%s6686_s0 + %s5176_s22]]   ;;  %s5180_s22 = smov 28  }
  0x26   :  { %s5333_s24 = sld [smem:[%s6686_s0 + %s5177_s28]]   ;;  %s5181_s28 = smov 29  }
  0x27   :  { %s5338_s30 = sld [smem:[%s6686_s0 + %s5178_s7]]   ;;  %s5182_s7 = smov 30  }
  0x28   :  { %s5343_s14 = sld [smem:[%s6686_s0 + %s5179_s15]]   ;;  %s5183_s15 = smov 31  }
  0x2b   :  { %6709 = sst [smem:[#allocation12_spill]] %s5328_s6 }
  0x2c   :  { %6710 = sst [smem:[#allocation13_spill]] %s5333_s24 }
  0x2d   :  { %6711 = sst [smem:[#allocation14_spill]] %s5338_s30 }
  0x2e   :  { %6712 = sst [smem:[#allocation15_spill]] %s5343_s14 }
  0x2f   :  { %s5348_s6 = sld [smem:[%s6686_s0 + %s5180_s22]]   ;;  %s5184_s22 = smov 32  }
  0x30   :  { %s5353_s24 = sld [smem:[%s6686_s0 + %s5181_s28]]   ;;  %s5185_s28 = smov 33  }
  0x31   :  { %s5358_s30 = sld [smem:[%s6686_s0 + %s5182_s7]]   ;;  %s5186_s7 = smov 34  }
  0x32   :  { %s5363_s14 = sld [smem:[%s6686_s0 + %s5183_s15]]   ;;  %s5187_s15 = smov 35  }
  0x35   :  { %6713 = sst [smem:[#allocation16_spill]] %s5348_s6 }
  0x36   :  { %6714 = sst [smem:[#allocation17_spill]] %s5353_s24 }
  0x37   :  { %6715 = sst [smem:[#allocation18_spill]] %s5358_s30 }
  0x38   :  { %6716 = sst [smem:[#allocation19_spill]] %s5363_s14 }
  0x39   :  { %s5368_s6 = sld [smem:[%s6686_s0 + %s5184_s22]]   ;;  %s5188_s22 = smov 36  }
  0x3a   :  { %s5373_s24 = sld [smem:[%s6686_s0 + %s5185_s28]]   ;;  %s5189_s28 = smov 37  }
  0x3b   :  { %s5378_s30 = sld [smem:[%s6686_s0 + %s5186_s7]]   ;;  %s5190_s7 = smov 38  }
  0x3c   :  { %s5383_s14 = sld [smem:[%s6686_s0 + %s5187_s15]]   ;;  %s5191_s15 = smov 39  }
  0x3f   :  { %6717 = sst [smem:[#allocation20_spill]] %s5368_s6 }
  0x40   :  { %6718 = sst [smem:[#allocation21_spill]] %s5373_s24 }
  0x41   :  { %6719 = sst [smem:[#allocation22_spill]] %s5378_s30 }
  0x42   :  { %6720 = sst [smem:[#allocation23_spill]] %s5383_s14 }
  0x43   :  { %s5388_s6 = sld [smem:[%s6686_s0 + %s5188_s22]]   ;;  %s5192_s22 = smov 40  }
  0x44   :  { %s5393_s24 = sld [smem:[%s6686_s0 + %s5189_s28]]   ;;  %s5410_s28 = smov 0  }
  0x45   :  { %s5398_s30 = sld [smem:[%s6686_s0 + %s5190_s7]]  }
  0x46   :  { %s5403_s14 = sld [smem:[%s6686_s0 + %s5191_s15]]  }
  0x49   :  { %6721 = sst [smem:[#allocation24_spill]] %s5388_s6 }
  0x4a   :  { %s5408_s6 = sld [smem:[%s6686_s0 + %s5192_s22]]  }
  0x4b LB: > { %s4479_s1 = sadd.s32 4294967295, %s5151_s28   ;;  %p4483_p0 = scmp.ge.s32.totalorder %s5151_s28, 1  ;;  %s5151_s28 = sphi %s5410_s28, %s91_s28  }
  0x4c   : > { %p1103_p1 = scmp.lt.s32.totalorder %s5151_s28, 3 }
  0x4e   : > { %p1104_p2 = pnand %p4483_p0, %p1103_p1 }
  0x4f   : > { %p1200_p3 = scmp.lt.s32.totalorder (!%p1104_p2), %s4479_s1, 1  ;;  %s5193_s7 = smov (!%p1104_p2), 120  }
  0x50   : > { %1107 = sbr.rel (%p1104_p2) target bundleno = 5121 (0x1401), region = 180  ;;  %s6697_s10 = smov (!%p1104_p2), 112  }
  0x51   : > { %s5195_s11 = smov (!%p1104_p2), 104   ;;  %s5196_s15 = smov (!%p1104_p2), 8  }
  0x52   : > { %s6695_s16 = smov (!%p1104_p2), 24   ;;  %s6696_s18 = smov (!%p1104_p2), 16  }
  0x53   : > { %s6722_s22 = sld [smem:[#allocation2_spill]] (!%p1104_p2) }
  0x54   : > { %s6723_s23 = sld [smem:[#allocation4_spill]] (!%p1104_p2) }
  0x55   : > { %v1226_v0 = vld [vmem:[%s5218_s13 + $0x10] sm:$0x3]  ;;  %vm1259_vm0 = vcmask 1041408   ;;  %s6751_s1 = smov (!%p1200_p3, %s4479_s1), 1  ;;  %v4754_v4 = vld [vmem:[%s5218_s13 + $0x8] sm:$0xff]  ;;  %v4753_v5 = vld [vmem:[%s5218_s13] sm:$0xff] }
  0x56   : > { %v1240_v1 = vunpack.c.l.b16 %v1226_v0  ;;  %s4752_s0 = sshll.u32 %s6751_s1, 6  ;;  %vm1246_vm1 = vcmask 293888   ;;  %v4760_v18 = vld [vmem:[%s5228_s21 + $0x28] sm:$0xff]  ;;  %v4758_v20 = vld [vmem:[%s5228_s21 + $0x18] sm:$0xff]  ;;  %v4759_v21 = vld [vmem:[%s5228_s21 + $0x20] sm:$0xff]  ;;  %vm1355_vm2 = vcmask 261120  }
  0x57   : > { %s1204_s2 = scalar_lea.vmem %s5208_s5, %s4752_s0  ;;  %1478 = vmatpush.bf16.msra.mxu3 %v4760_v18  ;;  %v4756_v19 = vld [vmem:[%s5228_s21 + $0x8] sm:$0xff]  ;;  %1418 = vmatpush.bf16.msra.mxu2 %v4758_v20  ;;  %v4755_v22 = vld [vmem:[%s5228_s21] sm:$0xff]  ;;  %v4757_v23 = vld [vmem:[%s5228_s21 + $0x10] sm:$0xff]  ;;  %vm1509_vm3 = vcmask 64512   ;;  %vm1571_vm4 = vcmask 523264   ;;  %vm2491_vm5 = vcmask 130048  }
  0x58   : > { %v1243_v2 = vpack.c.b16 %v1240_v1, %v1240_v1  ;;  %v1210_v6 = vld [vmem:[%s1204_s2] sm:$0xff]  ;;  %v1211_v7 = vld [vmem:[%s1204_s2 + $0x8] sm:$0xff]  ;;  %v1212_v9 = vld [vmem:[%s1204_s2 + $0x10] sm:$0xff]  ;;  %1374 = vmatpush.bf16.msra.mxu1 %v4756_v19  ;;  %vm2500_vm6 = vcmask 195584   ;;  %s6724_s26 = sld [smem:[#allocation3_spill]] }
  0x59   : > { %v1218_v8 = vpack.c.bf16 %v1211_v7, %v1210_v6  ;;  %v1213_v10 = vld [vmem:[%s1204_s2 + $0x18] sm:$0xff]  ;;  %v1214_v12 = vld [vmem:[%s1204_s2 + $0x20] sm:$0xff]  ;;  %v1215_v13 = vld [vmem:[%s1204_s2 + $0x28] sm:$0xff]  ;;  %s6725_s0 = sld [smem:[#allocation5_spill]] }
  0x5a   : > { %v1261_v3 = vsel %vm1259_vm0, %v1243_v2, 0  ;;  %v1219_v11 = vpack.c.bf16 %v1213_v10, %v1212_v9  ;;  %v1220_v14 = vpack.c.bf16 %v1215_v13, %v1214_v12  ;;  %v1216_v15 = vld [vmem:[%s1204_s2 + $0x30] sm:$0xff]  ;;  %v1217_v16 = vld [vmem:[%s1204_s2 + $0x38] sm:$0xff]  ;;  %v4910_v25 = vld [vmem:[%s5223_s17] ss:$0 sm:$0xff]  ;;  %s6726_s2 = sld [smem:[#allocation8_spill]] }
  0x5b   : > { %1268 = vmatpush.bf16.msra.mxu0 %v1261_v3  ;;  %v1221_v17 = vpack.c.bf16 %v1217_v16, %v1216_v15  ;;  %1479 = vmatpush.bf16.msra.mxu3 %v4759_v21  ;;  %v1300_v30 = vld [vmem:[%s5213_s9] sm:$0xff]  ;;  %v1301_v31 = vld [vmem:[%s5213_s9 + $0x8] sm:$0xff]  ;;  %v1302_v42 = vld [vmem:[%s5213_s9 + $0x10] sm:$0xff] }
  0x5c   : > { %1375 = vmatpush.bf16.msra.mxu1 %v4755_v22  ;;  %1419 = vmatpush.bf16.msra.mxu2 %v4757_v23  ;;  %v1303_v43 = vld [vmem:[%s5213_s9 + $0x18] sm:$0xff]  ;;  %v1304_v54 = vld [vmem:[%s5213_s9 + $0x20] sm:$0xff]  ;;  %v1305_v55 = vld [vmem:[%s5213_s9 + $0x28] sm:$0xff] }
  0x5d   : > { %v1306_v2 = vld [vmem:[%s5213_s9 + $0x30] sm:$0xff]  ;;  %v1307_v3 = vld [vmem:[%s5213_s9 + $0x38] sm:$0xff] }
  0x5f   : > { %1269 = vmatpush.bf16.msra.mxu0 %v4754_v4 }
  0x63   : > { %1270 = vmatpush.bf16.msra.mxu0 %v4753_v5 }
  0x66   : > { %4495 = vmatmul.msk.bf16.vlgmr.msra.gmra.mxu0 %vm1246_vm1, %v1218_v8 }
  0x76   : > { %4496 = vmatmul.msk.bf16.gmra.mxu0 %vm1246_vm1, %v1219_v11  ;;  %v5487_v11 = vld [vmem:[%s5233_s25] ss:$0 sm:$0xff] }
  0x86   : > { %4497 = vmatmul.msk.bf16.gmra.mxu0 %vm1246_vm1, %v1220_v14 }
  0x96   : > { %4498 = vmatmul.msk.bf16.gmra.mxu0 %vm1246_vm1, %v1221_v17 }
  0xe3   : > { %v1272_v24 = vpop.f32.mrf.mxu0 }
  0xe4   : > { %v1273_v26 = vadd.f32 %v4910_v25, %v1272_v24 }
  0xe6   : > { %v5432_v28 = vmax.f32 %v1273_v26, 0.0 }
  0xe8   : > { %v1308_v33 = vadd.f32 %v1300_v30, %v5432_v28 }
  0xeb   : > { %v1274_v27 = vpop.f32.mrf.mxu0 }
  0xec   : > { %v1275_v29 = vadd.f32 %v4910_v25, %v1274_v27  ;;  %v4913_v27 = vld [vmem:[%s5233_s25 + $0x1] ss:$0 sm:$0xff] }
  0xee   : > { %v5436_v32 = vmax.f32 %v1275_v29, 0.0 }
  0xf0   : > { %v1441_v34 = vpack.c.bf16 %v5436_v32, %v5432_v28  ;;  %v1309_v35 = vadd.f32 %v1301_v31, %v5436_v32 }
  0xf2   : > { %4531 = vmatmul.msk.bf16.vlgmr.msra.gmra.mxu3 %vm1355_vm2, %v1441_v34  ;;  %v1336_v36 = vpack.c.bf16 %v1309_v35, %v1308_v33 }
  0xf3   : > { %v1277_v37 = vpop.f32.mrf.mxu0 }
  0xf4   : > { %4507 = vmatmul.msk.bf16.vlgmr.msra.gmra.mxu1 %vm1355_vm2, %v1336_v36  ;;  %4519 = vmatmul.msk.bf16.vlgmr.msra.gmra.mxu2 %vm1355_vm2, %v1336_v36  ;;  %v1278_v38 = vadd.f32 %v4910_v25, %v1277_v37 }
  0xf6   : > { %v5445_v40 = vmax.f32 %v1278_v38, 0.0 }
  0xf8   : > { %v1310_v45 = vadd.f32 %v1302_v42, %v5445_v40 }
  0xfb   : > { %v1279_v39 = vpop.f32.mrf.mxu0 }
  0xfc   : > { %v1280_v41 = vadd.f32 %v4910_v25, %v1279_v39 }
  0xfe   : > { %v5449_v44 = vmax.f32 %v1280_v41, 0.0 }
 0x100   : > { %v1442_v46 = vpack.c.bf16 %v5449_v44, %v5445_v40  ;;  %v1311_v47 = vadd.f32 %v1303_v43, %v5449_v44 }
 0x102   : > { %4532 = vmatmul.msk.bf16.gmra.mxu3 %vm1355_vm2, %v1442_v46  ;;  %v1337_v48 = vpack.c.bf16 %v1311_v47, %v1310_v45 }
 0x103   : > { %v1282_v49 = vpop.f32.mrf.mxu0 }
 0x104   : > { %4508 = vmatmul.msk.bf16.gmra.mxu1 %vm1355_vm2, %v1337_v48  ;;  %4520 = vmatmul.msk.bf16.gmra.mxu2 %vm1355_vm2, %v1337_v48  ;;  %v1283_v50 = vadd.f32 %v4910_v25, %v1282_v49 }
 0x106   : > { %v5458_v52 = vmax.f32 %v1283_v50, 0.0 }
 0x108   : > { %v1312_v57 = vadd.f32 %v1304_v54, %v5458_v52  ;;  %v4912_v54 = vld [vmem:[%s5233_s25 + $0x2] ss:$0 sm:$0xff] }
 0x10b   : > { %v1284_v51 = vpop.f32.mrf.mxu0 }
 0x10c   : > { %v1285_v53 = vadd.f32 %v4910_v25, %v1284_v51 }
 0x10e   : > { %v5462_v56 = vmax.f32 %v1285_v53, 0.0 }
 0x110   : > { %v1443_v58 = vpack.c.bf16 %v5462_v56, %v5458_v52  ;;  %v1313_v59 = vadd.f32 %v1305_v55, %v5462_v56 }
 0x112   : > { %4533 = vmatmul.msk.bf16.gmra.mxu3 %vm1355_vm2, %v1443_v58  ;;  %v1338_v60 = vpack.c.bf16 %v1313_v59, %v1312_v57 }
 0x113   : > { %v1287_v61 = vpop.f32.mrf.mxu0 }
 0x114   : > { %4509 = vmatmul.msk.bf16.gmra.mxu1 %vm1355_vm2, %v1338_v60  ;;  %4521 = vmatmul.msk.bf16.gmra.mxu2 %vm1355_vm2, %v1338_v60  ;;  %v1288_v62 = vadd.f32 %v4910_v25, %v1287_v61 }
 0x116   : > { %v5471_v0 = vmax.f32 %v1288_v62, 0.0 }
 0x118   : > { %v1314_v5 = vadd.f32 %v1306_v2, %v5471_v0 }
 0x11b   : > { %v1289_v63 = vpop.f32.mrf.mxu0 }
 0x11c   : > { %v1290_v1 = vadd.f32 %v4910_v25, %v1289_v63 }
 0x11e   : > { %v5475_v4 = vmax.f32 %v1290_v1, 0.0 }
 0x120   : > { %v1444_v6 = vpack.c.bf16 %v5475_v4, %v5471_v0  ;;  %v1315_v7 = vadd.f32 %v1307_v3, %v5475_v4 }
 0x122   : > { %4534 = vmatmul.msk.bf16.gmra.mxu3 %vm1355_vm2, %v1444_v6  ;;  %v1339_v8 = vpack.c.bf16 %v1315_v7, %v1314_v5 }
 0x124   : > { %4510 = vmatmul.msk.bf16.gmra.mxu1 %vm1355_vm2, %v1339_v8  ;;  %4522 = vmatmul.msk.bf16.gmra.mxu2 %vm1355_vm2, %v1339_v8 }
 0x171   : > { %v1377_v9 = vpop.f32.mrf.mxu1 }
 0x172   : > { %v1378_v14 = vadd.f32 %v5487_v11, %v1377_v9 }
 0x175   : > { %v5484_v10 = vpop.f32.mrf.mxu3 }
 0x177   : > { %v1421_v12 = vpop.f32.mrf.mxu2 }
 0x178   : > { %v1422_v38 = vadd.f32 %v4913_v27, %v1421_v12 }
 0x179   : > { %v1379_v13 = vpop.f32.mrf.mxu1 }
 0x17a   : > { %v1380_v15 = vadd.f32 %v5487_v11, %v1379_v13  ;;  %v1482_v13 = vadd.f32 %v4912_v54, %v5484_v10 }
 0x17c   : > { %v5491_v16 = vpack.c.bf16 %v1380_v15, %v1378_v14 }
 0x17d   : > { %v5493_v17 = vpop.f32.mrf.mxu3 }
 0x17e   : > { %1713 = vrot.lane.b32.xlu2 %v5491_v16, %s5193_s7  ;;  %v1484_v9 = vadd.f32 %v4912_v54, %v5493_v17 }
 0x17f   : > { %v1423_v18 = vpop.f32.mrf.mxu2 }
 0x180   : > { %v1424_v36 = vadd.f32 %v4913_v27, %v1423_v18  ;;  %v5539_v14 = vpack.c.bf16 %v1484_v9, %v1482_v13 }
 0x181   : > { %v1382_v19 = vpop.f32.mrf.mxu1 }
 0x182   : > { %v1383_v23 = vadd.f32 %v5487_v11, %v1382_v19  ;;  %v5510_v39 = vpack.c.bf16 %v1424_v36, %v1422_v38 }
 0x185   : > { %v1486_v20 = vpop.f32.mrf.mxu3 }
 0x186   : > { %v1487_v8 = vadd.f32 %v4912_v54, %v1486_v20 }
 0x187   : > { %v1426_v21 = vpop.f32.mrf.mxu2 }
 0x188   : > { %v1427_v30 = vadd.f32 %v4913_v27, %v1426_v21  ;;  %v1523_v21 = vsel %vm1509_vm3, %v5510_v39, 0 }
 0x189   : > { %v1384_v22 = vpop.f32.mrf.mxu1 }
 0x18a   : > { %v1385_v24 = vadd.f32 %v5487_v11, %v1384_v22 }
 0x18c   : > { %v5499_v25 = vpack.c.bf16 %v1385_v24, %v1383_v23 }
 0x18d   : > { %v1488_v26 = vpop.f32.mrf.mxu3 }
 0x18e   : > { %1715 = vrot.lane.b32.xlu2 %v5499_v25, %s5193_s7  ;;  %v1489_v5 = vadd.f32 %v4912_v54, %v1488_v26 }
 0x18f   : > { %v1428_v29 = vpop.f32.mrf.mxu2 }
 0x190   : > { %v1429_v31 = vadd.f32 %v4913_v27, %v1428_v29  ;;  %v5535_v12 = vpack.c.bf16 %v1489_v5, %v1487_v8 }
 0x191   : > { %v1387_v33 = vpop.f32.mrf.mxu1 }
 0x192   : > { %v5504_v34 = vpack.c.bf16 %v1429_v31, %v1427_v30  ;;  %v1388_v46 = vadd.f32 %v5487_v11, %v1387_v33 }
 0x194   : > { %1727 = vrot.lane.b32.xlu1 %v5504_v34, %s5193_s7  ;;  %v1526_v20 = vsel %vm1509_vm3, %v5504_v34, 0 }
 0x195   : > { %v1491_v35 = vpop.f32.mrf.mxu3 }
 0x196   : > { %1953 = vrot.lane.b32.xlu2 %v5504_v34, %s6697_s10  ;;  %v1492_v1 = vadd.f32 %v4912_v54, %v1491_v35 }
 0x197   : > { %v1431_v37 = vpop.f32.mrf.mxu2 }
 0x198   : > { %v1432_v51 = vadd.f32 %v4913_v27, %v1431_v37 }
 0x199   : > { %v1389_v41 = vpop.f32.mrf.mxu1 }
 0x19a   : > { %v1390_v43 = vadd.f32 %v5487_v11, %v1389_v41 }
 0x19c   : > { %1725 = vrot.lane.b32.xlu1 %v5510_v39, %s5193_s7  ;;  %v5518_v47 = vpack.c.bf16 %v1390_v43, %v1388_v46 }
 0x19d   : > { %v1493_v42 = vpop.f32.mrf.mxu3 }
 0x19e   : > { %1951 = vrot.lane.b32.xlu2 %v5510_v39, %s6697_s10  ;;  %v1494_v60 = vadd.f32 %v4912_v54, %v1493_v42 }
 0x19f   : > { %v1433_v45 = vpop.f32.mrf.mxu2 }
 0x1a0   : > { %v1434_v49 = vadd.f32 %v4913_v27, %v1433_v45  ;;  %v5526_v6 = vpack.c.bf16 %v1494_v60, %v1492_v1 }
 0x1a1   : > { %v1392_v2 = vpop.f32.mrf.mxu1 }
 0x1a2   : > { %v1507_v53 = vpack.c.bf16 %v1434_v49, %v1432_v51  ;;  %v1393_v17 = vadd.f32 %v5487_v11, %v1392_v2 }
 0x1a4   : > { %1717 = vrot.lane.b32.xlu1 %v5518_v47, %s5193_s7  ;;  %v1529_v18 = vsel %vm1509_vm3, %v1507_v53, 0 }
 0x1a5   : > { %v1496_v48 = vpop.f32.mrf.mxu3 }
 0x1a6   : > { %2165 = vrot.lane.b32.xlu2 %v5491_v16, %s5195_s11  ;;  %v1497_v57 = vadd.f32 %v4912_v54, %v1496_v48 }
 0x1a7   : > { %v1436_v50 = vpop.f32.mrf.mxu2 }
 0x1a8   : > { %v1437_v61 = vadd.f32 %v4913_v27, %v1436_v50 }
 0x1a9   : > { %v1394_v15 = vpop.f32.mrf.mxu1 }
 0x1aa   : > { %v1395_v10 = vadd.f32 %v5487_v11, %v1394_v15 }
 0x1ac   : > { %2177 = vrot.lane.b32.xlu1 %v1507_v53, %s5195_s11  ;;  %v1504_v19 = vpack.c.bf16 %v1395_v10, %v1393_v17 }
 0x1ad   : > { %v1498_v55 = vpop.f32.mrf.mxu3 }
 0x1ae   : > { %v1499_v58 = vadd.f32 %v4912_v54, %v1498_v55 }
 0x1af   : > { %v1438_v59 = vpop.f32.mrf.mxu2 }
 0x1b0   : > { %v1667_v62 = vpack.c.bf16 %v1499_v58, %v1497_v57  ;;  %v1439_v63 = vadd.f32 %v4913_v27, %v1438_v59 }
 0x1b2   : > { %v1508_v3 = vpack.c.bf16 %v1439_v63, %v1437_v61  ;;  %1684 = vmatpush.bf16.msrb.mxu2 %v1667_v62 }
 0x1b4   : > { %1731 = vrot.lane.b32.xlu0 %v1508_v3, %s5193_s7  ;;  %2175 = vrot.lane.b32.xlu1 %v5504_v34, %s5195_s11  ;;  %v1532_v7 = vsel %vm1509_vm3, %v1508_v3, 0 }
 0x1b5   : > { %2179 = vrot.lane.b32.xlu2 %v1508_v3, %s5195_s11  ;;  %1538 = vmatpush.bf16.xpose.msrb.mxu1 %v1532_v7 }
 0x1b6   : > { %1685 = vmatpush.bf16.msrb.mxu2 %v5526_v6 }
 0x1ba   : > { %1686 = vmatpush.bf16.msrb.mxu2 %v5535_v12 }
 0x1bc   : > { %1729 = vrot.lane.b32.xlu0 %v1507_v53, %s5193_s7  ;;  %1943 = vrot.lane.b32.xlu1 %v5491_v16, %s6697_s10 }
 0x1bd   : > { %1947 = vrot.lane.b32.xlu2 %v5518_v47, %s6697_s10  ;;  %1539 = vmatpush.bf16.xpose.msrb.mxu1 %v1529_v18 }
 0x1be   : > { %1687 = vmatpush.bf16.msrb.mxu2 %v5539_v14 }
 0x1c4   : > { %1957 = vrot.lane.b32.xlu0 %v1508_v3, %s6697_s10  ;;  %2167 = vrot.lane.b32.xlu1 %v5499_v25, %s5195_s11 }
 0x1c5   : > { %2171 = vrot.lane.b32.xlu2 %v1504_v19, %s5195_s11  ;;  %1540 = vmatpush.bf16.xpose.msrb.mxu1 %v1526_v20 }
 0x1cc   : > { %1955 = vrot.lane.b32.xlu0 %v1507_v53, %s6697_s10  ;;  %1949 = vrot.lane.b32.xlu1 %v1504_v19, %s6697_s10 }
 0x1cd   : > { %1896 = vrot.lane.b32.xlu2 %v1667_v62, %s5193_s7  ;;  %1541 = vmatpush.bf16.xpose.msrb.mxu1 %v1523_v21 }
 0x1d4   : > { %1719 = vrot.lane.b32.xlu0 %v1504_v19, %s5193_s7  ;;  %1892 = vrot.lane.b32.xlu1 %v5535_v12, %s5193_s7 }
 0x1d5   : > { %4535 = vmatmul.msk.bf16.vlgmr.msrb.gmra.mxu1 %vm1509_vm3, %v5491_v16 }
 0x1d8   : > { %v1714_v11 = vpop.permute.xlu2 %1713 }
 0x1dc   : > { %2173 = vrot.lane.b32.xlu0 %v5510_v39, %s5195_s11  ;;  %2118 = vrot.lane.b32.xlu1 %v1667_v62, %s6697_s10 }
 0x1e4   : > { %1945 = vrot.lane.b32.xlu0 %v5499_v25, %s6697_s10  ;;  %2340 = vrot.lane.b32.xlu1 %v1667_v62, %s5195_s11 }
 0x1e5   : > { %4536 = vmatmul.msk.bf16.gmra.mxu1 %vm1509_vm3, %v5499_v25 }
 0x1e8   : > { %v1716_v22 = vpop.permute.xlu2 %1715 }
 0x1ec   : > { %2169 = vrot.lane.b32.xlu0 %v5518_v47, %s5195_s11 }
 0x1f0   : > { %v1954_v23 = vpop.permute.xlu2 %1953 }
 0x1f1   : > { %v1975_v55 = vsel %vm1509_vm3, %v1954_v23, 0 }
 0x1f4   : > { %1894 = vrot.lane.b32.xlu0 %v5526_v6, %s5193_s7 }
 0x1f5   : > { %4537 = vmatmul.msk.bf16.gmra.mxu1 %vm1509_vm3, %v5518_v47 }
 0x1f8   : > { %v1952_v16 = vpop.permute.xlu2 %1951 }
 0x1f9   : > { %v1972_v60 = vsel %vm1509_vm3, %v1952_v16, 0 }
 0x1fc   : > { %1890 = vrot.lane.b32.xlu0 %v5539_v14, %s5193_s7 }
 0x200   : > { %v5585_v25 = vpop.permute.xlu2 %2165 }
 0x204   : > { %2116 = vrot.lane.b32.xlu0 %v5526_v6, %s6697_s10 }
 0x205   : > { %4538 = vmatmul.msk.bf16.gmra.mxu1 %vm1509_vm3, %v1504_v19 }
 0x206   : > { %v1728_v24 = vpop.permute.xlu1 %1727 }
 0x207   : > { %v1749_v46 = vsel %vm1509_vm3, %v1728_v24, 0 }
 0x20e   : > { %v1726_v26 = vpop.permute.xlu1 %1725 }
 0x20f   : > { %v2180_v27 = vpop.permute.xlu2 %2179  ;;  %v1746_v49 = vsel %vm1509_vm3, %v1726_v26, 0 }
 0x210   : > { %v2203_v51 = vsel %vm1509_vm3, %v2180_v27, 0 }
 0x216   : > { %v1718_v29 = vpop.permute.xlu1 %1717 }
 0x217   : > { %v5587_v30 = vpop.permute.xlu2 %1947 }
 0x21e   : > { %v2178_v31 = vpop.permute.xlu1 %2177 }
 0x21f   : > { %v5589_v33 = vpop.permute.xlu2 %2171  ;;  %v2200_v57 = vsel %vm1509_vm3, %v2178_v31, 0 }
 0x226   : > { %v1732_v34 = vpop.permute.xlu0 %1731  ;;  %v2176_v35 = vpop.permute.xlu1 %2175 }
 0x227   : > { %v1897_v36 = vpop.permute.xlu2 %1896  ;;  %v1755_v37 = vsel %vm1509_vm3, %v1732_v34, 0  ;;  %v2197_v61 = vsel %vm1509_vm3, %v2176_v35, 0 }
 0x228   : > { %1918 = vmatpush.bf16.msrb.mxu0 %v1897_v36  ;;  %1761 = vmatpush.bf16.xpose.msrb.mxu3 %v1755_v37 }
 0x22e   : > { %v1730_v38 = vpop.permute.xlu0 %1729  ;;  %v1944_v39 = vpop.permute.xlu1 %1943 }
 0x22f   : > { %v1752_v41 = vsel %vm1509_vm3, %v1730_v38, 0 }
 0x230   : > { %1762 = vmatpush.bf16.xpose.msrb.mxu3 %v1752_v41 }
 0x236   : > { %v1958_v42 = vpop.permute.xlu0 %1957  ;;  %v5593_v43 = vpop.permute.xlu1 %2167 }
 0x237   : > { %v1981_v45 = vsel %vm1509_vm3, %v1958_v42, 0 }
 0x238   : > { %1763 = vmatpush.bf16.xpose.msrb.mxu3 %v1749_v46  ;;  %1987 = vmatpush.bf16.xpose.msra.mxu1 %v1981_v45 }
 0x23e   : > { %v1956_v47 = vpop.permute.xlu0 %1955  ;;  %v5597_v48 = vpop.permute.xlu1 %1949 }
 0x23f   : > { %v1978_v50 = vsel %vm1509_vm3, %v1956_v47, 0 }
 0x240   : > { %1764 = vmatpush.bf16.xpose.msrb.mxu3 %v1746_v49  ;;  %1988 = vmatpush.bf16.xpose.msra.mxu1 %v1978_v50 }
 0x246   : > { %v1720_v53 = vpop.permute.xlu0 %1719  ;;  %v1893_v54 = vpop.permute.xlu1 %1892 }
 0x247   : > { %4543 = vmatmul.msk.bf16.vlgmr.msrb.gmra.mxu3 %vm1509_vm3, %v1714_v11 }
 0x248   : > { %2209 = vmatpush.bf16.xpose.msra.mxu3 %v2203_v51  ;;  %1989 = vmatpush.bf16.xpose.msra.mxu1 %v1975_v55 }
 0x24e   : > { %v2174_v58 = vpop.permute.xlu0 %2173  ;;  %v2119_v59 = vpop.permute.xlu1 %2118 }
 0x24f   : > { %2140 = vmatpush.bf16.msra.mxu2 %v2119_v59  ;;  %v2194_v3 = vsel %vm1509_vm3, %v2174_v58, 0 }
 0x250   : > { %2210 = vmatpush.bf16.xpose.msra.mxu3 %v2200_v57  ;;  %1990 = vmatpush.bf16.xpose.msra.mxu1 %v1972_v60 }
 0x252   : > { %v1543_v62 = vpop.f32.mrf.mxu1 }
 0x253   : > { %v1563_v63 = vmul.f32 0.35355338, %v1543_v62 }
 0x255   : > { %v1572_v1 = vsel %vm1571_vm4, %v1563_v63, -inf }
 0x256   : > { %1573 = vmax.xlane.f32.xlu0 %v1572_v1  ;;  %v1946_v2 = vpop.permute.xlu0 %1945  ;;  %v2341_v11 = vpop.permute.xlu1 %2340 }
 0x257   : > { %4544 = vmatmul.msk.bf16.gmra.mxu3 %vm1509_vm3, %v1716_v22  ;;  %4551 = vmatmul.msk.bf16.vlgmr.msra.gmra.mxu1 %vm1509_vm3, %v1944_v39 }
 0x258   : > { %2211 = vmatpush.bf16.xpose.msra.mxu3 %v2197_v61 }
 0x25a   : > { %v1545_v5 = vpop.f32.mrf.mxu1 }
 0x25b   : > { %v5611_v7 = vmul.f32 0.35355338, %v1545_v5 }
 0x25d   : > { %v1575_v8 = vsel %vm1571_vm4, %v5611_v7, -inf }
 0x25e   : > { %1576 = vmax.xlane.f32.xlu1 %v1575_v8  ;;  %v2170_v9 = vpop.permute.xlu0 %2169 }
 0x260   : > { %2212 = vmatpush.bf16.xpose.msra.mxu3 %v2194_v3 }
 0x262   : > { %v1548_v13 = vpop.f32.mrf.mxu1 }
 0x263   : > { %v1565_v15 = vmul.f32 0.35355338, %v1548_v13 }
 0x265   : > { %v1578_v18 = vsel %vm1571_vm4, %v1565_v15, -inf }
 0x266   : > { %1579 = vmax.xlane.f32.xlu0 %v1578_v18  ;;  %v1895_v10 = vpop.permute.xlu0 %1894 }
 0x267   : > { %4545 = vmatmul.msk.bf16.gmra.mxu3 %vm1509_vm3, %v1718_v29  ;;  %1919 = vmatpush.bf16.msrb.mxu0 %v1895_v10 }
 0x268   : > { %4552 = vmatmul.msk.bf16.gmra.mxu1 %vm1509_vm3, %v1946_v2 }
 0x26a   : > { %v1550_v17 = vpop.f32.mrf.mxu1 }
 0x26b   : > { %v5618_v19 = vmul.f32 0.35355338, %v1550_v17  ;;  %1920 = vmatpush.bf16.msrb.mxu0 %v1893_v54 }
 0x26d   : > { %v1581_v20 = vsel %vm1571_vm4, %v5618_v19, -inf }
 0x26e   : > { %1582 = vmax.xlane.f32.xlu1 %v1581_v20  ;;  %v1891_v21 = vpop.permute.xlu0 %1890 }
 0x26f   : > { %1921 = vmatpush.bf16.msrb.mxu0 %v1891_v21 }
 0x272   : > { %v1553_v22 = vpop.f32.mrf.mxu1 }
 0x273   : > { %2362 = vmatpush.bf16.msra.mxu0 %v2341_v11  ;;  %v5622_v23 = vmul.f32 0.35355338, %v1553_v22 }
 0x275   : > { %v1584_v16 = vsel %vm1571_vm4, %v5622_v23, -inf }
 0x276   : > { %1585 = vmax.xlane.f32.xlu1 %v1584_v16  ;;  %v2117_v24 = vpop.permute.xlu0 %2116 }
 0x277   : > { %4546 = vmatmul.msk.bf16.gmra.mxu3 %vm1509_vm3, %v1720_v53  ;;  %2141 = vmatpush.bf16.msra.mxu2 %v2117_v24 }
 0x278   : > { %4553 = vmatmul.msk.bf16.gmra.mxu1 %vm1509_vm3, %v5587_v30 }
 0x27a   : > { %v1555_v26 = vpop.f32.mrf.mxu1 }
 0x27b   : > { %v5629_v27 = vmul.f32 0.35355338, %v1555_v26 }
 0x27d   : > { %v1587_v29 = vsel %vm1571_vm4, %v5629_v27, -inf }
 0x27e   : > { %1588 = vmax.xlane.f32.xlu2 %v1587_v29 }
 0x282   : > { %v1558_v31 = vpop.f32.mrf.mxu1 }
 0x283   : > { %v5633_v34 = vmul.f32 0.35355338, %v1558_v31 }
 0x285   : > { %v1590_v35 = vsel %vm1571_vm4, %v5633_v34, -inf }
 0x286   : > { %1591 = vmax.xlane.f32.xlu2 %v1590_v35 }
 0x287   : > { %4559 = vmatmul.msk.bf16.vlgmr.msra.gmra.mxu3 %vm1509_vm3, %v5585_v25 }
 0x288   : > { %4554 = vmatmul.msk.bf16.gmra.mxu1 %vm1509_vm3, %v5597_v48 }
 0x28a   : > { %v1560_v30 = vpop.f32.mrf.mxu1 }
 0x28b   : > { %v5641_v36 = vmul.f32 0.35355338, %v1560_v30 }
 0x28d   : > { %v1593_v37 = vsel %vm1571_vm4, %v5641_v36, -inf }
 0x28e   : > { %1594 = vmax.xlane.f32.xlu0 %v1593_v37 }
 0x297   : > { %4560 = vmatmul.msk.bf16.gmra.mxu3 %vm1509_vm3, %v5593_v43 }
 0x2a7   : > { %4561 = vmatmul.msk.bf16.gmra.mxu3 %vm1509_vm3, %v2170_v9 }
 0x2b7   : > { %4562 = vmatmul.msk.bf16.gmra.mxu3 %vm1509_vm3, %v5589_v33 }
 0x2c9   : > { %v1574_v38 = vpop.xlane.xlu0 %1573 }
 0x2ca   : > { %v1596_v25 = vsub.f32 %v1563_v63, %v1574_v38  ;;  %v1766_v39 = vpop.f32.mrf.mxu3 }
 0x2cb   : > { %v5658_v53 = vmul.f32 0.35355338, %v1766_v39 }
 0x2cc   : > { %v1604_v41 = vmul.f32 1.442695, %v1596_v25 }
 0x2cd   : > { %v1794_v58 = vsel %vm1571_vm4, %v5658_v53, -inf }
 0x2ce   : > { %4939 = vpow2.f32 %v1604_v41 }
 0x2d1   : > { %v1577_v49 = vpop.xlane.xlu1 %1576 }
 0x2d2   : > { %v1768_v42 = vpop.f32.mrf.mxu3  ;;  %v1597_v3 = vsub.f32 %v5611_v7, %v1577_v49 }
 0x2d3   : > { %v5666_v62 = vmul.f32 0.35355338, %v1768_v42 }
 0x2d4   : > { %v5650_v45 = vpop.eup %4939  ;;  %v1992_v46 = vpop.f32.mrf.mxu1  ;;  %v1606_v8 = vmul.f32 1.442695, %v1597_v3 }
 0x2d5   : > { %v5652_v47 = vmul.f32 0.35355338, %v1992_v46  ;;  %v1620_v48 = vsel %vm1571_vm4, %v5650_v45, 0.0  ;;  %v1797_v5 = vsel %vm1571_vm4, %v5666_v62, -inf }
 0x2d6   : > { %1621 = vadd.xlane.f32.xlu1 %v1620_v48 }
 0x2d7   : > { %v2020_v43 = vsel %vm1571_vm4, %v5652_v47, -inf }
 0x2d8   : > { %2021 = vmax.xlane.f32.xlu2 %v2020_v43 }
 0x2d9   : > { %v1580_v33 = vpop.xlane.xlu0 %1579 }
 0x2da   : > { %v1598_v50 = vsub.f32 %v1565_v15, %v1580_v33  ;;  %v1771_v51 = vpop.f32.mrf.mxu3 }
 0x2db   : > { %v5697_v25 = vmul.f32 0.35355338, %v1771_v51 }
 0x2dc   : > { %v1608_v54 = vmul.f32 1.442695, %v1598_v50  ;;  %v1994_v55 = vpop.f32.mrf.mxu1 }
 0x2dd   : > { %v5660_v57 = vmul.f32 0.35355338, %v1994_v55  ;;  %v1800_v48 = vsel %vm1571_vm4, %v5697_v25, -inf }
 0x2de   : > { %4941 = vpow2.f32 %v1608_v54 }
 0x2df   : > { %v2023_v59 = vsel %vm1571_vm4, %v5660_v57, -inf  ;;  %4943 = vpow2.f32 %v1606_v8 }
 0x2e0   : > { %1795 = vmax.xlane.f32.xlu2 %v1794_v58  ;;  %2024 = vmax.xlane.f32.xlu0 %v2023_v59 }
 0x2e1   : > { %v1583_v60 = vpop.xlane.xlu1 %1582 }
 0x2e2   : > { %v1773_v61 = vpop.f32.mrf.mxu3  ;;  %v1599_v29 = vsub.f32 %v5618_v19, %v1583_v60 }
 0x2e3   : > { %v5686_v24 = vmul.f32 0.35355338, %v1773_v61 }
 0x2e4   : > { %v5668_v63 = vpop.eup %4941  ;;  %v1610_v37 = vmul.f32 1.442695, %v1599_v29 }
 0x2e5   : > { %v1997_v1 = vpop.f32.mrf.mxu1  ;;  %v1626_v2 = vsel %vm1571_vm4, %v5668_v63, 0.0  ;;  %v5684_v16 = vpop.eup %4943  ;;  %v1803_v30 = vsel %vm1571_vm4, %v5686_v24, -inf }
 0x2e6   : > { %1627 = vadd.xlane.f32.xlu1 %v1626_v2  ;;  %v5675_v13 = vmul.f32 0.35355338, %v1997_v1 }
 0x2e8   : > { %1798 = vmax.xlane.f32.xlu2 %v1797_v5  ;;  %v2026_v20 = vsel %vm1571_vm4, %v5675_v13, -inf }
 0x2e9   : > { %v1586_v15 = vpop.xlane.xlu1 %1585 }
 0x2ea   : > { %v1776_v9 = vpop.f32.mrf.mxu3  ;;  %v1600_v17 = vsub.f32 %v5622_v23, %v1586_v15  ;;  %v1623_v23 = vsel %vm1571_vm4, %v5684_v16, 0.0 }
 0x2eb   : > { %v5699_v19 = vmul.f32 0.35355338, %v1776_v9 }
 0x2ec   : > { %v1612_v22 = vmul.f32 1.442695, %v1600_v17 }
 0x2ed   : > { %v1999_v18 = vpop.f32.mrf.mxu1  ;;  %v1806_v33 = vsel %vm1571_vm4, %v5699_v19, -inf }
 0x2ee   : > { %v5677_v10 = vmul.f32 0.35355338, %v1999_v18  ;;  %4945 = vpow2.f32 %v1612_v22 }
 0x2ef   : > { %4947 = vpow2.f32 %v1610_v37 }
 0x2f0   : > { %2027 = vmax.xlane.f32.xlu2 %v2026_v20  ;;  %v2029_v7 = vsel %vm1571_vm4, %v5677_v10, -inf }
 0x2f1   : > { %2030 = vmax.xlane.f32.xlu0 %v2029_v7  ;;  %v1589_v21 = vpop.xlane.xlu2 %1588 }
 0x2f2   : > { %v1778_v11 = vpop.f32.mrf.mxu3 }
 0x2f3   : > { %v5712_v54 = vmul.f32 0.35355338, %v1778_v11 }
 0x2f4   : > { %v5701_v41 = vpop.eup %4945 }
 0x2f5   : > { %v2002_v26 = vpop.f32.mrf.mxu1  ;;  %v1632_v43 = vsel %vm1571_vm4, %v5701_v41, 0.0  ;;  %v5710_v51 = vpop.eup %4947  ;;  %v1809_v60 = vsel %vm1571_vm4, %v5712_v54, -inf }
 0x2f6   : > { %v5689_v31 = vmul.f32 0.35355338, %v2002_v26  ;;  %v1629_v59 = vsel %vm1571_vm4, %v5710_v51, 0.0 }
 0x2f8   : > { %1624 = vadd.xlane.f32.xlu2 %v1623_v23  ;;  %v2032_v35 = vsel %vm1571_vm4, %v5689_v31, -inf }
 0x2f9   : > { %2033 = vmax.xlane.f32.xlu1 %v2032_v35  ;;  %1804 = vmax.xlane.f32.xlu0 %v1803_v30  ;;  %v1592_v39 = vpop.xlane.xlu2 %1591 }
 0x2fa   : > { %v1781_v38 = vpop.f32.mrf.mxu3  ;;  %v1602_v46 = vsub.f32 %v5633_v34, %v1592_v39  ;;  %v1601_v34 = vsub.f32 %v5629_v27, %v1589_v21 }
 0x2fb   : > { %v5725_v27 = vmul.f32 0.35355338, %v1781_v38 }
 0x2fc   : > { %v1616_v50 = vmul.f32 1.442695, %v1602_v46  ;;  %v1614_v1 = vmul.f32 1.442695, %v1601_v34 }
 0x2fd   : > { %v2004_v42 = vpop.f32.mrf.mxu1  ;;  %v1812_v15 = vsel %vm1571_vm4, %v5725_v27, -inf }
 0x2fe   : > { %4949 = vpow2.f32 %v1616_v50  ;;  %v5723_v3 = vmul.f32 0.35355338, %v2004_v42 }
 0x2ff   : > { %4951 = vpow2.f32 %v1614_v1 }
 0x300   : > { %1801 = vmax.xlane.f32.xlu2 %v1800_v48  ;;  %v2035_v8 = vsel %vm1571_vm4, %v5723_v3, -inf }
 0x301   : > { %1633 = vadd.xlane.f32.xlu1 %v1632_v43  ;;  %1807 = vmax.xlane.f32.xlu0 %v1806_v33  ;;  %v1595_v17 = vpop.xlane.xlu0 %1594 }
 0x302   : > { %v1783_v49 = vpop.f32.mrf.mxu3  ;;  %v1603_v21 = vsub.f32 %v5641_v36, %v1595_v17 }
 0x303   : > { %v5737_v7 = vmul.f32 0.35355338, %v1783_v49 }
 0x304   : > { %v5727_v5 = vpop.eup %4949  ;;  %v1618_v29 = vmul.f32 1.442695, %v1603_v21 }
 0x305   : > { %v2007_v55 = vpop.f32.mrf.mxu1  ;;  %v1638_v9 = vsel %vm1571_vm4, %v5727_v5, 0.0  ;;  %v5735_v20 = vpop.eup %4951  ;;  %v1815_v26 = vsel %vm1571_vm4, %v5737_v7, -inf }
 0x306   : > { %v5715_v58 = vmul.f32 0.35355338, %v2007_v55  ;;  %v1635_v11 = vsel %vm1571_vm4, %v5735_v20, 0.0  ;;  %4953 = vpow2.f32 %v1618_v29 }
 0x308   : > { %1630 = vadd.xlane.f32.xlu2 %v1629_v59  ;;  %v2038_v61 = vsel %vm1571_vm4, %v5715_v58, -inf }
 0x309   : > { %1810 = vmax.xlane.f32.xlu1 %v1809_v60  ;;  %2039 = vmax.xlane.f32.xlu0 %v2038_v61 }
 0x30a   : > { %v2214_v2 = vpop.f32.mrf.mxu3 }
 0x30b   : > { %v5760_v33 = vmul.f32 0.35355338, %v2214_v2 }
 0x30c   : > { %v5752_v39 = vpop.eup %4953 }
 0x30d   : > { %v2009_v22 = vpop.f32.mrf.mxu1  ;;  %v1641_v46 = vsel %vm1571_vm4, %v5752_v39, 0.0  ;;  %v2242_v50 = vsel %vm1571_vm4, %v5760_v33, -inf }
 0x30e   : > { %v5744_v35 = vmul.f32 0.35355338, %v2009_v22 }
 0x310   : > { %2036 = vmax.xlane.f32.xlu2 %v2035_v8  ;;  %v2041_v37 = vsel %vm1571_vm4, %v5744_v35, -inf }
 0x311   : > { %1639 = vadd.xlane.f32.xlu1 %v1638_v9  ;;  %1813 = vmax.xlane.f32.xlu0 %v1812_v15 }
 0x312   : > { %v2216_v18 = vpop.f32.mrf.mxu3 }
 0x313   : > { %v5746_v30 = vmul.f32 0.35355338, %v2216_v18 }
 0x315   : > { %v2245_v36 = vsel %vm1571_vm4, %v5746_v30, -inf }
 0x318   : > { %1636 = vadd.xlane.f32.xlu2 %v1635_v11 }
 0x319   : > { %1816 = vmax.xlane.f32.xlu1 %v1815_v26 }
 0x31a   : > { %v2219_v23 = vpop.f32.mrf.mxu3 }
 0x31b   : > { %v5754_v42 = vmul.f32 0.35355338, %v2219_v23 }
 0x31d   : > { %v2248_v48 = vsel %vm1571_vm4, %v5754_v42, -inf }
 0x320   : > { %2042 = vmax.xlane.f32.xlu2 %v2041_v37 }
 0x321   : > { %2246 = vmax.xlane.f32.xlu1 %v2245_v36 }
 0x322   : > { %v2221_v38 = vpop.f32.mrf.mxu3 }
 0x323   : > { %v5768_v59 = vmul.f32 0.35355338, %v2221_v38 }
 0x325   : > { %v2251_v1 = vsel %vm1571_vm4, %v5768_v59, -inf }
 0x328   : > { %1642 = vadd.xlane.f32.xlu2 %v1641_v46 }
 0x329   : > { %2249 = vmax.xlane.f32.xlu1 %v2248_v48 }
 0x32a   : > { %v2224_v43 = vpop.f32.mrf.mxu3 }
 0x32b   : > { %v5762_v49 = vmul.f32 0.35355338, %v2224_v43 }
 0x32d   : > { %v2254_v55 = vsel %vm1571_vm4, %v5762_v49, -inf }
 0x330   : > { %2243 = vmax.xlane.f32.xlu2 %v2242_v50 }
 0x331   : > { %2255 = vmax.xlane.f32.xlu1 %v2254_v55 }
 0x332   : > { %v2226_v34 = vpop.f32.mrf.mxu3 }
 0x333   : > { %v5770_v60 = vmul.f32 0.35355338, %v2226_v34 }
 0x335   : > { %v2257_v61 = vsel %vm1571_vm4, %v5770_v60, -inf }
 0x336   : > { %2258 = vmax.xlane.f32.xlu0 %v2257_v61 }
 0x338   : > { %2252 = vmax.xlane.f32.xlu2 %v2251_v1 }
 0x33a   : > { %v2229_v2 = vpop.f32.mrf.mxu3 }
 0x33b   : > { %v5776_v8 = vmul.f32 0.35355338, %v2229_v2 }
 0x33d   : > { %v2260_v9 = vsel %vm1571_vm4, %v5776_v8, -inf }
 0x340   : > { %2261 = vmax.xlane.f32.xlu2 %v2260_v9 }
 0x342   : > { %v2231_v15 = vpop.f32.mrf.mxu3 }
 0x343   : > { %v5780_v18 = vmul.f32 0.35355338, %v2231_v15 }
 0x345   : > { %v2263_v17 = vsel %vm1571_vm4, %v5780_v18, -inf }
 0x348   : > { %2264 = vmax.xlane.f32.xlu2 %v2263_v17 }
 0x34b   : > { %v2022_v21 = vpop.xlane.xlu2 %2021 }
 0x34c   : > { %v2044_v11 = vsub.f32 %v5652_v47, %v2022_v21  ;;  %v1622_v47 = vpop.xlane.xlu1 %1621 }
 0x34e   : > { %v2052_v22 = vmul.f32 1.442695, %v2044_v11 }
 0x350   : > { %4955 = vpow2.f32 %v2052_v22 }
 0x353   : > { %v1796_v26 = vpop.xlane.xlu2 %1795  ;;  %v2025_v29 = vpop.xlane.xlu0 %2024 }
 0x354   : > { %v1818_v23 = vsub.f32 %v5658_v53, %v1796_v26  ;;  %v2045_v37 = vsub.f32 %v5660_v57, %v2025_v29 }
 0x356   : > { %v5787_v36 = vpop.eup %4955  ;;  %v1826_v38 = vmul.f32 1.442695, %v1818_v23  ;;  %v2054_v46 = vmul.f32 1.442695, %v2045_v37 }
 0x357   : > { %v2068_v48 = vsel %vm1571_vm4, %v5787_v36, 0.0 }
 0x358   : > { %4957 = vpow2.f32 %v1826_v38  ;;  %2069 = vadd.xlane.f32.xlu0 %v2068_v48 }
 0x359   : > { %4959 = vpow2.f32 %v2054_v46  ;;  %v1628_v2 = vpop.xlane.xlu1 %1627 }
 0x35b   : > { %v1799_v43 = vpop.xlane.xlu2 %1798 }
 0x35c   : > { %v1819_v50 = vsub.f32 %v5666_v62, %v1799_v43 }
 0x35e   : > { %v5792_v55 = vpop.eup %4957  ;;  %v1828_v34 = vmul.f32 1.442695, %v1819_v50 }
 0x35f   : > { %v5794_v53 = vpop.eup %4959  ;;  %v1842_v57 = vsel %vm1571_vm4, %v5792_v55, 0.0 }
 0x360   : > { %4961 = vpow2.f32 %v1828_v34  ;;  %1843 = vadd.xlane.f32.xlu0 %v1842_v57  ;;  %v2071_v61 = vsel %vm1571_vm4, %v5794_v53, 0.0 }
 0x361   : > { %2072 = vadd.xlane.f32.xlu2 %v2071_v61  ;;  %4963 = vrcp.f32 %v1622_v47 }
 0x363   : > { %v5800_v1 = vpop.xlane.xlu2 %2027 }
 0x364   : > { %v5802_v9 = vpop.xlane.xlu0 %2030 }
 0x366   : > { %v5804_v62 = vpop.eup %4961 }
 0x367   : > { %v1845_v15 = vsel %vm1571_vm4, %v5804_v62, 0.0  ;;  %v4964_v29 = vpop.eup %4963 }
 0x368   : > { %1846 = vadd.xlane.f32.xlu1 %v1845_v15  ;;  %v1652_v37 = vmul.f32 %v4964_v29, %v5650_v45 }
 0x36b   : > { %v1625_v17 = vpop.xlane.xlu2 %1624 }
 0x36c   : > { %4965 = vrcp.f32 %v1625_v17  ;;  %v5808_v21 = vpop.xlane.xlu1 %2033  ;;  %v1805_v11 = vpop.xlane.xlu0 %1804 }
 0x36d   : > { %v1821_v22 = vsub.f32 %v5686_v24, %v1805_v11 }
 0x36f   : > { %v1832_v26 = vmul.f32 1.442695, %v1821_v22 }
 0x371   : > { %4967 = vpow2.f32 %v1832_v26 }
 0x372   : > { %v4966_v23 = vpop.eup %4965 }
 0x373   : > { %v1653_v38 = vmul.f32 %v4966_v23, %v5684_v16  ;;  %v1802_v46 = vpop.xlane.xlu2 %1801 }
 0x374   : > { %v1820_v48 = vsub.f32 %v5697_v25, %v1802_v46  ;;  %v1634_v43 = vpop.xlane.xlu1 %1633  ;;  %v1808_v47 = vpop.xlane.xlu0 %1807  ;;  %2114 = vrot.lane.b32.xlu0 %v5535_v12, %s6697_s10 }
 0x375   : > { %v1822_v50 = vsub.f32 %v5699_v19, %v1808_v47  ;;  %v1660_v34 = vpack.c.bf16 %v1653_v38, %v1652_v37 }
 0x376   : > { %v1830_v24 = vmul.f32 1.442695, %v1820_v48 }
 0x377   : > { %v1834_v57 = vmul.f32 1.442695, %v1822_v50  ;;  %4539 = vmatmul.msk.bf16.vlgmr.msrb.gmra.mxu2 %vm1571_vm4, %v1660_v34  ;;  %v5818_v61 = vpop.eup %4967 }
 0x378   : > { %4969 = vpow2.f32 %v1830_v24  ;;  %v1851_v45 = vsel %vm1571_vm4, %v5818_v61, 0.0 }
 0x379   : > { %4971 = vpow2.f32 %v1834_v57  ;;  %1852 = vadd.xlane.f32.xlu1 %v1851_v45 }
 0x37a   : > { %4973 = vrcp.f32 %v1628_v2 }
 0x37b   : > { %v1631_v16 = vpop.xlane.xlu2 %1630 }
 0x37c   : > { %4975 = vrcp.f32 %v1631_v16  ;;  %v1811_v25 = vpop.xlane.xlu1 %1810  ;;  %v5822_v15 = vpop.xlane.xlu0 %2039  ;;  %2338 = vrot.lane.b32.xlu0 %v5526_v6, %s5195_s11 }
 0x37d   : > { %v1823_v19 = vsub.f32 %v5712_v54, %v1811_v25 }
 0x37e   : > { %v5827_v17 = vpop.eup %4969 }
 0x37f   : > { %v5829_v11 = vpop.eup %4971  ;;  %v1836_v22 = vmul.f32 1.442695, %v1823_v19  ;;  %v1848_v26 = vsel %vm1571_vm4, %v5827_v17, 0.0 }
 0x380   : > { %v4974_v2 = vpop.eup %4973  ;;  %1849 = vadd.xlane.f32.xlu2 %v1848_v26  ;;  %v1854_v29 = vsel %vm1571_vm4, %v5829_v11, 0.0 }
 0x381   : > { %4977 = vpow2.f32 %v1836_v22  ;;  %1855 = vadd.xlane.f32.xlu1 %v1854_v29  ;;  %v1654_v6 = vmul.f32 %v4974_v2, %v5668_v63 }
 0x382   : > { %v4976_v23 = vpop.eup %4975 }
 0x383   : > { %v5835_v37 = vpop.xlane.xlu2 %2036  ;;  %v1655_v54 = vmul.f32 %v4976_v23, %v5710_v51 }
 0x384   : > { %v1640_v38 = vpop.xlane.xlu1 %1639  ;;  %v1814_v46 = vpop.xlane.xlu0 %1813  ;;  %2336 = vrot.lane.b32.xlu0 %v5535_v12, %s5195_s11 }
 0x385   : > { %v1824_v48 = vsub.f32 %v5725_v27, %v1814_v46  ;;  %v1661_v47 = vpack.c.bf16 %v1655_v54, %v1654_v6 }
 0x387   : > { %v5842_v50 = vpop.eup %4977  ;;  %v1838_v34 = vmul.f32 1.442695, %v1824_v48  ;;  %4540 = vmatmul.msk.bf16.gmra.mxu2 %vm1571_vm4, %v1661_v47 }
 0x388   : > { %v1857_v24 = vsel %vm1571_vm4, %v5842_v50, 0.0 }
 0x389   : > { %4979 = vpow2.f32 %v1838_v34  ;;  %1858 = vadd.xlane.f32.xlu2 %v1857_v24 }
 0x38a   : > { %4981 = vrcp.f32 %v1634_v43 }
 0x38b   : > { %v1637_v63 = vpop.xlane.xlu2 %1636 }
 0x38c   : > { %v1817_v51 = vpop.xlane.xlu1 %1816  ;;  %4983 = vrcp.f32 %v1637_v63 }
 0x38d   : > { %v1825_v57 = vsub.f32 %v5737_v7, %v1817_v51 }
 0x38f   : > { %v5848_v12 = vpop.eup %4979  ;;  %v1840_v27 = vmul.f32 1.442695, %v1825_v57 }
 0x390   : > { %v4982_v45 = vpop.eup %4981  ;;  %v1860_v16 = vsel %vm1571_vm4, %v5848_v12, 0.0 }
 0x391   : > { %4985 = vpow2.f32 %v1840_v27  ;;  %1861 = vadd.xlane.f32.xlu2 %v1860_v16  ;;  %v1656_v22 = vmul.f32 %v4982_v45, %v5701_v41  ;;  %v2046_v41 = vsub.f32 %v5675_v13, %v5800_v1  ;;  %v2049_v16 = vsub.f32 %v5723_v3, %v5835_v37 }
 0x392   : > { %v4984_v25 = vpop.eup %4983 }
 0x393   : > { %v2043_v19 = vpop.xlane.xlu2 %2042  ;;  %v1657_v43 = vmul.f32 %v4984_v25, %v5735_v20  ;;  %v2056_v46 = vmul.f32 1.442695, %v2046_v41 }
 0x394   : > { %v2247_v26 = vpop.xlane.xlu1 %2246 }
 0x395   : > { %v2267_v2 = vsub.f32 %v5746_v30, %v2247_v26  ;;  %v1662_v29 = vpack.c.bf16 %v1657_v43, %v1656_v22 }
 0x397   : > { %v5855_v7 = vpop.eup %4985  ;;  %v2276_v23 = vmul.f32 1.442695, %v2267_v2  ;;  %4541 = vmatmul.msk.bf16.gmra.mxu2 %vm1571_vm4, %v1662_v29 }
 0x398   : > { %v1863_v6 = vsel %vm1571_vm4, %v5855_v7, 0.0 }
 0x399   : > { %4987 = vpow2.f32 %v2276_v23  ;;  %1864 = vadd.xlane.f32.xlu1 %v1863_v6  ;;  %v2051_v23 = vsub.f32 %v5744_v35, %v2043_v19 }
 0x39a   : > { %4989 = vrcp.f32 %v1640_v38 }
 0x39b   : > { %v1643_v54 = vpop.xlane.xlu2 %1642 }
 0x39c   : > { %4991 = vrcp.f32 %v1643_v54  ;;  %v2250_v47 = vpop.xlane.xlu1 %2249 }
 0x39d   : > { %4993 = vpow2.f32 %v2056_v46  ;;  %v2268_v51 = vsub.f32 %v5754_v42, %v2250_v47 }
 0x39f   : > { %v5862_v20 = vpop.eup %4987  ;;  %v2278_v27 = vmul.f32 1.442695, %v2268_v51 }
 0x3a0   : > { %v4990_v30 = vpop.eup %4989  ;;  %v2293_v48 = vsel %vm1571_vm4, %v5862_v20, 0.0 }
 0x3a1   : > { %2294 = vadd.xlane.f32.xlu1 %v2293_v48  ;;  %v1658_v63 = vmul.f32 %v4990_v30, %v5727_v5 }
 0x3a2   : > { %v4992_v34 = vpop.eup %4991 }
 0x3a3   : > { %v2244_v24 = vpop.xlane.xlu2 %2243  ;;  %v1659_v38 = vmul.f32 %v4992_v34, %v5752_v39  ;;  %v5871_v45 = vpop.eup %4993 }
 0x3a4   : > { %v2266_v13 = vsub.f32 %v5760_v33, %v2244_v24  ;;  %v2074_v39 = vsel %vm1571_vm4, %v5871_v45, 0.0  ;;  %v2062_v33 = vmul.f32 1.442695, %v2049_v16  ;;  %v2256_v24 = vpop.xlane.xlu1 %2255 }
 0x3a5   : > { %v1663_v1 = vpack.c.bf16 %v1659_v38, %v1658_v63 }
 0x3a6   : > { %v2274_v57 = vmul.f32 1.442695, %v2266_v13 }
 0x3a7   : > { %4542 = vmatmul.msk.bf16.gmra.mxu2 %vm1571_vm4, %v1663_v1  ;;  %v2047_v1 = vsub.f32 %v5677_v10, %v5802_v9 }
 0x3a8   : > { %4995 = vpow2.f32 %v2274_v57 }
 0x3a9   : > { %4997 = vpow2.f32 %v2278_v27  ;;  %v2259_v22 = vpop.xlane.xlu0 %2258  ;;  %v2058_v27 = vmul.f32 1.442695, %v2047_v1 }
 0x3aa   : > { %4999 = vpow2.f32 %v2062_v33  ;;  %v2271_v26 = vsub.f32 %v5770_v60, %v2259_v22  ;;  %v2066_v60 = vmul.f32 1.442695, %v2051_v23  ;;  %v2048_v22 = vsub.f32 %v5689_v31, %v5808_v21 }
 0x3ab   : > { %v2253_v5 = vpop.xlane.xlu2 %2252 }
 0x3ac   : > { %v2284_v2 = vmul.f32 1.442695, %v2271_v26  ;;  %v2269_v34 = vsub.f32 %v5768_v59, %v2253_v5  ;;  %v2060_v10 = vmul.f32 1.442695, %v2048_v22 }
 0x3ae   : > { %v5877_v25 = vpop.eup %4995  ;;  %2075 = vadd.xlane.f32.xlu0 %v2074_v39  ;;  %5001 = vpow2.f32 %v2284_v2  ;;  %v2280_v63 = vmul.f32 1.442695, %v2269_v34 }
 0x3af   : > { %v2290_v42 = vsel %vm1571_vm4, %v5877_v25, 0.0  ;;  %v5881_v43 = vpop.eup %4997  ;;  %5003 = vpow2.f32 %v2066_v60  ;;  %v2050_v60 = vsub.f32 %v5715_v58, %v5822_v15 }
 0x3b0   : > { %2291 = vadd.xlane.f32.xlu2 %v2290_v42  ;;  %v2296_v3 = vsel %vm1571_vm4, %v5881_v43, 0.0  ;;  %v5888_v29 = vpop.eup %4999 }
 0x3b1   : > { %v2083_v6 = vsel %vm1571_vm4, %v5888_v29, 0.0 }
 0x3b3   : > { %v5886_v37 = vpop.xlane.xlu2 %2261 }
 0x3b4   : > { %v5895_v41 = vpop.eup %5001  ;;  %v2272_v58 = vsub.f32 %v5776_v8, %v5886_v37 }
 0x3b5   : > { %v2305_v46 = vsel %vm1571_vm4, %v5895_v41, 0.0  ;;  %v5902_v35 = vpop.eup %5003 }
 0x3b6   : > { %2297 = vadd.xlane.f32.xlu0 %v2296_v3  ;;  %v2089_v47 = vsel %vm1571_vm4, %v5902_v35, 0.0 }
 0x3ba   : > { %2334 = vrot.lane.b32.xlu1 %v5539_v14, %s5195_s11 }
 0x3bb   : > { %v2265_v54 = vpop.xlane.xlu2 %2264 }
 0x3bc   : > { %v2273_v30 = vsub.f32 %v5780_v18, %v2265_v54 }
 0x3be   : > { %2084 = vadd.xlane.f32.xlu0 %v2083_v6  ;;  %v2288_v48 = vmul.f32 1.442695, %v2273_v30 }
 0x3c0   : > { %5005 = vpow2.f32 %v2288_v48 }
 0x3c1   : > { %5007 = vpow2.f32 %v2280_v63 }
 0x3c6   : > { %2306 = vadd.xlane.f32.xlu0 %v2305_v46  ;;  %v5909_v18 = vpop.eup %5005  ;;  %v2064_v46 = vmul.f32 1.442695, %v2050_v60 }
 0x3c7   : > { %v2311_v38 = vsel %vm1571_vm4, %v5909_v18, 0.0  ;;  %v5913_v13 = vpop.eup %5007 }
 0x3c8   : > { %2112 = vrot.lane.b32.xlu2 %v5539_v14, %s6697_s10  ;;  %v2299_v39 = vsel %vm1571_vm4, %v5913_v13, 0.0 }
 0x3cb   : > { %v5904_v19 = vpop.xlane.xlu0 %2069 }
 0x3ce   : > { %2090 = vadd.xlane.f32.xlu0 %v2089_v47 }
 0x3d3   : > { %v1844_v14 = vpop.xlane.xlu0 %1843 }
 0x3d4   : > { %5009 = vrcp.f32 %v1844_v14  ;;  %v2073_v9 = vpop.xlane.xlu2 %2072 }
 0x3d6   : > { %2312 = vadd.xlane.f32.xlu0 %v2311_v38 }
 0x3da   : > { %v5010_v57 = vpop.eup %5009 }
 0x3db   : > { %v1847_v51 = vpop.xlane.xlu1 %1846  ;;  %v1874_v16 = vmul.f32 %v5010_v57, %v5792_v55 }
 0x3dc   : > { %5011 = vrcp.f32 %v1847_v51 }
 0x3dd   : > { %5013 = vpow2.f32 %v2058_v27 }
 0x3de   : > { %5015 = vpow2.f32 %v2060_v10 }
 0x3e2   : > { %v5012_v59 = vpop.eup %5011 }
 0x3e3   : > { %v1875_v5 = vmul.f32 %v5012_v59, %v5804_v62  ;;  %v5924_v26 = vpop.eup %5013  ;;  %v2270_v62 = vsub.f32 %v5762_v49, %v2256_v24 }
 0x3e4   : > { %2300 = vadd.xlane.f32.xlu1 %v2299_v39  ;;  %v2077_v2 = vsel %vm1571_vm4, %v5924_v26, 0.0  ;;  %v5929_v21 = vpop.eup %5015 }
 0x3e5   : > { %v1882_v42 = vpack.c.bf16 %v1875_v5, %v1874_v16  ;;  %v2282_v23 = vmul.f32 1.442695, %v2270_v62  ;;  %v2080_v49 = vsel %vm1571_vm4, %v5929_v21, 0.0 }
 0x3e6   : > { %v2115_v33 = vpop.permute.xlu0 %2114 }
 0x3e7   : > { %4547 = vmatmul.msk.bf16.vlgmr.msrb.gmra.mxu0 %vm1571_vm4, %v1882_v42  ;;  %2142 = vmatpush.bf16.msra.mxu2 %v2115_v33 }
 0x3ec   : > { %v1853_v3 = vpop.xlane.xlu1 %1852 }
 0x3ed   : > { %5017 = vrcp.f32 %v1853_v3 }
 0x3ee   : > { %v2339_v55 = vpop.permute.xlu0 %2338 }
 0x3ef   : > { %2363 = vmatpush.bf16.msra.mxu0 %v2339_v55 }
 0x3f1   : > { %2078 = vadd.xlane.f32.xlu2 %v2077_v2 }
 0x3f3   : > { %v1850_v31 = vpop.xlane.xlu2 %1849  ;;  %v5018_v54 = vpop.eup %5017 }
 0x3f4   : > { %5019 = vrcp.f32 %v1850_v31  ;;  %v1877_v47 = vmul.f32 %v5018_v54, %v5818_v61  ;;  %v1856_v15 = vpop.xlane.xlu1 %1855 }
 0x3f5   : > { %5021 = vpow2.f32 %v2282_v23 }
 0x3f6   : > { %v2337_v6 = vpop.permute.xlu0 %2336  ;;  %5023 = vpow2.f32 %v2064_v46 }
 0x3f7   : > { %2364 = vmatpush.bf16.msra.mxu0 %v2337_v6 }
 0x3f9   : > { %2081 = vadd.xlane.f32.xlu2 %v2080_v49 }
 0x3fa   : > { %v5020_v30 = vpop.eup %5019 }
 0x3fb   : > { %v1876_v48 = vmul.f32 %v5020_v30, %v5827_v17  ;;  %v5937_v34 = vpop.eup %5021  ;;  %v2286_v17 = vmul.f32 1.442695, %v2272_v58 }
 0x3fc   : > { %v1859_v24 = vpop.xlane.xlu2 %1858  ;;  %v2302_v38 = vsel %vm1571_vm4, %v5937_v34, 0.0  ;;  %v5944_v14 = vpop.eup %5023 }
 0x3fd   : > { %v1883_v63 = vpack.c.bf16 %v1877_v47, %v1876_v48  ;;  %5025 = vrcp.f32 %v1859_v24  ;;  %v2086_v1 = vsel %vm1571_vm4, %v5944_v14, 0.0  ;;  %v5967_v47 = vpop.f32.mrf.mxu2 }
 0x3fe   : > { %5027 = vrcp.f32 %v1856_v15 }
 0x3ff   : > { %4548 = vmatmul.msk.bf16.gmra.mxu0 %vm1571_vm4, %v1883_v63  ;;  %5029 = vpow2.f32 %v2286_v17 }
 0x401   : > { %2303 = vadd.xlane.f32.xlu2 %v2302_v38 }
 0x403   : > { %v5026_v61 = vpop.eup %5025 }
 0x404   : > { %v5028_v51 = vpop.eup %5027  ;;  %v1879_v8 = vmul.f32 %v5026_v61, %v5842_v50  ;;  %v1862_v16 = vpop.xlane.xlu2 %1861 }
 0x405   : > { %v1878_v37 = vmul.f32 %v5028_v51, %v5829_v11  ;;  %v5950_v57 = vpop.eup %5029 }
 0x406   : > { %v2308_v5 = vsel %vm1571_vm4, %v5950_v57, 0.0 }
 0x407   : > { %v1884_v27 = vpack.c.bf16 %v1879_v8, %v1878_v37 }
 0x409   : > { %2087 = vadd.xlane.f32.xlu2 %v2086_v1  ;;  %v5972_v1 = vpop.f32.mrf.mxu2 }
 0x40c   : > { %v1865_v59 = vpop.xlane.xlu1 %1864 }
 0x40d   : > { %5031 = vrcp.f32 %v1865_v59 }
 0x40e   : > { %5033 = vrcp.f32 %v1862_v16 }
 0x40f   : > { %4549 = vmatmul.msk.bf16.gmra.mxu0 %vm1571_vm4, %v1884_v27  ;;  %5035 = vrcp.f32 %v2073_v9 }
 0x410   : > { %5037 = vrcp.f32 %v5904_v19 }
 0x411   : > { %2309 = vadd.xlane.f32.xlu2 %v2308_v5 }
 0x413   : > { %v5032_v39 = vpop.eup %5031 }
 0x414   : > { %v5034_v42 = vpop.eup %5033  ;;  %v1881_v33 = vmul.f32 %v5032_v39, %v5855_v7  ;;  %v2295_v22 = vpop.xlane.xlu1 %2294 }
 0x415   : > { %v1880_v50 = vmul.f32 %v5034_v42, %v5848_v12  ;;  %5039 = vrcp.f32 %v2295_v22  ;;  %v5036_v55 = vpop.eup %5035 }
 0x416   : > { %v5038_v62 = vpop.eup %5037  ;;  %v2101_v2 = vmul.f32 %v5036_v55, %v5794_v53 }
 0x417   : > { %v1885_v11 = vpack.c.bf16 %v1881_v33, %v1880_v50  ;;  %v2100_v7 = vmul.f32 %v5038_v62, %v5787_v36 }
 0x419   : > { %v2108_v9 = vpack.c.bf16 %v2101_v2, %v2100_v7 }
 0x41b   : > { %v5040_v3 = vpop.eup %5039 }
 0x41c   : > { %v2323_v12 = vmul.f32 %v5040_v3, %v5862_v20 }
 0x41f   : > { %4550 = vmatmul.msk.bf16.gmra.mxu0 %vm1571_vm4, %v1885_v11 }
 0x421   : > { %v2076_v54 = vpop.xlane.xlu0 %2075 }
 0x423   : > { %v2292_v10 = vpop.xlane.xlu2 %2291 }
 0x424   : > { %5041 = vrcp.f32 %v2292_v10 }
 0x429   : > { %v2298_v49 = vpop.xlane.xlu0 %2297 }
 0x42a   : > { %v5042_v23 = vpop.eup %5041  ;;  %5043 = vrcp.f32 %v2298_v49 }
 0x42b   : > { %v2322_v31 = vmul.f32 %v5042_v23, %v5877_v25  ;;  %v2113_v6 = vpop.permute.xlu2 %2112 }
 0x42c   : > { %v2335_v60 = vpop.permute.xlu1 %2334  ;;  %2143 = vmatpush.bf16.msra.mxu2 %v2113_v6 }
 0x42d   : > { %v2330_v19 = vpack.c.bf16 %v2323_v12, %v2322_v31  ;;  %2365 = vmatpush.bf16.msra.mxu0 %v2335_v60 }
 0x42f   : > { %4555 = vmatmul.msk.bf16.vlgmr.msra.gmra.mxu2 %vm1571_vm4, %v2108_v9 }
 0x430   : > { %4563 = vmatmul.msk.bf16.vlgmr.msra.gmra.mxu0 %vm1571_vm4, %v2330_v19  ;;  %v5044_v36 = vpop.eup %5043 }
 0x431   : > { %v2324_v20 = vmul.f32 %v5044_v36, %v5881_v43  ;;  %v2085_v46 = vpop.xlane.xlu0 %2084 }
 0x439   : > { %v2307_v38 = vpop.xlane.xlu0 %2306 }
 0x441   : > { %v2091_v59 = vpop.xlane.xlu0 %2090 }
 0x449   : > { %v2313_v62 = vpop.xlane.xlu0 %2312 }
 0x457   : > { %v2301_v53 = vpop.xlane.xlu1 %2300 }
 0x458   : > { %5045 = vrcp.f32 %v2301_v53 }
 0x459   : > { %5047 = vrcp.f32 %v2076_v54 }
 0x45e   : > { %v5046_v30 = vpop.eup %5045 }
 0x45f   : > { %v2325_v25 = vmul.f32 %v5046_v30, %v5913_v13  ;;  %v5048_v58 = vpop.eup %5047 }
 0x460   : > { %v2102_v51 = vmul.f32 %v5048_v58, %v5871_v45  ;;  %v5976_v45 = vpop.f32.mrf.mxu2 }
 0x461   : > { %v2331_v48 = vpack.c.bf16 %v2325_v25, %v2324_v20 }
 0x463   : > { %4564 = vmatmul.msk.bf16.gmra.mxu0 %vm1571_vm4, %v2331_v48 }
 0x464   : > { %v2079_v24 = vpop.xlane.xlu2 %2078  ;;  %v1923_v63 = vpop.f32.mrf.mxu0 }
 0x465   : > { %5049 = vrcp.f32 %v2079_v24 }
 0x468   : > { %v5984_v3 = vpop.f32.mrf.mxu2 }
 0x46b   : > { %v5050_v15 = vpop.eup %5049 }
 0x46c   : > { %v2082_v17 = vpop.xlane.xlu2 %2081  ;;  %v1925_v61 = vpop.f32.mrf.mxu0  ;;  %v2103_v43 = vmul.f32 %v5050_v15, %v5924_v26 }
 0x46d   : > { %v4850_v13 = vpack.i.bf16 %v1925_v61, %v1923_v63  ;;  %5051 = vrcp.f32 %v2082_v17 }
 0x46e   : > { %v2109_v8 = vpack.c.bf16 %v2103_v43, %v2102_v51  ;;  %5053 = vrcp.f32 %v2085_v46 }
 0x46f   : > { %4851 = vrot.lane.b32.xlu2 %v4850_v13, %s5196_s15  ;;  %5055 = vrcp.f32 %v2307_v38 }
 0x470   : > { %4556 = vmatmul.msk.bf16.gmra.mxu2 %vm1571_vm4, %v2109_v8  ;;  %v5987_v12 = vpop.f32.mrf.mxu2 }
 0x473   : > { %v5052_v27 = vpop.eup %5051 }
 0x474   : > { %v2304_v37 = vpop.xlane.xlu2 %2303  ;;  %v5054_v16 = vpop.eup %5053  ;;  %v2104_v5 = vmul.f32 %v5052_v27, %v5929_v21  ;;  %v4762_v27 = vld [vmem:[%s5238_s29 + $0x8] sm:$0xff] }
 0x475   : > { %5057 = vrcp.f32 %v2304_v37  ;;  %v5056_v26 = vpop.eup %5055  ;;  %v2105_v50 = vmul.f32 %v5054_v16, %v5888_v29  ;;  %2546 = vmatpush.bf16.msrb.mxu1 %v4762_v27 }
 0x476   : > { %v2327_v22 = vmul.f32 %v5056_v26, %v5895_v41 }
 0x477   : > { %v2110_v10 = vpack.c.bf16 %v2105_v50, %v2104_v5 }
 0x478   : > { %v5994_v53 = vpop.f32.mrf.mxu2 }
 0x47b   : > { %v5058_v39 = vpop.eup %5057 }
 0x47c   : > { %v2088_v42 = vpop.xlane.xlu2 %2087  ;;  %v1928_v33 = vpop.f32.mrf.mxu0  ;;  %v2326_v11 = vmul.f32 %v5058_v39, %v5937_v34 }
 0x47d   : > { %5059 = vrcp.f32 %v2088_v42  ;;  %v4761_v42 = vld [vmem:[%s5238_s29] sm:$0xff] }
 0x47e   : > { %v2332_v55 = vpack.c.bf16 %v2327_v22, %v2326_v11  ;;  %5061 = vrcp.f32 %v2091_v59  ;;  %2547 = vmatpush.bf16.msrb.mxu1 %v4761_v42  ;;  %v4770_v11 = vld [vmem:[%s5298_s12 + $0x8] sm:$0xff]  ;;  %v6014_v22 = vld [vmem:[%s5288_s27] sm:$0xff] }
 0x47f   : > { %5063 = vrcp.f32 %v2313_v62  ;;  %3226 = vmatpush.bf16.msrb.mxu0 %v4770_v11 }
 0x480   : > { %4557 = vmatmul.msk.bf16.gmra.mxu2 %vm1571_vm4, %v2110_v10  ;;  %4565 = vmatmul.msk.bf16.gmra.mxu0 %vm1571_vm4, %v2332_v55  ;;  %v5996_v36 = vpop.f32.mrf.mxu2  ;;  %v3179_v55 = vld [vmem:[%s5293_s4] sm:$0xff] }
 0x483   : > { %v5060_v29 = vpop.eup %5059 }
 0x484   : > { %v2310_v21 = vpop.xlane.xlu2 %2309  ;;  %v1930_v2 = vpop.f32.mrf.mxu0  ;;  %v2106_v41 = vmul.f32 %v5060_v29, %v5944_v14 }
 0x485   : > { %5065 = vrcp.f32 %v2310_v21  ;;  %v5062_v23 = vpop.eup %5061  ;;  %v4865_v24 = vpack.i.bf16 %v1930_v2, %v1928_v33  ;;  %v4769_v21 = vld [vmem:[%s5298_s12] sm:$0xff]  ;;  %v3180_v2 = vadd.f32 %v3179_v55, %v6014_v22 }
 0x486   : > { %v5064_v34 = vpop.eup %5063  ;;  %v2107_v6 = vmul.f32 %v5062_v23, %v5902_v35  ;;  %3227 = vmatpush.bf16.msrb.mxu0 %v4769_v21 }
 0x487   : > { %v2329_v9 = vmul.f32 %v5064_v34, %v5909_v18  ;;  %v3201_v29 = vpack.c.bf16 %v3180_v2, %v3180_v2 }
 0x488   : > { %v2111_v19 = vpack.c.bf16 %v2107_v6, %v2106_v41  ;;  %v5998_v20 = vpop.f32.mrf.mxu2 }
 0x48b   : > { %v5066_v7 = vpop.eup %5065 }
 0x48c   : > { %v1933_v31 = vpop.f32.mrf.mxu0  ;;  %v2328_v60 = vmul.f32 %v5066_v7, %v5950_v57 }
 0x48e   : > { %v2333_v54 = vpack.c.bf16 %v2329_v9, %v2328_v60 }
 0x490   : > { %4558 = vmatmul.msk.bf16.gmra.mxu2 %vm1571_vm4, %v2111_v19  ;;  %4566 = vmatmul.msk.bf16.gmra.mxu0 %vm1571_vm4, %v2333_v54 }
 0x494   : > { %v1935_v49 = vpop.f32.mrf.mxu0 }
 0x495   : > { %v4880_v13 = vpack.i.bf16 %v1935_v49, %v1933_v31 }
 0x49c   : > { %v1938_v14 = vpop.f32.mrf.mxu0 }
 0x4a0   : > { %4619 = vmatmul.msk.bf16.vlgmr.msrb.gmra.mxu0 %vm1355_vm2, %v3201_v29 }
 0x4a4   : > { %v1940_v30 = vpop.f32.mrf.mxu0 }
 0x4a5   : > { %v4895_v16 = vpack.i.bf16 %v1940_v30, %v1938_v14 }
 0x4ad   : > { %v2367_v35 = vpop.f32.mrf.mxu0 }
 0x4b2   : > { %v2145_v25 = vpop.f32.mrf.mxu2 }
 0x4b5   : > { %v2369_v57 = vpop.f32.mrf.mxu0 }
 0x4b6   : > { %v4860_v46 = vpack.i.bf16 %v2369_v57, %v2367_v35 }
 0x4b8   : > { %4861 = vrot.lane.b32.xlu1 %v4860_v46, %s6695_s16  ;;  %v4772_v46 = vld [vmem:[%s5298_s12 + $0x18] sm:$0xff] }
 0x4b9   : > { %3254 = vmatpush.bf16.msra.mxu0 %v4772_v46  ;;  %v6066_v46 = vld [vmem:[%s5243_s3] ss:$0 sm:$0xff] }
 0x4ba   : > { %v2147_v18 = vpop.f32.mrf.mxu2 }
 0x4bb   : > { %v4855_v48 = vpack.i.bf16 %v2147_v18, %v2145_v25  ;;  %v4771_v18 = vld [vmem:[%s5298_s12 + $0x10] sm:$0xff] }
 0x4bd   : > { %4856 = vrot.lane.b32.xlu0 %v4855_v48, %s6696_s18  ;;  %3255 = vmatpush.bf16.msra.mxu0 %v4771_v18 }
 0x4c0   : > { %4628 = vmatmul.msk.bf16.vlgmr.msra.gmra.mxu0 %vm1355_vm2, %v3201_v29 }
 0x4c5   : > { %4866 = vrot.lane.b32.xlu0 %v4865_v24, %s5196_s15 }
 0x4c9   : > { %v4852_v23 = vpop.permute.xlu2 %4851 }
 0x4ca   : > { %v4854_v34 = vunpack.i.h.bf16 %v4852_v23  ;;  %v4853_v41 = vunpack.i.l.bf16 %v4852_v23 }
 0x4cc   : > { %v2484_v9 = vsel %vm1509_vm3, %v5972_v1, %v4854_v34  ;;  %v2483_v19 = vsel %vm1509_vm3, %v5967_v47, %v4853_v41 }
 0x4e0   : > { %v2372_v63 = vpop.f32.mrf.mxu0 }
 0x4e8   : > { %v2374_v58 = vpop.f32.mrf.mxu0 }
 0x4e9   : > { %v4875_v15 = vpack.i.bf16 %v2374_v58, %v2372_v63 }
 0x4eb   : > { %4876 = vrot.lane.b32.xlu0 %v4875_v15, %s6695_s16 }
 0x4f3   : > { %v2150_v38 = vpop.f32.mrf.mxu2 }
 0x4fb   : > { %v2152_v17 = vpop.f32.mrf.mxu2 }
 0x4fc   : > { %v4870_v61 = vpack.i.bf16 %v2152_v17, %v2150_v38 }
 0x4fd   : > { %v2377_v51 = vpop.f32.mrf.mxu0 }
 0x4fe   : > { %4871 = vrot.lane.b32.xlu2 %v4870_v61, %s6696_s18 }
 0x503   : > { %v2155_v43 = vpop.f32.mrf.mxu2 }
 0x505   : > { %v2379_v8 = vpop.f32.mrf.mxu0 }
 0x506   : > { %v4890_v37 = vpack.i.bf16 %v2379_v8, %v2377_v51  ;;  %4881 = vrot.lane.b32.xlu2 %v4880_v13, %s5196_s15 }
 0x508   : > { %4891 = vrot.lane.b32.xlu0 %v4890_v37, %s6695_s16 }
 0x50b   : > { %v2157_v59 = vpop.f32.mrf.mxu2 }
 0x50c   : > { %v4885_v26 = vpack.i.bf16 %v2157_v59, %v2155_v43 }
 0x50d   : > { %v2382_v5 = vpop.f32.mrf.mxu0 }
 0x50e   : > { %4896 = vrot.lane.b32.xlu2 %v4895_v16, %s5196_s15  ;;  %4886 = vrot.lane.b32.xlu1 %v4885_v26, %s6696_s18 }
 0x513   : > { %v2160_v39 = vpop.f32.mrf.mxu2 }
 0x515   : > { %v2384_v33 = vpop.f32.mrf.mxu0 }
 0x516   : > { %v4905_v50 = vpack.i.bf16 %v2384_v33, %v2382_v5 }
 0x518   : > { %4906 = vrot.lane.b32.xlu0 %v4905_v50, %s6695_s16 }
 0x51b   : > { %v2162_v10 = vpop.f32.mrf.mxu2 }
 0x51c   : > { %v4900_v62 = vpack.i.bf16 %v2162_v10, %v2160_v39 }
 0x51e   : > { %4901 = vrot.lane.b32.xlu1 %v4900_v62, %s6696_s18 }
 0x52a   : > { %v4862_v7 = vpop.permute.xlu1 %4861 }
 0x52b   : > { %v4864_v54 = vunpack.i.h.bf16 %v4862_v7  ;;  %v4863_v49 = vunpack.i.l.bf16 %v4862_v7 }
 0x52f   : > { %v4857_v31 = vpop.permute.xlu0 %4856 }
 0x530   : > { %v4859_v6 = vunpack.i.h.bf16 %v4857_v31  ;;  %v4858_v60 = vunpack.i.l.bf16 %v4857_v31 }
 0x532   : > { %v2493_v14 = vsel %vm2491_vm5, %v2484_v9, %v4859_v6  ;;  %v2492_v30 = vsel %vm2491_vm5, %v2483_v19, %v4858_v60 }
 0x533   : > { %v2502_v35 = vsel %vm2500_vm6, %v2493_v14, %v4864_v54  ;;  %v2501_v25 = vsel %vm2500_vm6, %v2492_v30, %v4863_v49 }
 0x534   : > { %v2509_v57 = vpack.c.bf16 %v2502_v35, %v2501_v25  ;;  %v3229_v35 = vpop.f32.mrf.mxu0  ;;  %v4774_v25 = vld [vmem:[%s5298_s12 + $0x28] sm:$0xff] }
 0x535   : > { %3286 = vmatpush.bf16.msrb.mxu0 %v4774_v25 }
 0x536   : > { %4575 = vmatmul.msk.bf16.vlgmr.msrb.gmra.mxu1 %vm1355_vm2, %v2509_v57 }
 0x537   : > { %v4867_v47 = vpop.permute.xlu0 %4866 }
 0x538   : > { %v4869_v48 = vunpack.i.h.bf16 %v4867_v47  ;;  %v4868_v24 = vunpack.i.l.bf16 %v4867_v47 }
 0x53a   : > { %v2486_v38 = vsel %vm1509_vm3, %v5984_v3, %v4869_v48  ;;  %v2485_v17 = vsel %vm1509_vm3, %v5976_v45, %v4868_v24 }
 0x53c   : > { %v3231_v57 = vpop.f32.mrf.mxu0 }
 0x558   : > { %v4872_v1 = vpop.permute.xlu2 %4871 }
 0x559   : > { %v4874_v63 = vunpack.i.h.bf16 %v4872_v1  ;;  %v4873_v58 = vunpack.i.l.bf16 %v4872_v1 }
 0x55b   : > { %v2494_v43 = vsel %vm2491_vm5, %v2485_v17, %v4873_v58  ;;  %v2495_v13 = vsel %vm2491_vm5, %v2486_v38, %v4874_v63  ;;  %v4916_v17 = vld [vmem:[%s5303_s20 + $0x1] ss:$0 sm:$0xff] }
 0x55d   : > { %v4877_v15 = vpop.permute.xlu0 %4876 }
 0x55e   : > { %v4879_v61 = vunpack.i.h.bf16 %v4877_v15  ;;  %v4878_v51 = vunpack.i.l.bf16 %v4877_v15 }
 0x560   : > { %v2503_v8 = vsel %vm2500_vm6, %v2494_v43, %v4878_v51  ;;  %v2504_v37 = vsel %vm2500_vm6, %v2495_v13, %v4879_v61  ;;  %v4882_v27 = vpop.permute.xlu2 %4881  ;;  %v3257_v61 = vpop.f32.mrf.mxu0  ;;  %v4915_v43 = vld [vmem:[%s5303_s20] ss:$0 sm:$0xff] }
 0x561   : > { %v2510_v59 = vpack.c.bf16 %v2504_v37, %v2503_v8  ;;  %v4884_v16 = vunpack.i.h.bf16 %v4882_v27  ;;  %v4883_v26 = vunpack.i.l.bf16 %v4882_v27  ;;  %v3258_v13 = vadd.f32 %v4916_v17, %v3257_v61 }
 0x562   : > { %v3230_v37 = vadd.f32 %v4915_v43, %v3229_v35 }
 0x563   : > { %4576 = vmatmul.msk.bf16.gmra.mxu1 %vm1355_vm2, %v2510_v59  ;;  %v2488_v42 = vsel %vm1509_vm3, %v5994_v53, %v4884_v16  ;;  %v2487_v33 = vsel %vm1509_vm3, %v5987_v12, %v4883_v26  ;;  %v6088_v8 = vpack.c.bf16 %v3258_v13, %v3258_v13 }
 0x564   : > { %v6092_v27 = vpack.c.bf16 %v3230_v37, %v3230_v37 }
 0x568   : > { %v4897_v29 = vpop.permute.xlu2 %4896  ;;  %v3259_v59 = vpop.f32.mrf.mxu0 }
 0x569   : > { %v4899_v23 = vunpack.i.h.bf16 %v4897_v29  ;;  %v4898_v34 = vunpack.i.l.bf16 %v4897_v29 }
 0x56b   : > { %v2490_v31 = vsel %vm1509_vm3, %v5998_v20, %v4899_v23  ;;  %v2489_v6 = vsel %vm1509_vm3, %v5996_v36, %v4898_v34  ;;  %v4773_v20 = vld [vmem:[%s5298_s12 + $0x20] sm:$0xff]  ;;  %v3261_v36 = vpack.c.bf16 %v6014_v22, %v6014_v22 }
 0x56c   : > { %3287 = vmatpush.bf16.msrb.mxu0 %v4773_v20 }
 0x56f   : > { %4637 = vmatmul.msk.bf16.vlgmr.msrb.gmra.mxu0 %vm1355_vm2, %v3261_v36 }
 0x57a   : > { %v4892_v3 = vpop.permute.xlu0 %4891 }
 0x57b   : > { %v4894_v50 = vunpack.i.h.bf16 %v4892_v3  ;;  %v4893_v11 = vunpack.i.l.bf16 %v4892_v3 }
 0x580   : > { %v4887_v5 = vpop.permute.xlu1 %4886 }
 0x581   : > { %v4889_v39 = vunpack.i.h.bf16 %v4887_v5  ;;  %v4888_v45 = vunpack.i.l.bf16 %v4887_v5 }
 0x583   : > { %v2497_v10 = vsel %vm2491_vm5, %v2488_v42, %v4889_v39  ;;  %v2496_v55 = vsel %vm2491_vm5, %v2487_v33, %v4888_v45 }
 0x584   : > { %v2505_v62 = vsel %vm2500_vm6, %v2496_v55, %v4893_v11  ;;  %v2506_v21 = vsel %vm2500_vm6, %v2497_v10, %v4894_v50 }
 0x585   : > { %v2511_v2 = vpack.c.bf16 %v2506_v21, %v2505_v62 }
 0x587   : > { %4577 = vmatmul.msk.bf16.gmra.mxu1 %vm1355_vm2, %v2511_v2 }
 0x58a   : > { %v4907_v53 = vpop.permute.xlu0 %4906 }
 0x58b   : > { %v4909_v60 = vunpack.i.h.bf16 %v4907_v53  ;;  %v4908_v9 = vunpack.i.l.bf16 %v4907_v53 }
 0x590   : > { %v4902_v41 = vpop.permute.xlu1 %4901 }
 0x591   : > { %v4904_v12 = vunpack.i.h.bf16 %v4902_v41  ;;  %v4903_v7 = vunpack.i.l.bf16 %v4902_v41 }
 0x593   : > { %v2499_v19 = vsel %vm2491_vm5, %v2490_v31, %v4904_v12  ;;  %v2498_v54 = vsel %vm2491_vm5, %v2489_v6, %v4903_v7  ;;  %v5199_v12 = vmov 32.0  }
 0x594   : > { %v2507_v49 = vsel %vm2500_vm6, %v2498_v54, %v4908_v9  ;;  %v2508_v14 = vsel %vm2500_vm6, %v2499_v19, %v4909_v60  ;;  %5067 = vrcp.f32 %v5199_v12 }
 0x595   : > { %v2512_v30 = vpack.c.bf16 %v2508_v14, %v2507_v49 }
 0x597   : > { %4578 = vmatmul.msk.bf16.gmra.mxu1 %vm1355_vm2, %v2512_v30 }
 0x59a   : > { %v5068_v60 = vpop.eup %5067 }
 0x59b   : > { %v2604_v54 = vmul.f32 32.0, %v5068_v60  ;;  %vm2608_vm7 = vweird.f32 %v5068_v60 }
 0x59d   : > { %v2605_v35 = vsub.f32 1.0, %v2604_v54 }
 0x59f   : > { %v2606_v36 = vmul.f32 %v5068_v60, %v2605_v35 }
 0x5b3   : > { %v2549_v18 = vpop.f32.mrf.mxu1 }
 0x5b4   : > { %v2550_v47 = vadd.f32 %v6066_v46, %v2549_v18  ;;  %v2607_v18 = vadd.f32 %v5068_v60, %v2606_v36 }
 0x5b6   : > { %v6070_v1 = vadd.f32 %v2550_v47, %v5432_v28 }
 0x5b8   : > { %v2579_v48 = vsel %vm1355_vm2, %v6070_v1, 0.0  ;;  %v2618_v22 = vmul.f32 %v6070_v1, %v6070_v1 }
 0x5b9   : > { %2580 = vadd.xlane.f32.xlu2 %v2579_v48 }
 0x5ba   : > { %v2626_v24 = vsel %vm1355_vm2, %v2618_v22, 0.0 }
 0x5bb   : > { %v2551_v63 = vpop.f32.mrf.mxu1  ;;  %2627 = vadd.xlane.f32.xlu0 %v2626_v24 }
 0x5bc   : > { %v2552_v58 = vadd.f32 %v6066_v46, %v2551_v63  ;;  %v4764_v63 = vld [vmem:[%s5258_s19 + $0x8] sm:$0xff] }
 0x5bd   : > { %2851 = vmatpush.bf16.msrb.mxu2 %v4764_v63 }
 0x5be   : > { %v6079_v15 = vadd.f32 %v2552_v58, %v5436_v32  ;;  %v3299_v32 = vsel %vm1509_vm3, %v6088_v8, 0 }
 0x5bf   : > { %3308 = vmatpush.bf16.xpose.msra.mxu0 %v3299_v32 }
 0x5c0   : > { %v2582_v28 = vsel %vm1355_vm2, %v6079_v15, 0.0  ;;  %v2619_v38 = vmul.f32 %v6079_v15, %v6079_v15 }
 0x5c1   : > { %2583 = vadd.xlane.f32.xlu1 %v2582_v28 }
 0x5c2   : > { %v2629_v51 = vsel %vm1355_vm2, %v2619_v38, 0.0  ;;  %v4763_v38 = vld [vmem:[%s5258_s19] sm:$0xff] }
 0x5c3   : > { %2630 = vadd.xlane.f32.xlu2 %v2629_v51  ;;  %2852 = vmatpush.bf16.msrb.mxu2 %v4763_v38 }
 0x5c6   : > { %4638 = vmatmul.msk.bf16.vlgmr.msra.gmra.mxu0 %vm1509_vm3, %v6092_v27 }
 0x5e0   : > { %v2554_v16 = vpop.f32.mrf.mxu1 }
 0x5e1   : > { %v2555_v26 = vadd.f32 %v6066_v46, %v2554_v16 }
 0x5e3   : > { %v6098_v3 = vadd.f32 %v2555_v26, %v5445_v40 }
 0x5e5   : > { %v2585_v5 = vsel %vm1355_vm2, %v6098_v3, 0.0  ;;  %v2620_v39 = vmul.f32 %v6098_v3, %v6098_v3 }
 0x5e6   : > { %2586 = vadd.xlane.f32.xlu1 %v2585_v5 }
 0x5e7   : > { %v2632_v45 = vsel %vm1355_vm2, %v2620_v39, 0.0 }
 0x5e8   : > { %v2556_v42 = vpop.f32.mrf.mxu1  ;;  %2633 = vadd.xlane.f32.xlu2 %v2632_v45 }
 0x5e9   : > { %v2557_v33 = vadd.f32 %v6066_v46, %v2556_v42 }
 0x5eb   : > { %v6107_v50 = vadd.f32 %v2557_v33, %v5449_v44 }
 0x5ec   : > { %v6164_v16 = vpop.f32.mrf.mxu0 }
 0x5ed   : > { %v2588_v40 = vsel %vm1355_vm2, %v6107_v50, 0.0  ;;  %v2621_v11 = vmul.f32 %v6107_v50, %v6107_v50 }
 0x5ee   : > { %2589 = vadd.xlane.f32.xlu0 %v2588_v40 }
 0x5ef   : > { %v2635_v10 = vsel %vm1355_vm2, %v2621_v11, 0.0 }
 0x5f0   : > { %2636 = vadd.xlane.f32.xlu1 %v2635_v10 }
 0x5f4   : > { %v3291_v33 = vpop.f32.mrf.mxu0 }
 0x604   : > { %v2559_v55 = vpop.f32.mrf.mxu1 }
 0x605   : > { %v2560_v62 = vadd.f32 %v6066_v46, %v2559_v55 }
 0x607   : > { %v6116_v21 = vadd.f32 %v2560_v62, %v5458_v52 }
 0x609   : > { %v2591_v44 = vsel %vm1355_vm2, %v6116_v21, 0.0  ;;  %v2622_v2 = vmul.f32 %v6116_v21, %v6116_v21 }
 0x60a   : > { %2592 = vadd.xlane.f32.xlu0 %v2591_v44 }
 0x60b   : > { %v2638_v29 = vsel %vm1355_vm2, %v2622_v2, 0.0 }
 0x60c   : > { %v2561_v23 = vpop.f32.mrf.mxu1  ;;  %2639 = vadd.xlane.f32.xlu1 %v2638_v29  ;;  %v6174_v29 = vld [vmem:[%s5248_s8] ss:$0 sm:$0xff] }
 0x60d   : > { %v2562_v34 = vadd.f32 %v6066_v46, %v2561_v23 }
 0x60f   : > { %v6125_v53 = vadd.f32 %v2562_v34, %v5462_v56 }
 0x611   : > { %v2594_v52 = vsel %vm1355_vm2, %v6125_v53, 0.0  ;;  %v2623_v41 = vmul.f32 %v6125_v53, %v6125_v53 }
 0x612   : > { %2595 = vadd.xlane.f32.xlu2 %v2594_v52 }
 0x613   : > { %v2641_v7 = vsel %vm1355_vm2, %v2623_v41, 0.0  ;;  %v6178_v41 = vld [vmem:[%s6722_s22] ss:$0 sm:$0xff]  ;;  %s6727_s22 = sld [smem:[#allocation12_spill]] }
 0x614   : > { %v2564_v31 = vpop.f32.mrf.mxu1  ;;  %2642 = vadd.xlane.f32.xlu0 %v2641_v7 }
 0x615   : > { %v2565_v6 = vadd.f32 %v6066_v46, %v2564_v31 }
 0x617   : > { %v6134_v9 = vadd.f32 %v2565_v6, %v5471_v0 }
 0x619   : > { %v2597_v56 = vsel %vm1355_vm2, %v6134_v9, 0.0  ;;  %v2624_v19 = vmul.f32 %v6134_v9, %v6134_v9 }
 0x61a   : > { %2598 = vadd.xlane.f32.xlu2 %v2597_v56 }
 0x61b   : > { %v2644_v49 = vsel %vm1355_vm2, %v2624_v19, 0.0 }
 0x61c   : > { %v2566_v14 = vpop.f32.mrf.mxu1  ;;  %2645 = vadd.xlane.f32.xlu0 %v2644_v49 }
 0x61d   : > { %v2567_v30 = vadd.f32 %v6066_v46, %v2566_v14  ;;  %v6150_v46 = vsel %vm2608_vm7, %v5068_v60, %v2607_v18 }
 0x61f   : > { %v6143_v25 = vadd.f32 %v2567_v30, %v5475_v4 }
 0x621   : > { %v2600_v0 = vsel %vm1355_vm2, %v6143_v25, 0.0  ;;  %v2625_v20 = vmul.f32 %v6143_v25, %v6143_v25 }
 0x622   : > { %2601 = vadd.xlane.f32.xlu1 %v2600_v0 }
 0x623   : > { %v2647_v57 = vsel %vm1355_vm2, %v2625_v20, 0.0 }
 0x624   : > { %2648 = vadd.xlane.f32.xlu2 %v2647_v57 }
 0x62c   : > { %v2581_v47 = vpop.xlane.xlu2 %2580 }
 0x62d   : > { %v2610_v4 = vmul.f32 %v6150_v46, %v2581_v47 }
 0x62e   : > { %v2628_v48 = vpop.xlane.xlu0 %2627 }
 0x62f   : > { %v2658_v22 = vmul.f32 %v2610_v4, %v2610_v4  ;;  %v2650_v24 = vmul.f32 %v2628_v48, %v6150_v46  ;;  %v2674_v44 = vsub.f32 %v6070_v1, %v2610_v4 }
 0x630   : > { %3349 = vrot.lane.b32.xlu0 %v6092_v27, %s5193_s7 }
 0x631   : > { %v2666_v58 = vsub.f32 %v2650_v24, %v2658_v22 }
 0x633   : > { %v2682_v28 = vadd.f32 1e-05, %v2666_v58 }
 0x634   : > { %v2584_v17 = vpop.xlane.xlu1 %2583 }
 0x635   : > { %5069 = vrsqrt.f32 %v2682_v28  ;;  %v2611_v61 = vmul.f32 %v6150_v46, %v2584_v17  ;;  %vm2696_vm9 = vweird.f32 %v2682_v28 }
 0x636   : > { %v2631_v51 = vpop.xlane.xlu2 %2630 }
 0x637   : > { %v2659_v43 = vmul.f32 %v2611_v61, %v2611_v61  ;;  %v2651_v13 = vmul.f32 %v2631_v51, %v6150_v46  ;;  %v2675_v52 = vsub.f32 %v6079_v15, %v2611_v61 }
 0x638   : > { %3465 = vrot.lane.b32.xlu0 %v6092_v27, %s5195_s11 }
 0x639   : > { %v2667_v37 = vsub.f32 %v2651_v13, %v2659_v43 }
 0x63b   : > { %v5070_v32 = vpop.eup %5069  ;;  %v2683_v59 = vadd.f32 1e-05, %v2667_v37  ;;  %3352 = vrot.lane.b32.xlu1 %v6088_v8, %s5193_s7 }
 0x63c   : > { %v2691_v26 = vmul.f32 %v5070_v32, %v2682_v28  ;;  %3467 = vrot.lane.b32.xlu2 %v6088_v8, %s5195_s11  ;;  %vm2697_vm8 = vweird.f32 %v5070_v32 }
 0x63d   : > { %5071 = vrsqrt.f32 %v2683_v59  ;;  %vm2698_vm10 = vmor %vm2696_vm9, %vm2697_vm8  ;;  %vm2706_vm12 = vweird.f32 %v2683_v59 }
 0x63e   : > { %v2692_v5 = vmul.f32 %v5070_v32, %v2691_v26 }
 0x640   : > { %v2693_v39 = vmul.f32 0.5, %v2692_v5 }
 0x642   : > { %v2694_v45 = vsub.f32 1.5, %v2693_v39 }
 0x643   : > { %v5072_v42 = vpop.eup %5071  ;;  %3410 = vrot.lane.b32.xlu1 %v6088_v8, %s6697_s10  ;;  %v3310_v23 = vpop.f32.mrf.mxu0 }
 0x644   : > { %v2695_v40 = vmul.f32 %v5070_v32, %v2694_v45  ;;  %v2701_v11 = vmul.f32 %v5072_v42, %v2683_v59  ;;  %3408 = vrot.lane.b32.xlu2 %v6092_v27, %s6697_s10  ;;  %vm2707_vm11 = vweird.f32 %v5072_v42  ;;  %v6195_v4 = vmul.f32 0.35355338, %v3310_v23 }
 0x645   : > { %vm2708_vm13 = vmor %vm2706_vm12, %vm2707_vm11 }
 0x646   : > { %v2702_v10 = vmul.f32 %v5072_v42, %v2701_v11  ;;  %v2699_v55 = vsel %vm2698_vm10, %v5070_v32, %v2695_v40  ;;  %v3315_v63 = vsel %vm1509_vm3, %v6195_v4, -inf }
 0x647   : > { %v2770_v8 = vmul.f32 %v2699_v55, %v2674_v44 }
 0x648   : > { %v2703_v62 = vmul.f32 0.5, %v2702_v10 }
 0x649   : > { %v2781_v12 = vmul.f32 %v6174_v29, %v2770_v8 }
 0x64a   : > { %v2704_v2 = vsub.f32 1.5, %v2703_v62 }
 0x64b   : > { %v6183_v1 = vadd.f32 %v6178_v41, %v2781_v12  ;;  %v3312_v60 = vpop.f32.mrf.mxu0 }
 0x64c   : > { %v2705_v34 = vmul.f32 %v5072_v42, %v2704_v2 }
 0x64e   : > { %v2709_v27 = vsel %vm2708_vm13, %v5072_v42, %v2705_v34 }
 0x64f   : > { %v2771_v7 = vmul.f32 %v2709_v27, %v2675_v52 }
 0x651   : > { %v2782_v31 = vmul.f32 %v6174_v29, %v2771_v7 }
 0x653   : > { %v6186_v6 = vadd.f32 %v6178_v41, %v2782_v31 }
 0x655   : > { %v2814_v56 = vpack.c.bf16 %v6186_v6, %v6183_v1 }
 0x657   : > { %4587 = vmatmul.msk.bf16.vlgmr.msrb.gmra.mxu2 %vm1355_vm2, %v2814_v56 }
 0x659   : > { %v2587_v15 = vpop.xlane.xlu1 %2586 }
 0x65a   : > { %v2612_v19 = vmul.f32 %v6150_v46, %v2587_v15 }
 0x65b   : > { %v2634_v54 = vpop.xlane.xlu2 %2633 }
 0x65c   : > { %v2660_v49 = vmul.f32 %v2612_v19, %v2612_v19  ;;  %v2652_v14 = vmul.f32 %v2634_v54, %v6150_v46  ;;  %v2676_v32 = vsub.f32 %v6098_v3, %v2612_v19 }
 0x65e   : > { %v2668_v30 = vsub.f32 %v2652_v14, %v2660_v49 }
 0x660   : > { %v2684_v35 = vadd.f32 1e-05, %v2668_v30 }
 0x661   : > { %v2590_v0 = vpop.xlane.xlu0 %2589 }
 0x662   : > { %5073 = vrsqrt.f32 %v2684_v35  ;;  %v2613_v20 = vmul.f32 %v6150_v46, %v2590_v0  ;;  %vm2716_vm15 = vweird.f32 %v2684_v35 }
 0x663   : > { %v2637_v36 = vpop.xlane.xlu1 %2636 }
 0x664   : > { %v2661_v57 = vmul.f32 %v2613_v20, %v2613_v20  ;;  %v2653_v18 = vmul.f32 %v2637_v36, %v6150_v46  ;;  %v2677_v39 = vsub.f32 %v6107_v50, %v2613_v20 }
 0x666   : > { %v2669_v47 = vsub.f32 %v2653_v18, %v2661_v57 }
 0x668   : > { %v5074_v48 = vpop.eup %5073  ;;  %v2685_v22 = vadd.f32 1e-05, %v2669_v47 }
 0x669   : > { %v2711_v24 = vmul.f32 %v5074_v48, %v2684_v35  ;;  %vm2717_vm14 = vweird.f32 %v5074_v48 }
 0x66a   : > { %5075 = vrsqrt.f32 %v2685_v22  ;;  %vm2718_vm0 = vmor %vm2716_vm15, %vm2717_vm14  ;;  %vm2726_vm7 = vweird.f32 %v2685_v22 }
 0x66b   : > { %v2712_v58 = vmul.f32 %v5074_v48, %v2711_v24 }
 0x66d   : > { %v2713_v28 = vmul.f32 0.5, %v2712_v58  ;;  %3316 = vmax.xlane.f32.xlu1 %v3315_v63 }
 0x66f   : > { %v2714_v38 = vsub.f32 1.5, %v2713_v28 }
 0x670   : > { %v5076_v17 = vpop.eup %5075 }
 0x671   : > { %v2715_v61 = vmul.f32 %v5074_v48, %v2714_v38  ;;  %v2721_v51 = vmul.f32 %v5076_v17, %v2685_v22  ;;  %vm2727_vm1 = vweird.f32 %v5076_v17 }
 0x672   : > { %vm2728_vm8 = vmor %vm2726_vm7, %vm2727_vm1 }
 0x673   : > { %v2722_v43 = vmul.f32 %v5076_v17, %v2721_v51  ;;  %v2719_v13 = vsel %vm2718_vm0, %v5074_v48, %v2715_v61 }
 0x674   : > { %v2772_v26 = vmul.f32 %v2719_v13, %v2676_v32 }
 0x675   : > { %v2723_v37 = vmul.f32 0.5, %v2722_v43 }
 0x676   : > { %v2783_v33 = vmul.f32 %v6174_v29, %v2772_v26 }
 0x677   : > { %v2724_v59 = vsub.f32 1.5, %v2723_v37 }
 0x678   : > { %v6206_v44 = vadd.f32 %v6178_v41, %v2783_v33 }
 0x679   : > { %v2725_v5 = vmul.f32 %v5076_v17, %v2724_v59 }
 0x67b   : > { %v2729_v45 = vsel %vm2728_vm8, %v5076_v17, %v2725_v5 }
 0x67c   : > { %v2773_v42 = vmul.f32 %v2729_v45, %v2677_v39 }
 0x67d   : > { %v2593_v40 = vpop.xlane.xlu0 %2592 }
 0x67e   : > { %v2614_v11 = vmul.f32 %v6150_v46, %v2593_v40  ;;  %v2784_v10 = vmul.f32 %v6174_v29, %v2773_v42 }
 0x67f   : > { %v2640_v55 = vpop.xlane.xlu1 %2639 }
 0x680   : > { %v2662_v62 = vmul.f32 %v2614_v11, %v2614_v11  ;;  %v2654_v3 = vmul.f32 %v2640_v55, %v6150_v46  ;;  %v6209_v2 = vadd.f32 %v6178_v41, %v2784_v10  ;;  %v2678_v51 = vsub.f32 %v6116_v21, %v2614_v11 }
 0x682   : > { %v2670_v50 = vsub.f32 %v2654_v3, %v2662_v62  ;;  %v2815_v8 = vpack.c.bf16 %v6209_v2, %v6206_v44 }
 0x684   : > { %v2686_v23 = vadd.f32 1e-05, %v2670_v50  ;;  %4588 = vmatmul.msk.bf16.gmra.mxu2 %vm1355_vm2, %v2815_v8 }
 0x685   : > { %v2596_v34 = vpop.xlane.xlu2 %2595 }
 0x686   : > { %5077 = vrsqrt.f32 %v2686_v23  ;;  %v2615_v52 = vmul.f32 %v6150_v46, %v2596_v34  ;;  %vm2736_vm10 = vweird.f32 %v2686_v23 }
 0x687   : > { %v2643_v27 = vpop.xlane.xlu0 %2642 }
 0x688   : > { %v2663_v12 = vmul.f32 %v2615_v52, %v2615_v52  ;;  %v2655_v7 = vmul.f32 %v2643_v27, %v6150_v46  ;;  %v2679_v39 = vsub.f32 %v6125_v53, %v2615_v52 }
 0x68a   : > { %v2671_v31 = vsub.f32 %v2655_v7, %v2663_v12 }
 0x68c   : > { %v5078_v60 = vpop.eup %5077  ;;  %v2687_v56 = vadd.f32 1e-05, %v2671_v31 }
 0x68d   : > { %v2731_v15 = vmul.f32 %v5078_v60, %v2686_v23  ;;  %v2599_v19 = vpop.xlane.xlu2 %2598  ;;  %vm2737_vm9 = vweird.f32 %v5078_v60 }
 0x68e   : > { %5079 = vrsqrt.f32 %v2687_v56  ;;  %v2616_v54 = vmul.f32 %v6150_v46, %v2599_v19  ;;  %vm2738_vm11 = vmor %vm2736_vm10, %vm2737_vm9  ;;  %vm2746_vm13 = vweird.f32 %v2687_v56  ;;  %vm3331_vm10 = vcmask 1043456  }
 0x68f   : > { %v2732_v49 = vmul.f32 %v5078_v60, %v2731_v15  ;;  %v2646_v14 = vpop.xlane.xlu0 %2645 }
 0x690   : > { %v2664_v30 = vmul.f32 %v2616_v54, %v2616_v54  ;;  %v2656_v35 = vmul.f32 %v2646_v14, %v6150_v46  ;;  %v2680_v27 = vsub.f32 %v6134_v9, %v2616_v54 }
 0x691   : > { %v2733_v0 = vmul.f32 0.5, %v2732_v49 }
 0x692   : > { %v2672_v20 = vsub.f32 %v2656_v35, %v2664_v30 }
 0x693   : > { %v2734_v36 = vsub.f32 1.5, %v2733_v0 }
 0x694   : > { %v5080_v57 = vpop.eup %5079  ;;  %v2688_v18 = vadd.f32 1e-05, %v2672_v20 }
 0x695   : > { %v2735_v47 = vmul.f32 %v5078_v60, %v2734_v36  ;;  %v2741_v48 = vmul.f32 %v5080_v57, %v2687_v56  ;;  %v2602_v22 = vpop.xlane.xlu1 %2601  ;;  %vm2747_vm12 = vweird.f32 %v5080_v57 }
 0x696   : > { %5081 = vrsqrt.f32 %v2688_v18  ;;  %v2617_v24 = vmul.f32 %v6150_v46, %v2602_v22  ;;  %vm2748_vm14 = vmor %vm2746_vm13, %vm2747_vm12  ;;  %vm2756_vm0 = vweird.f32 %v2688_v18 }
 0x697   : > { %v2742_v63 = vmul.f32 %v5080_v57, %v2741_v48  ;;  %v2649_v58 = vpop.xlane.xlu2 %2648  ;;  %v2739_v17 = vsel %vm2738_vm11, %v5078_v60, %v2735_v47  ;;  %v4766_v47 = vld [vmem:[%s6723_s23 + $0x8] sm:$0xff] }
 0x698   : > { %v2665_v28 = vmul.f32 %v2617_v24, %v2617_v24  ;;  %v2657_v38 = vmul.f32 %v2649_v58, %v6150_v46  ;;  %v2774_v32 = vmul.f32 %v2739_v17, %v2678_v51  ;;  %v2681_v56 = vsub.f32 %v6143_v25, %v2617_v24 }
 0x699   : > { %v2743_v61 = vmul.f32 0.5, %v2742_v63  ;;  %v4920_v63 = vld [vmem:[%s6724_s26] ss:$0 sm:$0xff]  ;;  %s6728_s26 = sld [smem:[#allocation6_spill]] }
 0x69a   : > { %v2673_v43 = vsub.f32 %v2657_v38, %v2665_v28  ;;  %v2785_v40 = vmul.f32 %v6174_v29, %v2774_v32 }
 0x69b   : > { %v2744_v13 = vsub.f32 1.5, %v2743_v61 }
 0x69c   : > { %v5082_v37 = vpop.eup %5081  ;;  %v2689_v59 = vadd.f32 1e-05, %v2673_v43  ;;  %v6225_v62 = vadd.f32 %v6178_v41, %v2785_v40 }
 0x69d   : > { %v2745_v26 = vmul.f32 %v5080_v57, %v2744_v13  ;;  %v2751_v5 = vmul.f32 %v5082_v37, %v2688_v18  ;;  %vm2757_vm15 = vweird.f32 %v5082_v37  ;;  %v4767_v18 = vld [vmem:[%s6723_s23 + $0x10] sm:$0xff] }
 0x69e   : > { %5083 = vrsqrt.f32 %v2689_v59  ;;  %vm2758_vm1 = vmor %vm2756_vm0, %vm2757_vm15  ;;  %vm2766_vm8 = vweird.f32 %v2689_v59 }
 0x69f   : > { %v2749_v45 = vsel %vm2748_vm14, %v5080_v57, %v2745_v26  ;;  %v2752_v42 = vmul.f32 %v5082_v37, %v2751_v5  ;;  %v3468_v15 = vpop.permute.xlu2 %3467  ;;  %v4768_v57 = vld [vmem:[%s6723_s23 + $0x18] sm:$0xff] }
 0x6a0   : > { %v2775_v33 = vmul.f32 %v2749_v45, %v2679_v39  ;;  %v3473_v14 = vsel %vm1509_vm3, %v3468_v15, 0  ;;  %2929 = vmatpush.bf16.msrb.mxu3 %v4768_v57  ;;  %v4919_v39 = vld [vmem:[%s5303_s20 + $0x2] ss:$0 sm:$0xff] }
 0x6a1   : > { %v2753_v10 = vmul.f32 0.5, %v2752_v42  ;;  %v3290_v42 = vadd.f32 %v4919_v39, %v6164_v16 }
 0x6a2   : > { %v2786_v21 = vmul.f32 %v6174_v29, %v2775_v33  ;;  %v3350_v48 = vpop.permute.xlu0 %3349 }
 0x6a3   : > { %v2754_v11 = vsub.f32 1.5, %v2753_v10  ;;  %v6261_v40 = vpack.c.bf16 %v3290_v42, %v3290_v42 }
 0x6a4   : > { %v5084_v55 = vpop.eup %5083  ;;  %v6228_v3 = vadd.f32 %v6178_v41, %v2786_v21  ;;  %2930 = vmatpush.bf16.msrb.mxu3 %v4767_v18 }
 0x6a5   : > { %v2755_v50 = vmul.f32 %v5082_v37, %v2754_v11  ;;  %v2761_v53 = vmul.f32 %v5084_v55, %v2689_v59  ;;  %vm2767_vm7 = vweird.f32 %v5084_v55 }
 0x6a6   : > { %v2816_v8 = vpack.c.bf16 %v6228_v3, %v6225_v62  ;;  %vm2768_vm9 = vmor %vm2766_vm8, %vm2767_vm7 }
 0x6a7   : > { %v2762_v23 = vmul.f32 %v5084_v55, %v2761_v53  ;;  %v2759_v34 = vsel %vm2758_vm1, %v5082_v37, %v2755_v50  ;;  %v3333_v50 = vsel %vm3331_vm10, %v6261_v40, 0 }
 0x6a8   : > { %4589 = vmatmul.msk.bf16.gmra.mxu2 %vm1355_vm2, %v2816_v8  ;;  %v2776_v7 = vmul.f32 %v2759_v34, %v2680_v27  ;;  %2931 = vmatpush.bf16.msrb.mxu3 %v4766_v47 }
 0x6a9   : > { %v2763_v52 = vmul.f32 0.5, %v2762_v23  ;;  %3342 = vmatpush.bf16.msra.mxu1 %v3333_v50 }
 0x6aa   : > { %v2787_v9 = vmul.f32 %v6174_v29, %v2776_v7  ;;  %v3466_v22 = vpop.permute.xlu0 %3465 }
 0x6ab   : > { %v2764_v12 = vsub.f32 1.5, %v2763_v52 }
 0x6ac   : > { %v6240_v25 = vadd.f32 %v6178_v41, %v2787_v9 }
 0x6ad   : > { %v2765_v31 = vmul.f32 %v5084_v55, %v2764_v12  ;;  %v3353_v60 = vpop.permute.xlu1 %3352 }
 0x6ae   : > { %v3358_v19 = vsel %vm1509_vm3, %v3353_v60, 0 }
 0x6af   : > { %v2769_v49 = vsel %vm2768_vm9, %v5084_v55, %v2765_v31  ;;  %3367 = vmatpush.bf16.xpose.msra.mxu2 %v3358_v19 }
 0x6b0   : > { %v2777_v30 = vmul.f32 %v2769_v49, %v2681_v56 }
 0x6b2   : > { %v2788_v54 = vmul.f32 %v6174_v29, %v2777_v30  ;;  %v3409_v29 = vpop.permute.xlu2 %3408 }
 0x6b4   : > { %v6243_v35 = vadd.f32 %v6178_v41, %v2788_v54  ;;  %v4765_v41 = vld [vmem:[%s6723_s23] sm:$0xff] }
 0x6b5   : > { %v3411_v0 = vpop.permute.xlu1 %3410  ;;  %2932 = vmatpush.bf16.msrb.mxu3 %v4765_v41 }
 0x6b6   : > { %v3416_v20 = vsel %vm1509_vm3, %v3411_v0, 0  ;;  %v2817_v36 = vpack.c.bf16 %v6243_v35, %v6240_v25 }
 0x6b7   : > { %3482 = vmatpush.bf16.xpose.msrb.mxu2 %v3473_v14  ;;  %3425 = vmatpush.bf16.xpose.msrb.mxu0 %v3416_v20 }
 0x6b8   : > { %4590 = vmatmul.msk.bf16.gmra.mxu2 %vm1355_vm2, %v2817_v36 }
 0x6be   : > { %4642 = vmatmul.msk.bf16.vlgmr.msrb.gmra.mxu0 %vm1509_vm3, %v3409_v29 }
 0x6c8   : > { %4640 = vmatmul.msk.bf16.vlgmr.msra.gmra.mxu2 %vm1509_vm3, %v3350_v48 }
 0x6d8   : > { %4644 = vmatmul.msk.bf16.vlgmr.msrb.gmra.mxu2 %vm1509_vm3, %v3466_v22 }
 0x6da   : > { %v2854_v24 = vpop.f32.mrf.mxu2 }
 0x6db   : > { %v2855_v58 = vadd.f32 %v4920_v63, %v2854_v24 }
 0x6dd   : > { %v2874_v17 = vmax.f32 %v2855_v58, 0.0 }
 0x6e0   : > { %v3317_v19 = vpop.xlane.xlu1 %3316 }
 0x6e1   : > { %v3318_v30 = vsub.f32 %v6195_v4, %v3317_v19 }
 0x6e2   : > { %v2856_v28 = vpop.f32.mrf.mxu2 }
 0x6e3   : > { %v2857_v38 = vadd.f32 %v4920_v63, %v2856_v28  ;;  %v3319_v54 = vmul.f32 1.442695, %v3318_v30 }
 0x6e5   : > { %v2875_v61 = vmax.f32 %v2857_v38, 0.0  ;;  %5085 = vpow2.f32 %v3319_v54 }
 0x6e7   : > { %v2882_v51 = vpack.c.bf16 %v2875_v61, %v2874_v17 }
 0x6e9   : > { %4607 = vmatmul.msk.bf16.vlgmr.msrb.gmra.mxu3 %vm1571_vm4, %v2882_v51 }
 0x6eb   : > { %v5086_v57 = vpop.eup %5085 }
 0x6ec   : > { %v3321_v18 = vsel %vm1509_vm3, %v5086_v57, 0.0 }
 0x707   : > { %v2859_v43 = vpop.f32.mrf.mxu2 }
 0x708   : > { %v2860_v13 = vadd.f32 %v4920_v63, %v2859_v43 }
 0x70a   : > { %v2876_v59 = vmax.f32 %v2860_v13, 0.0 }
 0x70f   : > { %v2861_v37 = vpop.f32.mrf.mxu2 }
 0x710   : > { %v2862_v32 = vadd.f32 %v4920_v63, %v2861_v37 }
 0x712   : > { %v2877_v26 = vmax.f32 %v2862_v32, 0.0 }
 0x714   : > { %v2883_v5 = vpack.c.bf16 %v2877_v26, %v2876_v59 }
 0x716   : > { %4608 = vmatmul.msk.bf16.gmra.mxu3 %vm1571_vm4, %v2883_v5 }
 0x72b   : > { %v2864_v45 = vpop.f32.mrf.mxu2 }
 0x72c   : > { %v2865_v33 = vadd.f32 %v4920_v63, %v2864_v45 }
 0x72e   : > { %v2878_v11 = vmax.f32 %v2865_v33, 0.0 }
 0x733   : > { %v2866_v10 = vpop.f32.mrf.mxu2 }
 0x734   : > { %v2867_v21 = vadd.f32 %v4920_v63, %v2866_v10 }
 0x736   : > { %v2879_v55 = vmax.f32 %v2867_v21, 0.0  ;;  %v6286_v21 = vld [vmem:[%s6725_s0] ss:$0 sm:$0xff]  ;;  %s6729_s0 = sld [smem:[#allocation7_spill]] }
 0x738   : > { %v2884_v53 = vpack.c.bf16 %v2879_v55, %v2878_v11 }
 0x73a   : > { %4609 = vmatmul.msk.bf16.gmra.mxu3 %vm1571_vm4, %v2884_v53 }
 0x73b   : > { %v2869_v8 = vpop.f32.mrf.mxu2  ;;  %v3427_v23 = vpop.f32.mrf.mxu0 }
 0x73c   : > { %v2870_v34 = vadd.f32 %v4920_v63, %v2869_v8  ;;  %v3431_v49 = vmul.f32 0.35355338, %v3427_v23 }
 0x73e   : > { %v2880_v12 = vmax.f32 %v2870_v34, 0.0  ;;  %v3432_v9 = vsel %vm1509_vm3, %v3431_v49, -inf }
 0x743   : > { %v2871_v52 = vpop.f32.mrf.mxu2  ;;  %v3429_v16 = vpop.f32.mrf.mxu0 }
 0x744   : > { %v2872_v27 = vadd.f32 %v4920_v63, %v2871_v52 }
 0x746   : > { %v2881_v7 = vmax.f32 %v2872_v27, 0.0 }
 0x748   : > { %v2885_v31 = vpack.c.bf16 %v2881_v7, %v2880_v12 }
 0x74a   : > { %4610 = vmatmul.msk.bf16.gmra.mxu3 %vm1571_vm4, %v2885_v31 }
 0x74b   : > { %v3369_v60 = vpop.f32.mrf.mxu2 }
 0x74c   : > { %v3373_v56 = vmul.f32 0.35355338, %v3369_v60 }
 0x74e   : > { %v3374_v15 = vsel %vm1509_vm3, %v3373_v56, -inf }
 0x74f   : > { %3375 = vmax.xlane.f32.xlu0 %v3374_v15 }
 0x753   : > { %v3371_v14 = vpop.f32.mrf.mxu2 }
 0x757   : > { %3433 = vmax.xlane.f32.xlu0 %v3432_v9 }
 0x75b   : > { %v3484_v0 = vpop.f32.mrf.mxu2 }
 0x75c   : > { %v3488_v20 = vmul.f32 0.35355338, %v3484_v0 }
 0x75e   : > { %v3489_v36 = vsel %vm1509_vm3, %v3488_v20, -inf }
 0x75f   : > { %3490 = vmax.xlane.f32.xlu2 %v3489_v36 }
 0x763   : > { %v3486_v29 = vpop.f32.mrf.mxu2 }
 0x767   : > { %3322 = vadd.xlane.f32.xlu2 %v3321_v18 }
 0x76b   : > { %3387 = vrot.lane.b32.xlu0 %v6261_v40, %s5193_s7 }
 0x76c   : > { %v6279_v45 = vpop.f32.mrf.mxu3 }
 0x774   : > { %v2936_v42 = vpop.f32.mrf.mxu3 }
 0x775   : > { %v2937_v55 = vadd.f32 %v6286_v21, %v2936_v42 }
 0x777   : > { %v6290_v50 = vadd.f32 %v2937_v55, %v6186_v6 }
 0x779   : > { %v2967_v8 = vsel %vm1355_vm2, %v6290_v50, 0.0 }
 0x799   : > { %v2939_v33 = vpop.f32.mrf.mxu3 }
 0x79a   : > { %v2940_v53 = vadd.f32 %v6286_v21, %v2939_v33 }
 0x7a1   : > { %v2941_v10 = vpop.f32.mrf.mxu3 }
 0x7a2   : > { %v2942_v34 = vadd.f32 %v6286_v21, %v2941_v10 }
 0x7a4   : > { %v6302_v52 = vadd.f32 %v2942_v34, %v6209_v2 }
 0x7a6   : > { %v2999_v12 = vmul.f32 %v6302_v52, %v6302_v52  ;;  %v2973_v10 = vsel %vm1355_vm2, %v6302_v52, 0.0 }
 0x7bd   : > { %v2944_v11 = vpop.f32.mrf.mxu3 }
 0x7be   : > { %v2945_v27 = vadd.f32 %v6286_v21, %v2944_v11 }
 0x7c0   : > { %v6310_v7 = vadd.f32 %v2945_v27, %v6225_v62 }
 0x7c2   : > { %v3376_v47 = vpop.xlane.xlu0 %3375  ;;  %v3000_v2 = vmul.f32 %v6310_v7, %v6310_v7  ;;  %v2976_v55 = vsel %vm1355_vm2, %v6310_v7, 0.0 }
 0x7c3   : > { %v3377_v4 = vsub.f32 %v3373_v56, %v3376_v47 }
 0x7c4   : > { %v3016_v56 = vsel %vm1355_vm2, %v3000_v2, 0.0 }
 0x7c5   : > { %v3378_v41 = vmul.f32 1.442695, %v3377_v4  ;;  %v6295_v23 = vpop.f32.mrf.mxu3 }
 0x7c7   : > { %5087 = vpow2.f32 %v3378_v41 }
 0x7ca   : > { %v3434_v48 = vpop.xlane.xlu0 %3433 }
 0x7cb   : > { %v3435_v22 = vsub.f32 %v3431_v49, %v3434_v48 }
 0x7cd   : > { %v5088_v24 = vpop.eup %5087  ;;  %v3436_v63 = vmul.f32 1.442695, %v3435_v22  ;;  %v2949_v16 = vpop.f32.mrf.mxu3 }
 0x7ce   : > { %v3380_v58 = vsel %vm1509_vm3, %v5088_v24, 0.0 }
 0x7cf   : > { %5089 = vpow2.f32 %v3436_v63  ;;  %3381 = vadd.xlane.f32.xlu1 %v3380_v58 }
 0x7d2   : > { %v3491_v28 = vpop.xlane.xlu2 %3490 }
 0x7d3   : > { %v3492_v38 = vsub.f32 %v3488_v20, %v3491_v28 }
 0x7d5   : > { %v5090_v17 = vpop.eup %5089  ;;  %v3493_v61 = vmul.f32 1.442695, %v3492_v38  ;;  %v2951_v31 = vpop.f32.mrf.mxu3 }
 0x7d6   : > { %v3438_v51 = vsel %vm1509_vm3, %v5090_v17, 0.0  ;;  %v2952_v60 = vadd.f32 %v6286_v21, %v2951_v31 }
 0x7d7   : > { %5091 = vpow2.f32 %v3493_v61  ;;  %3439 = vadd.xlane.f32.xlu2 %v3438_v51  ;;  %v2935_v61 = vadd.f32 %v6286_v21, %v6279_v45 }
 0x7d8   : > { %v6318_v15 = vadd.f32 %v2952_v60, %v6243_v35 }
 0x7d9   : > { %v6333_v51 = vadd.f32 %v2935_v61, %v6183_v1 }
 0x7da   : > { %v3323_v43 = vpop.xlane.xlu2 %3322  ;;  %v2985_v19 = vsel %vm1355_vm2, %v6318_v15, 0.0 }
 0x7db   : > { %5093 = vrcp.f32 %v3323_v43  ;;  %v2964_v43 = vsel %vm1355_vm2, %v6333_v51, 0.0 }
 0x7dd   : > { %v5092_v13 = vpop.eup %5091  ;;  %v3388_v37 = vpop.permute.xlu0 %3387 }
 0x7de   : > { %v3495_v32 = vsel %vm1509_vm3, %v5092_v13, 0.0  ;;  %v3393_v59 = vsel %vm3331_vm10, %v3388_v37, 0 }
 0x7df   : > { %3496 = vadd.xlane.f32.xlu1 %v3495_v32  ;;  %3402 = vmatpush.bf16.msra.mxu3 %v3393_v59  ;;  %v2947_v59 = vadd.f32 %v6286_v21, %v6295_v23 }
 0x7e1   : > { %v5094_v26 = vpop.eup %5093  ;;  %v6346_v1 = vadd.f32 %v2947_v59, %v6228_v3 }
 0x7e2   : > { %v3325_v5 = vmul.f32 %v5094_v26, %v5086_v57 }
 0x7e3   : > { %v2979_v45 = vsel %vm1355_vm2, %v6346_v1, 0.0 }
 0x7e4   : > { %v3326_v39 = vpack.c.bf16 %v3325_v5, %v3325_v5  ;;  %v2996_v5 = vmul.f32 %v6333_v51, %v6333_v51 }
 0x7e6   : > { %4639 = vmatmul.msk.bf16.vlgmr.msra.gmra.mxu1 %vm1509_vm3, %v3326_v39  ;;  %v2950_v39 = vadd.f32 %v6286_v21, %v2949_v16  ;;  %v3004_v42 = vsel %vm1355_vm2, %v2996_v5, 0.0  ;;  %v3003_v21 = vmul.f32 %v6318_v15, %v6318_v15 }
 0x7e8   : > { %v6355_v33 = vadd.f32 %v2950_v39, %v6240_v25  ;;  %v3025_v11 = vsel %vm1355_vm2, %v3003_v21, 0.0  ;;  %v4776_v25 = vld [vmem:[%s6726_s2 + $0x8] sm:$0xff] }
 0x7e9   : > { %3562 = vmatpush.bf16.msra.mxu0 %v4776_v25 }
 0x7ea   : > { %v2982_v3 = vsel %vm1355_vm2, %v6355_v33, 0.0  ;;  %v3002_v23 = vmul.f32 %v6355_v33, %v6355_v33 }
 0x7ec   : > { %v3022_v34 = vsel %vm1355_vm2, %v3002_v23, 0.0 }
 0x7ef   : > { %3444 = vrot.lane.b32.xlu2 %v6261_v40, %s6697_s10 }
 0x7f8   : > { %3501 = vrot.lane.b32.xlu1 %v6261_v40, %s5195_s11  ;;  %v6298_v40 = vadd.f32 %v2940_v53, %v6206_v44  ;;  %v3013_v44 = vsel %vm1355_vm2, %v2999_v12, 0.0  ;;  %v3001_v53 = vmul.f32 %v6346_v1, %v6346_v1 }
 0x7fa   : > { %v2970_v6 = vsel %vm1355_vm2, %v6298_v40, 0.0  ;;  %v2998_v32 = vmul.f32 %v6298_v40, %v6298_v40 }
 0x7fc   : > { %v3010_v26 = vsel %vm1355_vm2, %v2998_v32, 0.0 }
 0x818   : > { %2968 = vadd.xlane.f32.xlu2 %v2967_v8  ;;  %v3019_v8 = vsel %vm1355_vm2, %v3001_v53, 0.0 }
 0x820   : > { %2971 = vadd.xlane.f32.xlu2 %v2970_v6  ;;  %v4775_v6 = vld [vmem:[%s6726_s2] sm:$0xff] }
 0x821   : > { %3563 = vmatpush.bf16.msra.mxu0 %v4775_v6 }
 0x828   : > { %3014 = vadd.xlane.f32.xlu2 %v3013_v44 }
 0x830   : > { %3017 = vadd.xlane.f32.xlu2 %v3016_v56 }
 0x838   : > { %2986 = vadd.xlane.f32.xlu2 %v2985_v19 }
 0x842   : > { %v3382_v62 = vpop.xlane.xlu1 %3381 }
 0x843   : > { %5095 = vrcp.f32 %v3382_v62 }
 0x849   : > { %v5096_v49 = vpop.eup %5095 }
 0x84a   : > { %v3384_v14 = vmul.f32 %v5096_v49, %v5088_v24  ;;  %v3440_v30 = vpop.xlane.xlu2 %3439 }
 0x84b   : > { %5097 = vrcp.f32 %v3440_v30 }
 0x84c   : > { %v3385_v9 = vpack.c.bf16 %v3384_v14, %v3384_v14 }
 0x84e   : > { %4641 = vmatmul.msk.bf16.vlgmr.msra.gmra.mxu3 %vm1509_vm3, %v3385_v9 }
 0x851   : > { %v5098_v54 = vpop.eup %5097 }
 0x852   : > { %v3442_v0 = vmul.f32 %v5098_v54, %v5090_v17  ;;  %v3445_v20 = vpop.permute.xlu2 %3444  ;;  %v3497_v57 = vpop.xlane.xlu1 %3496 }
 0x853   : > { %v3450_v36 = vsel %vm3331_vm10, %v3445_v20, 0  ;;  %5099 = vrcp.f32 %v3497_v57  ;;  %v4780_v57 = vld [vmem:[%s6727_s22 + $0x18] sm:$0xff] }
 0x854   : > { %v3443_v35 = vpack.c.bf16 %v3442_v0, %v3442_v0  ;;  %3459 = vmatpush.bf16.msrb.mxu1 %v3450_v36  ;;  %3694 = vmatpush.bf16.msra.mxu2 %v4780_v57 }
 0x857   : > { %4643 = vmatmul.msk.bf16.vlgmr.msrb.gmra.mxu1 %vm1509_vm3, %v3443_v35 }
 0x859   : > { %v5100_v18 = vpop.eup %5099 }
 0x85a   : > { %v3499_v47 = vmul.f32 %v5100_v18, %v5092_v13  ;;  %v2997_v13 = vmul.f32 %v6290_v50, %v6290_v50 }
 0x85c   : > { %v3500_v22 = vpack.c.bf16 %v3499_v47, %v3499_v47  ;;  %v3007_v37 = vsel %vm1355_vm2, %v2997_v13, 0.0 }
 0x863   : > { %v3344_v29 = vpop.f32.mrf.mxu1 }
 0x86a   : > { %v3502_v4 = vpop.permute.xlu1 %3501 }
 0x86b   : > { %v3507_v41 = vsel %vm3331_vm10, %v3502_v4, 0  ;;  %v3346_v48 = vpop.f32.mrf.mxu1 }
 0x86c   : > { %3516 = vmatpush.bf16.msrb.mxu3 %v3507_v41 }
 0x86f   : > { %4645 = vmatmul.msk.bf16.vlgmr.msrb.gmra.mxu3 %vm1509_vm3, %v3500_v22  ;;  %v4779_v22 = vld [vmem:[%s6727_s22 + $0x10] sm:$0xff] }
 0x870   : > { %3695 = vmatpush.bf16.msra.mxu2 %v4779_v22 }
 0x88b   : > { %v2969_v19 = vpop.xlane.xlu2 %2968 }
 0x88c   : > { %v6379_v62 = vmul.f32 %v2969_v19, %v6150_v46 }
 0x88e   : > { %v3037_v14 = vmul.f32 %v6379_v62, %v6379_v62 }
 0x893   : > { %v2972_v54 = vpop.xlane.xlu2 %2971 }
 0x894   : > { %v6385_v20 = vmul.f32 %v2972_v54, %v6150_v46 }
 0x896   : > { %v3038_v18 = vmul.f32 %v6385_v20, %v6385_v20 }
 0x8d1   : > { %v3404_v24 = vpop.f32.mrf.mxu3 }
 0x8d2   : > { %3523 = vrot.lane.b32.xlu0 %v3404_v24, %s5196_s15  ;;  %v4781_v24 = vld [vmem:[%s6727_s22 + $0x20] sm:$0xff] }
 0x8d4   : > { %v3461_v63 = vpop.f32.mrf.mxu1 }
 0x8d9   : > { %v3406_v58 = vpop.f32.mrf.mxu3 }
 0x8da   : > { %3527 = vrot.lane.b32.xlu0 %v3461_v63, %s6696_s18  ;;  %v3015_v63 = vpop.xlane.xlu2 %3014 }
 0x8dc   : > { %v3463_v28 = vpop.f32.mrf.mxu1 }
 0x8f2   : > { %v3518_v38 = vpop.f32.mrf.mxu3 }
 0x8f3   : > { %3531 = vrot.lane.b32.xlu1 %v3518_v38, %s6695_s16  ;;  %s6735_s16 = sld [smem:[#allocation11_spill]] }
 0x8fa   : > { %v3520_v17 = vpop.f32.mrf.mxu3 }
 0x904   : > { %2965 = vadd.xlane.f32.xlu0 %v2964_v43 }
 0x90c   : > { %3008 = vadd.xlane.f32.xlu0 %v3007_v37 }
 0x914   : > { %3011 = vadd.xlane.f32.xlu0 %v3010_v26  ;;  %v3018_v26 = vpop.xlane.xlu2 %3017 }
 0x91c   : > { %2980 = vadd.xlane.f32.xlu0 %v2979_v45 }
 0x91d   : > { %3005 = vadd.xlane.f32.xlu1 %v3004_v42  ;;  %v3031_v42 = vmul.f32 %v3015_v63, %v6150_v46 }
 0x924   : > { %2983 = vadd.xlane.f32.xlu0 %v2982_v3 }
 0x925   : > { %2974 = vadd.xlane.f32.xlu1 %v2973_v10 }
 0x92c   : > { %3026 = vadd.xlane.f32.xlu0 %v3025_v11 }
 0x92d   : > { %2977 = vadd.xlane.f32.xlu1 %v2976_v55 }
 0x935   : > { %3020 = vadd.xlane.f32.xlu1 %v3019_v8 }
 0x93d   : > { %3023 = vadd.xlane.f32.xlu1 %v3022_v34 }
 0x944   : > { %v3524_v16 = vpop.permute.xlu0 %3523 }
 0x945   : > { %v3534_v12 = vsel %vm1509_vm3, %v3344_v29, %v3524_v16  ;;  %v4782_v29 = vld [vmem:[%s6727_s22 + $0x28] sm:$0xff] }
 0x946   : > { %3738 = vmatpush.bf16.msra.mxu3 %v4782_v29 }
 0x94a   : > { %3739 = vmatpush.bf16.msra.mxu3 %v4781_v24 }
 0x94c   : > { %v3528_v27 = vpop.permute.xlu0 %3527 }
 0x94d   : > { %v3535_v44 = vsel %vm2491_vm5, %v3534_v12, %v3528_v27 }
 0x965   : > { %v3532_v2 = vpop.permute.xlu1 %3531 }
 0x966   : > { %v3536_v31 = vsel %vm2500_vm6, %v3535_v44, %v3532_v2  ;;  %v3053_v44 = vsub.f32 %v6290_v50, %v6379_v62  ;;  %v3032_v2 = vmul.f32 %v3018_v26, %v6150_v46 }
 0x967   : > { %v3537_v60 = vpack.c.bf16 %v3536_v31, %v3536_v31  ;;  %v2987_v31 = vpop.xlane.xlu2 %2986 }
 0x968   : > { %v6432_v54 = vmul.f32 %v2987_v31, %v6150_v46 }
 0x969   : > { %4654 = vmatmul.msk.bf16.vlgmr.msra.gmra.mxu0 %vm1355_vm2, %v3537_v60 }
 0x977   : > { %v2966_v56 = vpop.xlane.xlu0 %2965 }
 0x978   : > { %v6393_v4 = vmul.f32 %v2966_v56, %v6150_v46 }
 0x97a   : > { %v3036_v28 = vmul.f32 %v6393_v4, %v6393_v4 }
 0x97f   : > { %v3009_v49 = vpop.xlane.xlu0 %3008 }
 0x980   : > { %v3029_v30 = vmul.f32 %v3009_v49, %v6150_v46  ;;  %v6429_v49 = vld [vmem:[%s6728_s26] ss:$0 sm:$0xff]  ;;  %s6732_s26 = sld [smem:[#allocation9_spill]] }
 0x982   : > { %v3045_v9 = vsub.f32 %v3029_v30, %v3037_v14 }
 0x984   : > { %v3061_v0 = vadd.f32 1e-05, %v3045_v9 }
 0x986   : > { %5101 = vrsqrt.f32 %v3061_v0  ;;  %vm3084_vm12 = vweird.f32 %v3061_v0 }
 0x987   : > { %v3012_v36 = vpop.xlane.xlu0 %3011 }
 0x988   : > { %v3030_v35 = vmul.f32 %v3012_v36, %v6150_v46  ;;  %v3052_v36 = vsub.f32 %v6333_v51, %v6393_v4  ;;  %v3043_v4 = vmul.f32 %v6432_v54, %v6432_v54 }
 0x98a   : > { %v3046_v41 = vsub.f32 %v3030_v35, %v3038_v18 }
 0x98c   : > { %v5102_v47 = vpop.eup %5101  ;;  %v6399_v38 = vadd.f32 1e-05, %v3046_v41 }
 0x98d   : > { %v3079_v48 = vmul.f32 %v5102_v47, %v3061_v0  ;;  %vm3085_vm11 = vweird.f32 %v5102_v47 }
 0x98e   : > { %5103 = vrsqrt.f32 %v6399_v38  ;;  %vm3086_vm13 = vmor %vm3084_vm12, %vm3085_vm11  ;;  %vm3094_vm8 = vweird.f32 %v6399_v38 }
 0x98f   : > { %v2981_v17 = vpop.xlane.xlu0 %2980  ;;  %v3080_v43 = vmul.f32 %v5102_v47, %v3079_v48  ;;  %v6443_v48 = vld [vmem:[%s6729_s0] ss:$0 sm:$0xff]  ;;  %s6733_s0 = sld [smem:[#allocation13_spill]] }
 0x990   : > { %v3006_v58 = vpop.xlane.xlu1 %3005  ;;  %v6426_v56 = vmul.f32 %v2981_v17, %v6150_v46 }
 0x991   : > { %v3028_v61 = vmul.f32 %v3006_v58, %v6150_v46  ;;  %v3081_v32 = vmul.f32 0.5, %v3080_v43 }
 0x992   : > { %v3041_v57 = vmul.f32 %v6426_v56, %v6426_v56 }
 0x993   : > { %v3044_v13 = vsub.f32 %v3028_v61, %v3036_v28  ;;  %v3082_v39 = vsub.f32 1.5, %v3081_v32 }
 0x994   : > { %v6406_v45 = vpop.eup %5103 }
 0x995   : > { %v3060_v37 = vadd.f32 1e-05, %v3044_v13  ;;  %v3083_v55 = vmul.f32 %v5102_v47, %v3082_v39  ;;  %v3089_v25 = vmul.f32 %v6406_v45, %v6399_v38  ;;  %vm3095_vm1 = vweird.f32 %v6406_v45 }
 0x996   : > { %vm6459_vm9 = vmor %vm3094_vm8, %vm3095_vm1 }
 0x997   : > { %5105 = vrsqrt.f32 %v3060_v37  ;;  %v2984_v3 = vpop.xlane.xlu0 %2983  ;;  %v3087_v16 = vsel %vm3086_vm13, %v5102_v47, %v3083_v55  ;;  %v3090_v27 = vmul.f32 %v6406_v45, %v3089_v25  ;;  %vm3074_vm15 = vweird.f32 %v3060_v37 }
 0x998   : > { %v2975_v59 = vpop.xlane.xlu1 %2974  ;;  %v3149_v14 = vmul.f32 %v3087_v16, %v3053_v44  ;;  %v6455_v32 = vmul.f32 %v2984_v3, %v6150_v46 }
 0x999   : > { %v6404_v5 = vmul.f32 %v2975_v59, %v6150_v46  ;;  %v3091_v50 = vmul.f32 0.5, %v3090_v27  ;;  %v3054_v27 = vsub.f32 %v6298_v40, %v6385_v20 }
 0x99a   : > { %v3160_v22 = vmul.f32 %v6429_v49, %v3149_v14 }
 0x99b   : > { %v3039_v10 = vmul.f32 %v6404_v5, %v6404_v5  ;;  %v3092_v63 = vsub.f32 1.5, %v3091_v50  ;;  %v3055_v38 = vsub.f32 %v6302_v52, %v6404_v5 }
 0x99c   : > { %v3171_v13 = vadd.f32 %v6443_v48, %v3160_v22 }
 0x99d   : > { %v5106_v21 = vpop.eup %5105  ;;  %v3047_v11 = vsub.f32 %v3031_v42, %v3039_v10  ;;  %v3093_v26 = vmul.f32 %v6406_v45, %v3092_v63 }
 0x99e   : > { %v3069_v53 = vmul.f32 %v5106_v21, %v3060_v37  ;;  %vm3075_vm14 = vweird.f32 %v5106_v21 }
 0x99f   : > { %v6413_v8 = vadd.f32 1e-05, %v3047_v11  ;;  %v3027_v30 = vpop.xlane.xlu0 %3026  ;;  %vm3076_vm0 = vmor %vm3074_vm15, %vm3075_vm14 }
 0x9a0   : > { %v3070_v23 = vmul.f32 %v5106_v21, %v3069_v53  ;;  %v2978_v34 = vpop.xlane.xlu1 %2977  ;;  %v3035_v47 = vmul.f32 %v3027_v30, %v6150_v46  ;;  %v3042_v53 = vmul.f32 %v6455_v32, %v6455_v32 }
 0x9a1   : > { %5107 = vrsqrt.f32 %v6413_v8  ;;  %v6417_v6 = vmul.f32 %v2978_v34, %v6150_v46  ;;  %vm3104_vm10 = vweird.f32 %v6413_v8 }
 0x9a2   : > { %v3071_v12 = vmul.f32 0.5, %v3070_v23  ;;  %v3051_v43 = vsub.f32 %v3035_v47, %v3043_v4 }
 0x9a3   : > { %v3040_v60 = vmul.f32 %v6417_v6, %v6417_v6  ;;  %v3056_v63 = vsub.f32 %v6310_v7, %v6417_v6 }
 0x9a4   : > { %v3072_v19 = vsub.f32 1.5, %v3071_v12  ;;  %v6464_v55 = vadd.f32 1e-05, %v3051_v43 }
 0x9a5   : > { %v3048_v9 = vsub.f32 %v3032_v2, %v3040_v60 }
 0x9a6   : > { %v3073_v62 = vmul.f32 %v5106_v21, %v3072_v19 }
 0x9a7   : > { %v5108_v0 = vpop.eup %5107  ;;  %v6436_v35 = vadd.f32 1e-05, %v3048_v9 }
 0x9a8   : > { %v3077_v29 = vsel %vm3076_vm0, %v5106_v21, %v3073_v62  ;;  %v3099_v18 = vmul.f32 %v5108_v0, %v6413_v8  ;;  %v3021_v41 = vpop.xlane.xlu1 %3020  ;;  %vm3105_vm7 = vweird.f32 %v5108_v0  ;;  %v3097_v8 = vsel %vm6459_vm9, %v6406_v45, %v3093_v26 }
 0x9a9   : > { %v3148_v24 = vmul.f32 %v3077_v29, %v3052_v36  ;;  %5109 = vrsqrt.f32 %v6436_v35  ;;  %v3033_v51 = vmul.f32 %v3021_v41, %v6150_v46  ;;  %vm3106_vm11 = vmor %vm3104_vm10, %vm3105_vm7  ;;  %v3150_v5 = vmul.f32 %v3097_v8, %v3054_v27  ;;  %v5143_v8 = vld [vmem:[%s5288_s27] sm:$0xff] }
 0x9aa   : > { %v3100_v58 = vmul.f32 %v5108_v0, %v3099_v18  ;;  %vm3114_vm0 = vweird.f32 %v6436_v35 }
 0x9ab   : > { %v3159_v28 = vmul.f32 %v6429_v49, %v3148_v24  ;;  %v3049_v17 = vsub.f32 %v3033_v51, %v3041_v57  ;;  %v3161_v45 = vmul.f32 %v6429_v49, %v3150_v5  ;;  %v3057_v24 = vsub.f32 %v6346_v1, %v6426_v56 }
 0x9ac   : > { %v3101_v61 = vmul.f32 0.5, %v3100_v58 }
 0x9ad   : > { %v3170_v37 = vadd.f32 %v6443_v48, %v3159_v28  ;;  %v3065_v59 = vadd.f32 1e-05, %v3049_v17  ;;  %v3172_v36 = vadd.f32 %v6443_v48, %v3161_v45 }
 0x9ae   : > { %v3102_v39 = vsub.f32 1.5, %v3101_v61 }
 0x9af   : > { %v5110_v42 = vpop.eup %5109  ;;  %5111 = vrsqrt.f32 %v3065_v59  ;;  %v3657_v10 = vpack.c.bf16 %v3171_v13, %v3170_v37  ;;  %vm3124_vm13 = vweird.f32 %v3065_v59 }
 0x9b0   : > { %v3103_v11 = vmul.f32 %v5108_v0, %v3102_v39  ;;  %v3109_v3 = vmul.f32 %v5110_v42, %v6436_v35  ;;  %v3024_v25 = vpop.xlane.xlu1 %3023  ;;  %5113 = vrsqrt.f32 %v6464_v55  ;;  %vm3115_vm14 = vweird.f32 %v5110_v42 }
 0x9b1   : > { %v3034_v23 = vmul.f32 %v3024_v25, %v6150_v46  ;;  %4672 = vmatmul.msk.bf16.vlgmr.msra.gmra.mxu2 %vm1355_vm2, %v3657_v10  ;;  %4684 = vmatmul.msk.bf16.vlgmr.msra.gmra.mxu3 %vm1355_vm2, %v3657_v10  ;;  %vm3116_vm1 = vmor %vm3114_vm0, %vm3115_vm14  ;;  %v3058_v39 = vsub.f32 %v6355_v33, %v6455_v32  ;;  %v3059_v10 = vsub.f32 %v6318_v15, %v6432_v54 }
 0x9b2   : > { %v3107_v34 = vsel %vm3106_vm11, %v5108_v0, %v3103_v11  ;;  %v3110_v16 = vmul.f32 %v5110_v42, %v3109_v3  ;;  %vm3144_vm11 = vweird.f32 %v6464_v55 }
 0x9b3   : > { %v3151_v12 = vmul.f32 %v3107_v34, %v3055_v38  ;;  %v3050_v44 = vsub.f32 %v3034_v23, %v3042_v53  ;;  %v4924_v53 = vld [vmem:[%s6732_s26] ss:$0 sm:$0xff]  ;;  %s6734_s26 = sld [smem:[#allocation10_spill]] }
 0x9b4   : > { %v3111_v31 = vmul.f32 0.5, %v3110_v16 }
 0x9b5   : > { %v5112_v52 = vpop.eup %5111  ;;  %v3066_v2 = vadd.f32 1e-05, %v3050_v44  ;;  %v3162_v19 = vmul.f32 %v6429_v49, %v3151_v12 }
 0x9b6   : > { %v3119_v60 = vmul.f32 %v5112_v52, %v3065_v59  ;;  %v5114_v30 = vpop.eup %5113  ;;  %v3112_v9 = vsub.f32 1.5, %v3111_v31  ;;  %vm3125_vm12 = vweird.f32 %v5112_v52 }
 0x9b7   : > { %5115 = vrsqrt.f32 %v3066_v2  ;;  %v3173_v40 = vadd.f32 %v6443_v48, %v3162_v19  ;;  %v3139_v0 = vmul.f32 %v5114_v30, %v6464_v55  ;;  %vm3126_vm15 = vmor %vm3124_vm13, %vm3125_vm12  ;;  %vm3145_vm8 = vweird.f32 %v5114_v30  ;;  %v4777_v19 = vld [vmem:[%s6727_s22] sm:$0xff] }
 0x9b8   : > { %v3120_v14 = vmul.f32 %v5112_v52, %v3119_v60  ;;  %v3113_v57 = vmul.f32 %v5110_v42, %v3112_v9  ;;  %vm3134_vm9 = vweird.f32 %v3066_v2  ;;  %vm3146_vm12 = vmor %vm3144_vm11, %vm3145_vm8  ;;  %v4778_v60 = vld [vmem:[%s6727_s22 + $0x8] sm:$0xff]  ;;  %vm4383_vm11 = vcmask 162816  }
 0x9b9   : > { %v3658_v47 = vpack.c.bf16 %v3173_v40, %v3172_v36  ;;  %v3140_v51 = vmul.f32 %v5114_v30, %v3139_v0  ;;  %3650 = vmatpush.bf16.msra.mxu1 %v4778_v60 }
 0x9ba   : > { %v3121_v50 = vmul.f32 0.5, %v3120_v14  ;;  %v3117_v4 = vsel %vm3116_vm1, %v5110_v42, %v3113_v57 }
 0x9bb   : > { %v3152_v17 = vmul.f32 %v3117_v4, %v3056_v63  ;;  %v3141_v61 = vmul.f32 0.5, %v3140_v51 }
 0x9bc   : > { %v3122_v20 = vsub.f32 1.5, %v3121_v50 }
 0x9bd   : > { %v5116_v62 = vpop.eup %5115  ;;  %v3163_v13 = vmul.f32 %v6429_v49, %v3152_v17  ;;  %v3142_v1 = vsub.f32 1.5, %v3141_v61  ;;  %3651 = vmatpush.bf16.msra.mxu1 %v4777_v19 }
 0x9be   : > { %v3123_v29 = vmul.f32 %v5112_v52, %v3122_v20  ;;  %v3129_v18 = vmul.f32 %v5116_v62, %v3066_v2  ;;  %vm3135_vm7 = vweird.f32 %v5116_v62 }
 0x9bf   : > { %v3174_v59 = vadd.f32 %v6443_v48, %v3163_v13  ;;  %v3143_v26 = vmul.f32 %v5114_v30, %v3142_v1  ;;  %vm3136_vm10 = vmor %vm3134_vm9, %vm3135_vm7 }
 0x9c0   : > { %v3127_v41 = vsel %vm3126_vm15, %v5112_v52, %v3123_v29  ;;  %v3130_v22 = vmul.f32 %v5116_v62, %v3129_v18 }
 0x9c1   : > { %4673 = vmatmul.msk.bf16.gmra.mxu2 %vm1355_vm2, %v3658_v47  ;;  %4685 = vmatmul.msk.bf16.gmra.mxu3 %vm1355_vm2, %v3658_v47  ;;  %v3153_v58 = vmul.f32 %v3127_v41, %v3057_v24  ;;  %v3147_v42 = vsel %vm3146_vm12, %v5114_v30, %v3143_v26  ;;  %v4925_v47 = vld [vmem:[%s6733_s0 + $0x1] ss:$0 sm:$0xff]  ;;  %v4926_v41 = vld [vmem:[%s6733_s0 + $0x2] ss:$0 sm:$0xff] }
 0x9c2   : > { %v3131_v28 = vmul.f32 0.5, %v3130_v22  ;;  %v3155_v11 = vmul.f32 %v3147_v42, %v3059_v10 }
 0x9c3   : > { %v3164_v35 = vmul.f32 %v6429_v49, %v3153_v58 }
 0x9c4   : > { %v3132_v43 = vsub.f32 1.5, %v3131_v28  ;;  %v3166_v55 = vmul.f32 %v6429_v49, %v3155_v11 }
 0x9c5   : > { %v3175_v56 = vadd.f32 %v6443_v48, %v3164_v35 }
 0x9c6   : > { %v3133_v37 = vmul.f32 %v5116_v62, %v3132_v43  ;;  %v3177_v33 = vadd.f32 %v6443_v48, %v3166_v55 }
 0x9c7   : > { %v3659_v7 = vpack.c.bf16 %v3175_v56, %v3174_v59 }
 0x9c8   : > { %v3137_v6 = vsel %vm3136_vm10, %v5116_v62, %v3133_v37 }
 0x9c9   : > { %v3154_v21 = vmul.f32 %v3137_v6, %v3058_v39 }
 0x9cb   : > { %v3165_v3 = vmul.f32 %v6429_v49, %v3154_v21 }
 0x9cd   : > { %v3176_v25 = vadd.f32 %v6443_v48, %v3165_v3 }
 0x9cf   : > { %v3660_v32 = vpack.c.bf16 %v3177_v33, %v3176_v25 }
 0x9d1   : > { %4674 = vmatmul.msk.bf16.gmra.mxu2 %vm1355_vm2, %v3659_v7  ;;  %4686 = vmatmul.msk.bf16.gmra.mxu3 %vm1355_vm2, %v3659_v7 }
 0x9e1   : > { %4675 = vmatmul.msk.bf16.gmra.mxu2 %vm1355_vm2, %v3660_v32  ;;  %4687 = vmatmul.msk.bf16.gmra.mxu3 %vm1355_vm2, %v3660_v32 }
 0x9e6   : > { %v3565_v38 = vpop.f32.mrf.mxu0 }
 0x9e7   : > { %v3566_v23 = vadd.f32 %v4924_v53, %v3565_v38  ;;  %v4927_v53 = vld [vmem:[%s6734_s26] ss:$0 sm:$0xff]  ;;  %s6740_s26 = sld [smem:[#allocation20_spill]] }
 0x9e9   : > { %v6511_v15 = vadd.f32 %v5143_v8, %v3566_v23 }
 0x9eb   : > { %v3572_v54 = vsel %vm1355_vm2, %v6511_v15, 0.0  ;;  %v3576_v49 = vmul.f32 %v6511_v15, %v6511_v15 }
 0x9ec   : > { %3573 = vadd.xlane.f32.xlu2 %v3572_v54 }
 0x9ed   : > { %v3577_v48 = vsel %vm1355_vm2, %v3576_v49, 0.0  ;;  %v4928_v49 = vld [vmem:[%s6735_s16] ss:$0 sm:$0xff]  ;;  %s6738_s16 = smov 24  }
 0x9ee   : > { %v3567_v34 = vpop.f32.mrf.mxu0  ;;  %3578 = vadd.xlane.f32.xlu1 %v3577_v48 }
 0xa34   : > { %v3697_v16 = vpop.f32.mrf.mxu2  ;;  %v6518_v27 = vpop.f32.mrf.mxu3 }
 0xa35   : > { %v3698_v42 = vadd.f32 %v4925_v47, %v3697_v16  ;;  %v3742_v38 = vadd.f32 %v4926_v41, %v6518_v27 }
 0xa3c   : > { %v3699_v12 = vpop.f32.mrf.mxu2  ;;  %v3743_v44 = vpop.f32.mrf.mxu3 }
 0xa3d   : > { %v3700_v59 = vadd.f32 %v4925_v47, %v3699_v12  ;;  %v3744_v3 = vadd.f32 %v4926_v41, %v3743_v44  ;;  %v5144_v44 = vld [vmem:[%s5293_s4] sm:$0xff] }
 0xa3f   : > { %v6539_v55 = vpack.c.bf16 %v3700_v59, %v3698_v42 }
 0xa44   : > { %v6520_v52 = vpop.f32.mrf.mxu2  ;;  %v3746_v5 = vpop.f32.mrf.mxu3 }
 0xa45   : > { %v3747_v10 = vadd.f32 %v4926_v41, %v3746_v5  ;;  %v3703_v34 = vadd.f32 %v4925_v47, %v6520_v52  ;;  %v3770_v52 = vsel %vm1509_vm3, %v6539_v55, 0 }
 0xa4c   : > { %v3704_v2 = vpop.f32.mrf.mxu2  ;;  %v3748_v31 = vpop.f32.mrf.mxu3 }
 0xa4d   : > { %v3749_v26 = vadd.f32 %v4926_v41, %v3748_v31  ;;  %v3705_v23 = vadd.f32 %v4925_v47, %v3704_v2 }
 0xa4f   : > { %v6541_v25 = vpack.c.bf16 %v3749_v26, %v3747_v10  ;;  %v3763_v27 = vpack.c.bf16 %v3705_v23, %v3703_v34 }
 0xa51   : > { %v3773_v2 = vsel %vm1509_vm3, %v3763_v27, 0 }
 0xa54   : > { %v3707_v14 = vpop.f32.mrf.mxu2  ;;  %v3751_v45 = vpop.f32.mrf.mxu3 }
 0xa55   : > { %v3752_v13 = vadd.f32 %v4926_v41, %v3751_v45  ;;  %v3708_v7 = vadd.f32 %v4925_v47, %v3707_v14 }
 0xa5c   : > { %v3709_v30 = vpop.f32.mrf.mxu2  ;;  %v3753_v9 = vpop.f32.mrf.mxu3 }
 0xa5d   : > { %v3754_v17 = vadd.f32 %v4926_v41, %v3753_v9  ;;  %v3710_v1 = vadd.f32 %v4925_v47, %v3709_v30 }
 0xa5f   : > { %v3574_v50 = vpop.xlane.xlu2 %3573  ;;  %v6534_v6 = vpack.c.bf16 %v3754_v17, %v3752_v13  ;;  %v6536_v21 = vpack.c.bf16 %v3710_v1, %v3708_v7 }
 0xa60   : > { %v3575_v40 = vmul.f32 %v3574_v50, %v6150_v46 }
 0xa61   : > { %v3579_v20 = vpop.xlane.xlu1 %3578  ;;  %v3776_v54 = vsel %vm1509_vm3, %v6536_v21, 0 }
 0xa62   : > { %v3581_v62 = vmul.f32 %v3575_v40, %v3575_v40  ;;  %v3580_v0 = vmul.f32 %v3579_v20, %v6150_v46  ;;  %v3583_v32 = vsub.f32 %v6511_v15, %v3575_v40  ;;  %v6553_v15 = vpack.c.bf16 %v3744_v3, %v3742_v38 }
 0xa64   : > { %v3582_v36 = vsub.f32 %v3580_v0, %v3581_v62  ;;  %v3712_v57 = vpop.f32.mrf.mxu2  ;;  %v3756_v29 = vpop.f32.mrf.mxu3 }
 0xa65   : > { %v3713_v51 = vadd.f32 %v4925_v47, %v3712_v57  ;;  %v3757_v4 = vadd.f32 %v4926_v41, %v3756_v29  ;;  %v4929_v57 = vld [vmem:[%s6733_s0] ss:$0 sm:$0xff]  ;;  %s6745_s0 = sld [smem:[#allocation24_spill]] }
 0xa66   : > { %v3584_v18 = vadd.f32 1e-05, %v3582_v36 }
 0xa68   : > { %5117 = vrsqrt.f32 %v3584_v18  ;;  %vm3591_vm14 = vweird.f32 %v3584_v18 }
 0xa6c   : > { %v3714_v22 = vpop.f32.mrf.mxu2  ;;  %v3758_v24 = vpop.f32.mrf.mxu3 }
 0xa6d   : > { %v3715_v63 = vadd.f32 %v4925_v47, %v3714_v22  ;;  %v3759_v58 = vadd.f32 %v4926_v41, %v3758_v24 }
 0xa6e   : > { %v5118_v28 = vpop.eup %5117 }
 0xa6f   : > { %v3586_v61 = vmul.f32 %v5118_v28, %v3584_v18  ;;  %v3765_v35 = vpack.c.bf16 %v3715_v63, %v3713_v51  ;;  %v6528_v43 = vpack.c.bf16 %v3759_v58, %v3757_v4  ;;  %vm3592_vm13 = vweird.f32 %v5118_v28 }
 0xa70   : > { %vm3593_vm15 = vmor %vm3591_vm14, %vm3592_vm13 }
 0xa71   : > { %v3587_v56 = vmul.f32 %v5118_v28, %v3586_v61  ;;  %3818 = vmatpush.bf16.msrb.mxu1 %v6528_v43  ;;  %3923 = vrot.lane.b32.xlu1 %v3765_v35, %s6697_s10  ;;  %v3779_v37 = vsel %vm1509_vm3, %v3765_v35, 0 }
 0xa72   : > { %3840 = vrot.lane.b32.xlu2 %v3765_v35, %s5193_s7  ;;  %3785 = vmatpush.bf16.xpose.msrb.mxu0 %v3779_v37 }
 0xa73   : > { %v3588_v39 = vmul.f32 0.5, %v3587_v56 }
 0xa75   : > { %v3589_v11 = vsub.f32 1.5, %v3588_v39  ;;  %3819 = vmatpush.bf16.msrb.mxu1 %v6534_v6 }
 0xa77   : > { %v3590_v33 = vmul.f32 %v5118_v28, %v3589_v11 }
 0xa79   : > { %v3594_v8 = vsel %vm3593_vm15, %v5118_v28, %v3590_v33  ;;  %3820 = vmatpush.bf16.msrb.mxu1 %v6541_v25  ;;  %3834 = vrot.lane.b32.xlu1 %v6539_v55, %s5193_s7 }
 0xa7a   : > { %v3595_v48 = vmul.f32 %v3594_v8, %v3583_v32  ;;  %4002 = vrot.lane.b32.xlu2 %v3765_v35, %s5195_s11  ;;  %3786 = vmatpush.bf16.xpose.msrb.mxu0 %v3776_v54 }
 0xa7c   : > { %v3599_v16 = vmul.f32 %v4927_v53, %v3595_v48 }
 0xa7d   : > { %3821 = vmatpush.bf16.msrb.mxu1 %v6553_v15 }
 0xa7e   : > { %v6557_v12 = vadd.f32 %v4928_v49, %v3599_v16 }
 0xa80   : > { %v3604_v5 = vadd.f32 %v5144_v44, %v6557_v12 }
 0xa82   : > { %3921 = vrot.lane.b32.xlu2 %v6536_v21, %s6697_s10  ;;  %3787 = vmatpush.bf16.xpose.msrb.mxu0 %v3773_v2  ;;  %v3625_v31 = vpack.c.bf16 %v3604_v5, %v3604_v5 }
 0xa84   : > { %4663 = vmatmul.msk.bf16.vlgmr.msra.gmra.mxu1 %vm1355_vm2, %v3625_v31 }
 0xa8a   : > { %3919 = vrot.lane.b32.xlu2 %v3763_v27, %s6697_s10  ;;  %3788 = vmatpush.bf16.xpose.msrb.mxu0 %v3770_v52 }
 0xa92   : > { %3917 = vrot.lane.b32.xlu2 %v6539_v55, %s6697_s10 }
 0xacc   : > { %v3841_v60 = vpop.permute.xlu2 %3840 }
 0xacd   : > { %v3855_v19 = vsel %vm1509_vm3, %v3841_v60, 0 }
 0xace   : > { %3861 = vmatpush.bf16.xpose.msra.mxu1 %v3855_v19 }
 0xad4   : > { %v4003_v14 = vpop.permute.xlu2 %4002 }
 0xad5   : > { %v4017_v45 = vsel %vm1509_vm3, %v4003_v14, 0 }
 0xad6   : > { %4023 = vmatpush.bf16.xpose.msrb.mxu3 %v4017_v45 }
 0xadc   : > { %v3922_v50 = vpop.permute.xlu2 %3921 }
 0xadd   : > { %v3935_v40 = vsel %vm1509_vm3, %v3922_v50, 0 }
 0xae3   : > { %v3924_v30 = vpop.permute.xlu1 %3923 }
 0xae4   : > { %v3938_v9 = vsel %vm1509_vm3, %v3924_v30, 0  ;;  %v3920_v20 = vpop.permute.xlu2 %3919 }
 0xae5   : > { %3944 = vmatpush.bf16.xpose.msrb.mxu2 %v3938_v9  ;;  %v3932_v62 = vsel %vm1509_vm3, %v3920_v20, 0 }
 0xaeb   : > { %v3835_v37 = vpop.permute.xlu1 %3834 }
 0xaec   : > { %v3918_v0 = vpop.permute.xlu2 %3917  ;;  %v3846_v26 = vsel %vm1509_vm3, %v3835_v37, 0 }
 0xaed   : > { %3945 = vmatpush.bf16.xpose.msrb.mxu2 %v3935_v40  ;;  %v3929_v36 = vsel %vm1509_vm3, %v3918_v0, 0 }
 0xaf5   : > { %3946 = vmatpush.bf16.xpose.msrb.mxu2 %v3932_v62 }
 0xafd   : > { %3947 = vmatpush.bf16.xpose.msrb.mxu2 %v3929_v36 }
 0xb01   : > { %v3653_v29 = vpop.f32.mrf.mxu1 }
 0xb02   : > { %v3654_v18 = vadd.f32 %v4929_v57, %v3653_v29 }
 0xb04   : > { %v3761_v47 = vpack.c.bf16 %v3654_v18, %v3654_v18 }
 0xb06   : > { %3994 = vrot.lane.b32.xlu2 %v3761_v47, %s5195_s11  ;;  %3828 = vrot.lane.b32.xlu1 %v3761_v47, %s5193_s7 }
 0xb07   : > { %4688 = vmatmul.msk.bf16.vlgmr.msrb.gmra.mxu0 %vm1509_vm3, %v3761_v47 }
 0xb09   : > { %v3655_v41 = vpop.f32.mrf.mxu1 }
 0xb60   : > { %v3995_v11 = vpop.permute.xlu2 %3994 }
 0xb84   : > { %v3790_v22 = vpop.f32.mrf.mxu0 }
 0xb85   : > { %v3794_v24 = vmul.f32 0.35355338, %v3790_v22 }
 0xb87   : > { %v3795_v51 = vsel %vm1571_vm4, %v3794_v24, -inf }
 0xb88   : > { %3796 = vmax.xlane.f32.xlu0 %v3795_v51 }
 0xb8c   : > { %v3792_v4 = vpop.f32.mrf.mxu0 }
 0xb9c   : > { %3838 = vrot.lane.b32.xlu0 %v6536_v21, %s5193_s7 }
 0xba4   : > { %3836 = vrot.lane.b32.xlu0 %v3763_v27, %s5193_s7 }
 0xbac   : > { %4000 = vrot.lane.b32.xlu0 %v6536_v21, %s5195_s11 }
 0xbb4   : > { %3998 = vrot.lane.b32.xlu0 %v3763_v27, %s5195_s11 }
 0xbbc   : > { %3996 = vrot.lane.b32.xlu0 %v6539_v55, %s5195_s11  ;;  %v3829_v55 = vpop.permute.xlu1 %3828 }
 0xbc4   : > { %3893 = vrot.lane.b32.xlu0 %v6528_v43, %s5193_s7 }
 0xbfb   : > { %v3797_v63 = vpop.xlane.xlu0 %3796 }
 0xbfc   : > { %v3798_v58 = vsub.f32 %v3794_v24, %v3797_v63 }
 0xbfe   : > { %v3799_v28 = vmul.f32 1.442695, %v3798_v58 }
 0xc00   : > { %5119 = vpow2.f32 %v3799_v28 }
 0xc06   : > { %v5120_v17 = vpop.eup %5119 }
 0xc07   : > { %v3801_v61 = vsel %vm1571_vm4, %v5120_v17, 0.0 }
 0xc08   : > { %3802 = vadd.xlane.f32.xlu1 %v3801_v61 }
 0xc0e   : > { %v3839_v35 = vpop.permute.xlu0 %3838 }
 0xc0f   : > { %v3852_v13 = vsel %vm1509_vm3, %v3839_v35, 0 }
 0xc10   : > { %3862 = vmatpush.bf16.xpose.msra.mxu1 %v3852_v13 }
 0xc16   : > { %v3837_v1 = vpop.permute.xlu0 %3836 }
 0xc17   : > { %v3849_v56 = vsel %vm1509_vm3, %v3837_v1, 0 }
 0xc18   : > { %3863 = vmatpush.bf16.xpose.msra.mxu1 %v3849_v56 }
 0xc1e   : > { %v4001_v59 = vpop.permute.xlu0 %4000 }
 0xc1f   : > { %v4014_v7 = vsel %vm1509_vm3, %v4001_v59, 0 }
 0xc20   : > { %3864 = vmatpush.bf16.xpose.msra.mxu1 %v3846_v26  ;;  %4024 = vmatpush.bf16.xpose.msrb.mxu3 %v4014_v7 }
 0xc21   : > { %3915 = vrot.lane.b32.xlu1 %v3761_v47, %s6697_s10 }
 0xc26   : > { %v3999_v39 = vpop.permute.xlu0 %3998 }
 0xc27   : > { %v4011_v42 = vsel %vm1509_vm3, %v3999_v39, 0 }
 0xc28   : > { %4025 = vmatpush.bf16.xpose.msrb.mxu3 %v4011_v42 }
 0xc2e   : > { %v3997_v10 = vpop.permute.xlu0 %3996 }
 0xc2f   : > { %v4008_v21 = vsel %vm1509_vm3, %v3997_v10, 0 }
 0xc30   : > { %4026 = vmatpush.bf16.xpose.msrb.mxu3 %v4008_v21 }
 0xc36   : > { %v3894_v3 = vpop.permute.xlu0 %3893 }
 0xc37   : > { %3906 = vmatpush.bf16.msra.mxu0 %v3894_v3  ;;  %4694 = vmatmul.msk.bf16.vlgmr.msrb.gmra.mxu3 %vm1509_vm3, %v3995_v11 }
 0xc7b   : > { %v3803_v33 = vpop.xlane.xlu1 %3802 }
 0xc7c   : > { %5121 = vrcp.f32 %v3803_v33 }
 0xc82   : > { %v5122_v32 = vpop.eup %5121 }
 0xc83   : > { %v3805_v53 = vmul.f32 %v5122_v32, %v5120_v17 }
 0xc85   : > { %v3806_v38 = vpack.c.bf16 %v3805_v53, %v3805_v53 }
 0xc87   : > { %4689 = vmatmul.msk.bf16.vlgmr.msrb.gmra.mxu1 %vm1571_vm4, %v3806_v38 }
 0xc93   : > { %v3916_v23 = vpop.permute.xlu1 %3915 }
 0xc94   : > { %4692 = vmatmul.msk.bf16.vlgmr.msrb.gmra.mxu2 %vm1509_vm3, %v3916_v23 }
 0xc97   : > { %4690 = vmatmul.msk.bf16.vlgmr.msra.gmra.mxu1 %vm1509_vm3, %v3829_v55 }
 0xcba   : > { %v4028_v8 = vpop.f32.mrf.mxu3 }
 0xcbb   : > { %v4032_v54 = vmul.f32 0.35355338, %v4028_v8 }
 0xcbd   : > { %v4033_v49 = vsel %vm1571_vm4, %v4032_v54, -inf }
 0xcbe   : > { %4034 = vmax.xlane.f32.xlu2 %v4033_v49 }
 0xcc2   : > { %v4030_v48 = vpop.f32.mrf.mxu3 }
 0xcd6   : > { %3891 = vrot.lane.b32.xlu2 %v6534_v6, %s5193_s7 }
 0xcde   : > { %3972 = vrot.lane.b32.xlu2 %v6528_v43, %s6697_s10 }
 0xd04   : > { %v6608_v34 = vpop.f32.mrf.mxu1 }
 0xd0c   : > { %v3825_v16 = vpop.f32.mrf.mxu1 }
 0xd14   : > { %v3866_v27 = vpop.f32.mrf.mxu1 }
 0xd15   : > { %v3870_v44 = vmul.f32 0.35355338, %v3866_v27 }
 0xd17   : > { %v3949_v5 = vpop.f32.mrf.mxu2  ;;  %v3871_v2 = vsel %vm1571_vm4, %v3870_v44, -inf }
 0xd18   : > { %v3953_v31 = vmul.f32 0.35355338, %v3949_v5  ;;  %3872 = vmax.xlane.f32.xlu0 %v3871_v2 }
 0xd1a   : > { %v3954_v52 = vsel %vm1571_vm4, %v3953_v31, -inf }
 0xd1b   : > { %3955 = vmax.xlane.f32.xlu1 %v3954_v52 }
 0xd1c   : > { %v3868_v60 = vpop.f32.mrf.mxu1 }
 0xd1f   : > { %v3951_v19 = vpop.f32.mrf.mxu2 }
 0xd2c   : > { %3887 = vrot.lane.b32.xlu0 %v6553_v15, %s5193_s7 }
 0xd31   : > { %v4035_v14 = vpop.xlane.xlu2 %4034 }
 0xd32   : > { %v4036_v22 = vsub.f32 %v4032_v54, %v4035_v14 }
 0xd34   : > { %4051 = vrot.lane.b32.xlu0 %v6528_v43, %s5195_s11  ;;  %v4037_v24 = vmul.f32 1.442695, %v4036_v22 }
 0xd39   : > { %v3892_v45 = vpop.permute.xlu2 %3891 }
 0xd3a   : > { %3907 = vmatpush.bf16.msra.mxu0 %v3892_v45 }
 0xd3c   : > { %3970 = vrot.lane.b32.xlu0 %v6534_v6, %s6697_s10 }
 0xd41   : > { %v3973_v17 = vpop.permute.xlu2 %3972 }
 0xd44   : > { %4049 = vrot.lane.b32.xlu0 %v6534_v6, %s5195_s11 }
 0xd4c   : > { %3968 = vrot.lane.b32.xlu0 %v6541_v25, %s6697_s10 }
 0xd54   : > { %4047 = vrot.lane.b32.xlu0 %v6541_v25, %s5195_s11 }
 0xd5c   : > { %3966 = vrot.lane.b32.xlu0 %v6553_v15, %s6697_s10  ;;  %s6744_s10 = sld [smem:[#allocation21_spill]] }
 0xd64   : > { %4045 = vrot.lane.b32.xlu0 %v6553_v15, %s5195_s11  ;;  %s6737_s11 = sld [smem:[#allocation15_spill]] }
 0xd6a   : > { %v4930_v27 = vld [vmem:[%s6737_s11] ss:$0 sm:$0xff]  ;;  %s6741_s11 = sld [smem:[#allocation16_spill]] }
 0xd8b   : > { %v3873_v43 = vpop.xlane.xlu0 %3872 }
 0xd8c   : > { %v3874_v30 = vsub.f32 %v3870_v44, %v3873_v43 }
 0xd8e   : > { %v3875_v9 = vmul.f32 1.442695, %v3874_v30  ;;  %v3956_v50 = vpop.xlane.xlu1 %3955 }
 0xd8f   : > { %v3957_v40 = vsub.f32 %v3953_v31, %v3956_v50  ;;  %v4790_v50 = vld [vmem:[%s6740_s26 + $0x18] sm:$0xff] }
 0xd90   : > { %5123 = vpow2.f32 %v3875_v9  ;;  %4237 = vmatpush.bf16.msra.mxu2 %v4790_v50 }
 0xd91   : > { %v3958_v20 = vmul.f32 1.442695, %v3957_v40 }
 0xd93   : > { %5125 = vpow2.f32 %v3958_v20  ;;  %v4789_v20 = vld [vmem:[%s6740_s26 + $0x10] sm:$0xff] }
 0xd94   : > { %5127 = vpow2.f32 %v4037_v24  ;;  %4238 = vmatpush.bf16.msra.mxu2 %v4789_v20  ;;  %v4938_v20 = vld [vmem:[%s5403_s14] ss:$0 sm:$0xff] }
 0xd96   : > { %v5124_v6 = vpop.eup %5123 }
 0xd97   : > { %v3877_v62 = vsel %vm1571_vm4, %v5124_v6, 0.0 }
 0xd98   : > { %3878 = vadd.xlane.f32.xlu1 %v3877_v62 }
 0xd99   : > { %v5126_v0 = vpop.eup %5125 }
 0xd9a   : > { %v3960_v36 = vsel %vm1571_vm4, %v5126_v0, 0.0  ;;  %v5128_v63 = vpop.eup %5127 }
 0xd9b   : > { %3961 = vadd.xlane.f32.xlu2 %v3960_v36  ;;  %v4039_v58 = vsel %vm1571_vm4, %v5128_v63, 0.0 }
 0xd9e   : > { %v3888_v57 = vpop.permute.xlu0 %3887 }
 0xda6   : > { %v4052_v29 = vpop.permute.xlu0 %4051 }
 0xda7   : > { %4064 = vmatpush.bf16.msrb.mxu1 %v4052_v29 }
 0xdae   : > { %v3971_v15 = vpop.permute.xlu0 %3970 }
 0xdb1   : > { %3889 = vrot.lane.b32.xlu1 %v6541_v25, %s5193_s7  ;;  %s6736_s7 = sld [smem:[#allocation14_spill]] }
 0xdb6   : > { %v4050_v18 = vpop.permute.xlu0 %4049 }
 0xdb7   : > { %4065 = vmatpush.bf16.msrb.mxu1 %v4050_v18  ;;  %v4784_v32 = vld [vmem:[%s6736_s7 + $0x8] sm:$0xff]  ;;  %v4783_v53 = vld [vmem:[%s6736_s7] sm:$0xff] }
 0xdbe   : > { %v3969_v47 = vpop.permute.xlu0 %3968 }
 0xdc6   : > { %v4048_v41 = vpop.permute.xlu0 %4047 }
 0xdc7   : > { %4066 = vmatpush.bf16.msrb.mxu1 %v4048_v41 }
 0xdce   : > { %v3967_v51 = vpop.permute.xlu0 %3966 }
 0xdd6   : > { %v4046_v4 = vpop.permute.xlu0 %4045 }
 0xdd7   : > { %4067 = vmatpush.bf16.msrb.mxu1 %v4046_v4 }
 0xddb   : > { %4040 = vadd.xlane.f32.xlu1 %v4039_v58  ;;  %v4788_v58 = vld [vmem:[%s6740_s26 + $0x8] sm:$0xff] }
 0xddc   : > { %4239 = vmatpush.bf16.msra.mxu2 %v4788_v58 }
 0xe0b   : > { %v3879_v28 = vpop.xlane.xlu1 %3878 }
 0xe0c   : > { %5129 = vrcp.f32 %v3879_v28  ;;  %v4787_v28 = vld [vmem:[%s6740_s26] sm:$0xff] }
 0xe0d   : > { %4240 = vmatpush.bf16.msra.mxu2 %v4787_v28 }
 0xe0e   : > { %v3962_v1 = vpop.xlane.xlu2 %3961 }
 0xe0f   : > { %5131 = vrcp.f32 %v3962_v1 }
 0xe12   : > { %v5130_v61 = vpop.eup %5129 }
 0xe13   : > { %v3881_v35 = vmul.f32 %v5130_v61, %v5124_v6 }
 0xe15   : > { %v3882_v13 = vpack.c.bf16 %v3881_v35, %v3881_v35  ;;  %v5132_v56 = vpop.eup %5131 }
 0xe16   : > { %v3964_v37 = vmul.f32 %v5132_v56, %v5126_v0  ;;  %v4934_v56 = vld [vmem:[%s6744_s10] ss:$0 sm:$0xff]  ;;  %s6747_s10 = sld [smem:[#allocation23_spill]] }
 0xe18   : > { %v3965_v59 = vpack.c.bf16 %v3964_v37, %v3964_v37 }
 0xe23   : > { %v3890_v25 = vpop.permute.xlu1 %3889 }
 0xe24   : > { %3908 = vmatpush.bf16.msra.mxu0 %v3890_v25 }
 0xe28   : > { %3909 = vmatpush.bf16.msra.mxu0 %v3888_v57 }
 0xe2b   : > { %4691 = vmatmul.msk.bf16.vlgmr.msra.gmra.mxu0 %vm1571_vm4, %v3882_v13 }
 0xe2c   : > { %3985 = vmatpush.bf16.msrb.mxu0 %v3973_v17 }
 0xe30   : > { %3986 = vmatpush.bf16.msrb.mxu0 %v3971_v15 }
 0xe34   : > { %3987 = vmatpush.bf16.msrb.mxu0 %v3969_v47  ;;  %v4931_v47 = vld [vmem:[%s6741_s11] ss:$0 sm:$0xff]  ;;  %s6748_s11 = smov 112  }
 0xe38   : > { %3988 = vmatpush.bf16.msrb.mxu0 %v3967_v51 }
 0xe3b   : > { %4693 = vmatmul.msk.bf16.vlgmr.msrb.gmra.mxu0 %vm1571_vm4, %v3965_v59 }
 0xe3c   : > { %4113 = vmatpush.bf16.msra.mxu0 %v4784_v32 }
 0xe40   : > { %4114 = vmatpush.bf16.msra.mxu0 %v4783_v53 }
 0xe4e   : > { %v4041_v26 = vpop.xlane.xlu1 %4040 }
 0xe4f   : > { %5133 = vrcp.f32 %v4041_v26 }
 0xe55   : > { %v5134_v7 = vpop.eup %5133 }
 0xe56   : > { %v4043_v39 = vmul.f32 %v5134_v7, %v5128_v63 }
 0xe58   : > { %v4044_v42 = vpack.c.bf16 %v4043_v39, %v4043_v39 }
 0xe5a   : > { %4695 = vmatmul.msk.bf16.vlgmr.msrb.gmra.mxu1 %vm1571_vm4, %v4044_v42 }
 0xea8   : > { %v3911_v10 = vpop.f32.mrf.mxu0 }
 0xea9   : > { %4074 = vrot.lane.b32.xlu2 %v3911_v10, %s5196_s15  ;;  %s6739_s15 = sld [smem:[#allocation18_spill]] }
 0xeaf   : > { %v4786_v19 = vld [vmem:[%s6739_s15 + $0x8] sm:$0xff]  ;;  %v4785_v14 = vld [vmem:[%s6739_s15] sm:$0xff] }
 0xeb0   : > { %v3913_v21 = vpop.f32.mrf.mxu0  ;;  %4194 = vmatpush.bf16.msra.mxu1 %v4786_v19  ;;  %v4794_v19 = vld [vmem:[%s5398_s30 + $0x8] sm:$0xff] }
 0xeb1   : > { %v4792_v21 = vld [vmem:[%s6745_s0 + $0x8] sm:$0xff]  ;;  %4352 = vmatpush.bf16.msrb.mxu0 %v4794_v19 }
 0xeb2   : > { %4311 = vmatpush.bf16.msra.mxu3 %v4792_v21 }
 0xeb4   : > { %4195 = vmatpush.bf16.msra.mxu1 %v4785_v14  ;;  %v4793_v14 = vld [vmem:[%s5398_s30] sm:$0xff] }
 0xeb5   : > { %4353 = vmatpush.bf16.msrb.mxu0 %v4793_v14 }
 0xeb8   : > { %v3990_v11 = vpop.f32.mrf.mxu0 }
 0xeb9   : > { %4078 = vrot.lane.b32.xlu1 %v3990_v11, %s6696_s18  ;;  %s6743_s18 = sld [smem:[#allocation19_spill]]  ;;  %v4791_v11 = vld [vmem:[%s6745_s0] sm:$0xff] }
 0xeba   : > { %4312 = vmatpush.bf16.msra.mxu3 %v4791_v11 }
 0xebf   : > { %v4933_v17 = vld [vmem:[%s6743_s18] ss:$0 sm:$0xff]  ;;  %s6746_s18 = sld [smem:[#allocation22_spill]] }
 0xec0   : > { %v3992_v3 = vpop.f32.mrf.mxu0 }
 0xed7   : > { %v4069_v55 = vpop.f32.mrf.mxu1 }
 0xed8   : > { %4082 = vrot.lane.b32.xlu0 %v4069_v55, %s6738_s16  ;;  %s6742_s16 = sld [smem:[#allocation17_spill]] }
 0xede   : > { %v4932_v22 = vld [vmem:[%s6742_s16] ss:$0 sm:$0xff]  ;;  %s6749_s16 = smov 16  }
 0xedf   : > { %v4071_v33 = vpop.f32.mrf.mxu1 }
 0xf03   : > { %v4075_v38 = vpop.permute.xlu2 %4074 }
 0xf04   : > { %v4085_v8 = vsel %vm1509_vm3, %v6608_v34, %v4075_v38 }
 0xf2b   : > { %v4079_v23 = vpop.permute.xlu1 %4078 }
 0xf2c   : > { %v4086_v54 = vsel %vm2491_vm5, %v4085_v8, %v4079_v23 }
 0xf4a   : > { %v4083_v49 = vpop.permute.xlu0 %4082 }
 0xf4b   : > { %v4087_v48 = vsel %vm2500_vm6, %v4086_v54, %v4083_v49 }
 0xf4c   : > { %v4088_v16 = vpack.c.bf16 %v4087_v48, %v4087_v48 }
 0xf4e   : > { %4704 = vmatmul.msk.bf16.vlgmr.msra.gmra.mxu0 %vm1355_vm2, %v4088_v16 }
 0xfcb   : > { %v4116_v44 = vpop.f32.mrf.mxu0 }
 0xfcc   : > { %v4117_v5 = vadd.f32 %v4930_v27, %v4116_v44 }
 0xfce   : > { %v4120_v2 = vadd.f32 %v4117_v5, %v6557_v12  ;;  %v4935_v5 = vld [vmem:[%s6746_s18] ss:$0 sm:$0xff]  ;;  %s4486_s18 = sshll.u32 %s6751_s1, 3 }
 0xfd0   : > { %v4123_v31 = vsel %vm1355_vm2, %v4120_v2, 0.0  ;;  %v4127_v52 = vmul.f32 %v4120_v2, %v4120_v2 }
 0xfd1   : > { %4124 = vadd.xlane.f32.xlu0 %v4123_v31 }
 0xfd2   : > { %v4128_v34 = vsel %vm1355_vm2, %v4127_v52, 0.0 }
 0xfd3   : > { %v4118_v60 = vpop.f32.mrf.mxu0  ;;  %4129 = vadd.xlane.f32.xlu2 %v4128_v34 }
0x1044   : > { %v4125_v45 = vpop.xlane.xlu0 %4124 }
0x1045   : > { %v4126_v43 = vmul.f32 %v4125_v45, %v6150_v46  ;;  %v4937_v45 = vld [vmem:[%s5393_s24] ss:$0 sm:$0xff] }
0x1046   : > { %v4130_v30 = vpop.xlane.xlu2 %4129 }
0x1047   : > { %v4132_v9 = vmul.f32 %v4126_v43, %v4126_v43  ;;  %v4131_v12 = vmul.f32 %v4130_v30, %v6150_v46  ;;  %v4134_v18 = vsub.f32 %v4120_v2, %v4126_v43 }
0x1049   : > { %v4133_v40 = vsub.f32 %v4131_v12, %v4132_v9 }
0x104b   : > { %v4135_v6 = vadd.f32 1e-05, %v4133_v40 }
0x104d   : > { %5135 = vrsqrt.f32 %v4135_v6  ;;  %vm4142_vm6 = vweird.f32 %v4135_v6 }
0x1053   : > { %v5136_v62 = vpop.eup %5135 }
0x1054   : > { %v4137_v0 = vmul.f32 %v5136_v62, %v4135_v6  ;;  %vm4143_vm3 = vweird.f32 %v5136_v62 }
0x1055   : > { %vm4144_vm0 = vmor %vm4142_vm6, %vm4143_vm3 }
0x1056   : > { %v4138_v36 = vmul.f32 %v5136_v62, %v4137_v0 }
0x1058   : > { %v4139_v57 = vmul.f32 0.5, %v4138_v36 }
0x105a   : > { %v4140_v29 = vsub.f32 1.5, %v4139_v57 }
0x105c   : > { %v4141_v15 = vmul.f32 %v5136_v62, %v4140_v29 }
0x105e   : > { %v4145_v41 = vsel %vm4144_vm0, %v5136_v62, %v4141_v15 }
0x105f   : > { %v4146_v24 = vmul.f32 %v4145_v41, %v4134_v18 }
0x1061   : > { %v4150_v51 = vmul.f32 %v4931_v47, %v4146_v24 }
0x1063   : > { %v4154_v4 = vadd.f32 %v4932_v22, %v4150_v51 }
0x1065   : > { %v4169_v63 = vpack.c.bf16 %v4154_v4, %v4154_v4 }
0x1067   : > { %4713 = vmatmul.msk.bf16.vlgmr.msra.gmra.mxu1 %vm1355_vm2, %v4169_v63 }
0x10e4   : > { %v4197_v61 = vpop.f32.mrf.mxu1 }
0x10e5   : > { %v4198_v25 = vadd.f32 %v4933_v17, %v4197_v61 }
0x10e7   : > { %v4201_v35 = vmax.f32 %v4198_v25, 0.0 }
0x10e9   : > { %v4202_v13 = vpack.c.bf16 %v4201_v35, %v4201_v35 }
0x10eb   : > { %4730 = vmatmul.msk.bf16.vlgmr.msra.gmra.mxu2 %vm1571_vm4, %v4202_v13 }
0x10ec   : > { %v4199_v1 = vpop.f32.mrf.mxu1 }
0x116e   : > { %v4242_v37 = vpop.f32.mrf.mxu2 }
0x116f   : > { %v4243_v59 = vadd.f32 %v4934_v56, %v4242_v37 }
0x1171   : > { %v4246_v26 = vadd.f32 %v4243_v59, %v4154_v4 }
0x1173   : > { %v4249_v7 = vsel %vm1355_vm2, %v4246_v26, 0.0  ;;  %v4253_v39 = vmul.f32 %v4246_v26, %v4246_v26 }
0x1174   : > { %4250 = vadd.xlane.f32.xlu1 %v4249_v7 }
0x1175   : > { %v4254_v42 = vsel %vm1355_vm2, %v4253_v39, 0.0 }
0x1176   : > { %v4244_v10 = vpop.f32.mrf.mxu2  ;;  %4255 = vadd.xlane.f32.xlu0 %v4254_v42 }
0x11e7   : > { %v4251_v3 = vpop.xlane.xlu1 %4250 }
0x11e8   : > { %v4252_v55 = vmul.f32 %v4251_v3, %v6150_v46 }
0x11e9   : > { %v4256_v33 = vpop.xlane.xlu0 %4255 }
0x11ea   : > { %v4258_v32 = vmul.f32 %v4252_v55, %v4252_v55  ;;  %v4257_v53 = vmul.f32 %v4256_v33, %v6150_v46  ;;  %v4260_v44 = vsub.f32 %v4246_v26, %v4252_v55  ;;  %v4936_v46 = vld [vmem:[%s6747_s10] ss:$0 sm:$0xff]  ;;  %s1208_s10 = scalar_lea.vmem %s5408_s6, %s4486_s18 }
0x11ec   : > { %v4259_v38 = vsub.f32 %v4257_v53, %v4258_v32 }
0x11ee   : > { %v4261_v23 = vadd.f32 1e-05, %v4259_v38 }
0x11f0   : > { %5137 = vrsqrt.f32 %v4261_v23  ;;  %vm4268_vm1 = vweird.f32 %v4261_v23 }
0x11f6   : > { %v5138_v8 = vpop.eup %5137 }
0x11f7   : > { %v4263_v54 = vmul.f32 %v5138_v8, %v4261_v23  ;;  %vm4269_vm4 = vweird.f32 %v5138_v8 }
0x11f8   : > { %vm4270_vm7 = vmor %vm4268_vm1, %vm4269_vm4 }
0x11f9   : > { %v4264_v49 = vmul.f32 %v5138_v8, %v4263_v54 }
0x11fb   : > { %v4265_v48 = vmul.f32 0.5, %v4264_v49 }
0x11fd   : > { %v4266_v16 = vsub.f32 1.5, %v4265_v48 }
0x11ff   : > { %v4267_v27 = vmul.f32 %v5138_v8, %v4266_v16 }
0x1201   : > { %v4271_v2 = vsel %vm4270_vm7, %v5138_v8, %v4267_v27 }
0x1202   : > { %v4272_v31 = vmul.f32 %v4271_v2, %v4260_v44 }
0x1204   : > { %v4276_v52 = vmul.f32 %v4935_v5, %v4272_v31 }
0x1206   : > { %v4280_v34 = vadd.f32 %v4936_v46, %v4276_v52 }
0x1208   : > { %v4281_v60 = vpack.c.bf16 %v4280_v34, %v4280_v34 }
0x120a   : > { %4739 = vmatmul.msk.bf16.vlgmr.msra.gmra.mxu3 %vm1355_vm2, %v4281_v60 }
0x128d   : > { %v4314_v43 = vpop.f32.mrf.mxu3 }
0x128e   : > { %v4315_v30 = vadd.f32 %v4937_v45, %v4314_v43 }
0x1290   : > { %v4318_v9 = vmax.f32 %v4315_v30, 0.0 }
0x1292   : > { %v4319_v12 = vpack.c.bf16 %v4318_v9, %v4318_v9 }
0x1294   : > { %4329 = vrot.lane.b32.xlu2 %v4319_v12, %s6748_s11 }
0x1295   : > { %v4316_v50 = vpop.f32.mrf.mxu3 }
0x12ee   : > { %v4330_v40 = vpop.permute.xlu2 %4329 }
0x12ef   : > { %4748 = vmatmul.msk.bf16.vlgmr.msrb.gmra.mxu0 %vm1355_vm2, %v4330_v40 }
0x136c   : > { %v4355_v6 = vpop.f32.mrf.mxu0 }
0x136d   : > { %v4356_v62 = vadd.f32 %v4938_v20, %v4355_v6 }
0x136f   : > { %v4749_v0 = vmul.f32 -1.442695, %v4356_v62 }
0x1371   : > { %5139 = vpow2.f32 %v4749_v0 }
0x1374   : > { %v4357_v36 = vpop.f32.mrf.mxu0 }
0x1377   : > { %v5140_v57 = vpop.eup %5139 }
0x1378   : > { %v4362_v29 = vadd.f32 1.0, %v5140_v57 }
0x137a   : > { %5141 = vrcp.f32 %v4362_v29  ;;  %v4374_v41 = vand.u32 2147483648, %v4362_v29  ;;  %v4372_v24 = vand.u32 2147483647, %v4362_v29  ;;  %vm4368_vm2 = vweird.f32 %v4362_v29 }
0x137c   : > { %v4375_v4 = vor.u32 1.1754944e-38, %v4374_v41  ;;  %vm4373_vm10 = vcmp.eq.f32.partialorder %v4372_v24, 8.507059e+37 }
0x1380   : > { %v5142_v15 = vpop.eup %5141 }
0x1381   : > { %v4364_v18 = vmul.f32 %v5142_v15, %v4362_v29  ;;  %vm4369_vm8 = vweird.f32 %v5142_v15 }
0x1382   : > { %vm4370_vm9 = vmor %vm4368_vm2, %vm4369_vm8 }
0x1383   : > { %v4365_v47 = vsub.f32 1.0, %v4364_v18 }
0x1385   : > { %v4366_v22 = vmul.f32 %v5142_v15, %v4365_v47 }
0x1387   : > { %v4367_v51 = vadd.f32 %v5142_v15, %v4366_v22 }
0x1389   : > { %v4371_v63 = vsel %vm4370_vm9, %v5142_v15, %v4367_v51 }
0x138a   : > { %v4376_v58 = vsel %vm4373_vm10, %v4375_v4, %v4371_v63 }
0x138b   : > { %4379 = vrot.lane.b32.xlu0 %v4376_v58, %s6749_s16 }
0x13fd   : > { %v4380_v28 = vpop.permute.xlu0 %4379 }
0x13fe   : > { %v4382_v17 = vsel %vm2491_vm5, %v4315_v30, %v4380_v28 }
0x13ff   : > { %v4384_v61 = vsel %vm4383_vm11, %v4382_v17, 0.0 }
0x1400   : > { %4385 = vst [vmem:[%s1208_s10] sm:$0xff] %v4384_v61 }
0x1401 PF: > { %s91_s28 = sadd.s32 1, %s5151_s28  }
0x1402   : > { %p88_p4 = scmp.ge.s32.totalorder %s91_s28, 4  }
0x1404   :  { %90 = sbr.rel (!%p88_p4) target bundleno = 75 (0x4b), region = 250 }

</bundles_post_ra>
